<compile_context>
chip_gen: v7x
topology: tpu7x:2x2x1
jax: 0.10.0
libtpu: 0.0.40
codegen_flags: <defaults>
</compile_context>

<pallas_src>
import jax
import jax.numpy as jnp
from jax import lax
from jax.experimental import pallas as pl
from jax.experimental.pallas import tpu as pltpu


_PAD_W = 8  # left/right zero padding of the W (sublane) axis of the f32
            # activation scratch; keeps every interior store (8,128)-aligned.


def _make_fused_kernel(H, W, Cin, F, Cout, L, scale):
    """Whole-network fused kernel factory (one batch element per grid step)."""
    PW = _PAD_W

    def conv3x3(src_ref, w_dh, bias, Co):
        """3x3 'same' conv of the zero-bordered activation held in src_ref.

        src_ref: VMEM ref (H+2, W+2*PW, C) f32; interior at [1:H+1, PW:PW+W, :],
                 border (the conv halo) is all zeros.
        w_dh(dh): (3*C, Co) bf16 weight slab for kernel row dh (dw-major,
                  c-minor im2col layout).
        Returns the (H*W, Co) f32 accumulator (+ bias if given).
        """
        C = src_ref.shape[-1]
        # Hoisted im2col: build the dw lane-concat ONCE per conv.  The three
        # per-dh reads below only slice its leading (non-tiled) axis.
        e = jnp.concatenate(
            [src_ref[:, PW - 1 + dw:PW - 1 + dw + W, :] for dw in range(3)],
            axis=-1).astype(jnp.bfloat16)            # (H+2, W, 3C) bf16
        acc = jnp.zeros((H * W, Co), jnp.float32)
        for dh in range(3):                          # 3 back-to-back MXU dots
            acc = acc + jnp.dot(e[dh:dh + H].reshape(H * W, 3 * C), w_dh(dh),
                                preferred_element_type=jnp.float32)
        if bias is not None:
            acc = acc + bias                         # bias/ReLU after the dots
        return acc

    def kernel(x_ref, w_in_ref, b_in_ref, w_res_ref, b_res_ref, w_out_ref,
               o_ref, xp_s, h_s, t_s):
        # Zero ONLY the 1-px halo of the scratch buffers; interiors are fully
        # rewritten below.  Unconditional per step (safe under megacore).
        def zero_halo(ref):
            C = ref.shape[-1]
            zr = jnp.zeros((W, C), ref.dtype)
            ref[0, PW:PW + W, :] = zr
            ref[H + 1, PW:PW + W, :] = zr
            zc = jnp.zeros((H + 2, PW, C), ref.dtype)
            ref[:, 0:PW, :] = zc
            ref[:, PW + W:PW + W + PW, :] = zc

        zero_halo(xp_s)
        zero_halo(h_s)
        zero_halo(t_s)

        # ---------------- input conv + bias + ReLU -------------------------
        xp_s[1:H + 1, PW:PW + W, :] = x_ref[0]
        a = conv3x3(xp_s, lambda dh: w_in_ref[dh], b_in_ref[...], F)
        h_s[1:H + 1, PW:PW + W, :] = jnp.maximum(a, 0.0).reshape(H, W, F)

        # ---------------- residual blocks: h += scale*conv(relu(conv(h))) --
        def res_block(l, carry):
            a1 = conv3x3(h_s, lambda dh: w_res_ref[l, dh],
                         b_res_ref[l, 0], F)
            t_s[1:H + 1, PW:PW + W, :] = jnp.maximum(a1, 0.0).reshape(H, W, F)
            a2 = conv3x3(t_s, lambda dh: w_res_ref[l, 3 + dh],
                         b_res_ref[l, 1], F)
            h_s[1:H + 1, PW:PW + W, :] = (h_s[1:H + 1, PW:PW + W, :]
                                          + scale * a2.reshape(H, W, F))
            return carry

        lax.fori_loop(0, L, res_block, 0)

        # ---------------- output conv (no bias) + global skip --------------
        out = conv3x3(h_s, lambda dh: w_out_ref[dh], None, Cout)
        skip = x_ref[0, :, :, 2:2 + Cout]       # == x[:, 2:, :, :] in NCHW
        o_ref[0] = out.reshape(H, W, Cout) + skip

    return kernel


# ----------------------------- model wrapper --------------------------------

def init_params(key, in_channels, out_channels, num_layers, feature_dim):
    """Deterministic synthetic parameters (shapes match the PyTorch module)."""
    n_keys = 2 + 4 * num_layers + 1
    keys = list(jax.random.split(key, n_keys))

    def w_init(k, cin, cout):
        return (0.05 * jax.random.normal(k, (3, 3, cin, cout))).astype(jnp.float32)

    def b_init(k, cout):
        return (0.05 * jax.random.normal(k, (cout,))).astype(jnp.float32)

    it = iter(keys)
    params = {
        "w_in": w_init(next(it), in_channels, feature_dim),
        "b_in": b_init(next(it), feature_dim),
        "res": [],
        "w_out": None,
    }
    for _ in range(num_layers):
        wa = w_init(next(it), feature_dim, feature_dim)
        ba = b_init(next(it), feature_dim)
        wb = w_init(next(it), feature_dim, feature_dim)
        bb = b_init(next(it), feature_dim)
        params["res"].append((wa, ba, wb, bb))
    params["w_out"] = w_init(next(it), feature_dim, out_channels)
    return params


def dsen2cr_forward(x_nchw, params, res_scale=0.1):
    """DSen2_CR forward: x[:, 2:, :, :] + blocks(x), NCHW in/out."""
    # TODO(synk): for production shapes, feed NCHW directly and emit a
    # lane-dense NCHW output from inside the kernel (needs an in-kernel
    # CHW<->HWC relayout); at toy sizes these two transposes are negligible
    # and kept for lowering robustness.
    x = jnp.transpose(x_nchw, (0, 2, 3, 1)).astype(jnp.float32)   # NCHW -> NHWC
    N, H, W, Cin = x.shape
    F = params["w_in"].shape[-1]
    Cout = params["w_out"].shape[-1]
    L = len(params["res"])
    assert Cout == Cin - 2, "skip connection requires out_channels == in_channels - 2"

    wdt = jnp.bfloat16
    # Per-kernel-row weight slabs (dh on the leading, untiled axis -> no
    # unaligned sublane slicing in-kernel), bf16 storage.
    w_in = params["w_in"].reshape(3, 3 * Cin, F).astype(wdt)        # (3, 3Cin, F)
    b_in = params["b_in"].reshape(1, F).astype(jnp.float32)
    w_res = jnp.stack(
        [jnp.concatenate([wa.reshape(3, 3 * F, F), wb.reshape(3, 3 * F, F)],
                         axis=0)
         for (wa, _, wb, _) in params["res"]]).astype(wdt)          # (L, 6, 3F, F)
    b_res = jnp.stack([jnp.stack([ba.reshape(1, F), bb.reshape(1, F)])
                       for (_, ba, _, bb) in params["res"]]
                      ).astype(jnp.float32)                         # (L, 2, 1, F)
    w_out = params["w_out"].reshape(3, 3 * F, Cout).astype(wdt)     # (3, 3F, Cout)

    kernel = _make_fused_kernel(H, W, Cin, F, Cout, L, res_scale)

    flops = 2 * N * H * W * 9 * (Cin * F + 2 * L * F * F + F * Cout)
    bytes_accessed = int(4 * (x.size + N * H * W * Cout + b_in.size + b_res.size)
                         + 2 * (w_in.size + w_res.size + w_out.size))

    # Explicit scoped-VMEM budget: scratch + double-buffered blocks + headroom.
    PW = _PAD_W
    scratch_b = 4 * (H + 2) * (W + 2 * PW) * (Cin + 2 * F)
    blocks_b = 2 * (4 * H * W * (Cin + Cout)
                    + 2 * (w_in.size + w_res.size + w_out.size)
                    + 4 * (b_in.size + b_res.size))
    vmem_limit = int(min(96 * 1024 * 1024,
                         max(32 * 1024 * 1024, 2 * (scratch_b + blocks_b))))

    out_nhwc = pl.pallas_call(
        kernel,
        out_shape=jax.ShapeDtypeStruct((N, H, W, Cout), jnp.float32),
        grid=(N,),
        in_specs=[
            pl.BlockSpec((1, H, W, Cin), lambda n: (n, 0, 0, 0)),
            pl.BlockSpec((3, 3 * Cin, F), lambda n: (0, 0, 0)),
            pl.BlockSpec((1, F), lambda n: (0, 0)),
            pl.BlockSpec((L, 6, 3 * F, F), lambda n: (0, 0, 0, 0)),
            pl.BlockSpec((L, 2, 1, F), lambda n: (0, 0, 0, 0)),
            pl.BlockSpec((3, 3 * F, Cout), lambda n: (0, 0, 0)),
        ],
        out_specs=pl.BlockSpec((1, H, W, Cout), lambda n: (n, 0, 0, 0)),
        scratch_shapes=[
            pltpu.VMEM((H + 2, W + 2 * _PAD_W, Cin), jnp.float32),  # padded x
            pltpu.VMEM((H + 2, W + 2 * _PAD_W, F), jnp.float32),    # padded h
            pltpu.VMEM((H + 2, W + 2 * _PAD_W, F), jnp.float32),    # padded tmp
        ],
        compiler_params=pltpu.CompilerParams(
            dimension_semantics=("parallel",),
            vmem_limit_bytes=vmem_limit),
        cost_estimate=pl.CostEstimate(
            flops=flops, transcendentals=0, bytes_accessed=bytes_accessed),
    )(x, w_in, b_in, w_res, b_res, w_out)

    return jnp.transpose(out_nhwc, (0, 3, 1, 2))   # NHWC -> NCHW


# ----------------------------- pure-JAX reference ---------------------------

def _conv_ref(x, w, b=None):
    y = lax.conv_general_dilated(
        x, w, window_strides=(1, 1), padding="SAME",
        dimension_numbers=("NHWC", "HWIO", "NHWC"))
    if b is not None:
        y = y + b.reshape(1, 1, 1, -1)
    return y


def dsen2cr_ref(x_nchw, params, res_scale=0.1):
    x = jnp.transpose(x_nchw, (0, 2, 3, 1)).astype(jnp.float32)
    skip = x[..., 2:]
    h = jax.nn.relu(_conv_ref(x, params["w_in"], params["b_in"]))
    for (wa, ba, wb, bb) in params["res"]:
        t = jax.nn.relu(_conv_ref(h, wa, ba))
        h = h + res_scale * _conv_ref(t, wb, bb)
    out = skip + _conv_ref(h, params["w_out"])
    return jnp.transpose(out, (0, 3, 1, 2))


# ----------------------------------- main ------------------------------------

if __name__ == "__main__":
    # Small shapes consistent with the module: out_channels = in_channels - 2
    # (required by the x[:, 2:, :, :] + blocks(x) skip connection).
    N, IN_C, OUT_C, H, W = 2, 6, 4, 16, 16
    NUM_LAYERS, FEATURE_DIM = 2, 32

    key = jax.random.PRNGKey(0)
    k_x, k_p = jax.random.split(key)
    x = jax.random.normal(k_x, (N, IN_C, H, W), dtype=jnp.float32)
    params = init_params(k_p, IN_C, OUT_C, NUM_LAYERS, FEATURE_DIM)

    out = dsen2cr_forward(x, params)
    out = jax.block_until_ready(out)

    ref = jax.block_until_ready(dsen2cr_ref(x, params))
    assert out.shape == (N, OUT_C, H, W), out.shape
    # bf16 weights / bf16 MXU inputs (f32 accumulation) vs the f32 reference
    # -> looser tolerance than the pure-f32 version.
    assert jnp.allclose(out, ref, rtol=2e-2, atol=2e-2), (
        float(jnp.max(jnp.abs(out - ref))))

    print("KERNEL_OK")
</pallas_src>

<mosaic_0001>
module attributes {stable_mosaic.version = 11 : i64} {
  func.func @kernel(%arg0: i32, %arg1: memref<1x16x16x6xf32, #tpu.memory_space<vmem>>, %arg2: memref<3x18x32xbf16, #tpu.memory_space<vmem>>, %arg3: memref<1x32xf32, #tpu.memory_space<vmem>>, %arg4: memref<2x6x96x32xbf16, #tpu.memory_space<vmem>>, %arg5: memref<2x2x1x32xf32, #tpu.memory_space<vmem>>, %arg6: memref<3x96x4xbf16, #tpu.memory_space<vmem>>, %arg7: memref<1x16x16x4xf32, #tpu.memory_space<vmem>>, %arg8: memref<18x32x6xf32, #tpu.memory_space<vmem>>, %arg9: memref<18x32x32xf32, #tpu.memory_space<vmem>>, %arg10: memref<18x32x32xf32, #tpu.memory_space<vmem>>) attributes {dimension_semantics = [#tpu.dimension_semantics<parallel>], iteration_bounds = array<i64: 2>, scalar_prefetch = 0 : i64, scratch_operands = 3 : i64, tpu.core_type = #tpu.core_type<tc>, window_params = [{transform_indices = @transform_0, window_bounds = array<i64: 1, 16, 16, 6>}, {pipeline_mode = #tpu.pipeline_mode<synchronous>, transform_indices = @transform_1, window_bounds = array<i64: 3, 18, 32>}, {pipeline_mode = #tpu.pipeline_mode<synchronous>, transform_indices = @transform_2, window_bounds = array<i64: 1, 32>}, {pipeline_mode = #tpu.pipeline_mode<synchronous>, transform_indices = @transform_3, window_bounds = array<i64: 2, 6, 96, 32>}, {pipeline_mode = #tpu.pipeline_mode<synchronous>, transform_indices = @transform_4, window_bounds = array<i64: 2, 2, 1, 32>}, {pipeline_mode = #tpu.pipeline_mode<synchronous>, transform_indices = @transform_5, window_bounds = array<i64: 3, 96, 4>}, {transform_indices = @transform_6, window_bounds = array<i64: 1, 16, 16, 4>}]} {
    %cst = arith.constant 0.000000e+00 : f32
    %0 = vector.broadcast %cst : f32 to vector<16x6xf32>
    %c0 = arith.constant 0 : index
    %c8 = arith.constant 8 : index
    %c0_0 = arith.constant 0 : index
    %1 = vector.load %arg8[%c0, %c8, %c0_0] : memref<18x32x6xf32, #tpu.memory_space<vmem>>, vector<1x16x6xf32>
    %2 = vector.shape_cast %1 : vector<1x16x6xf32> to vector<16x6xf32>
    %3 = vector.shape_cast %0 : vector<16x6xf32> to vector<1x16x6xf32>
    tpu.vector_store %arg8[%c0, %c8, %c0_0], %3 {strides = array<i32>} : memref<18x32x6xf32, #tpu.memory_space<vmem>>, vector<1x16x6xf32>,
    %c17 = arith.constant 17 : index
    %c8_1 = arith.constant 8 : index
    %c0_2 = arith.constant 0 : index
    %4 = vector.load %arg8[%c17, %c8_1, %c0_2] : memref<18x32x6xf32, #tpu.memory_space<vmem>>, vector<1x16x6xf32>
    %5 = vector.shape_cast %4 : vector<1x16x6xf32> to vector<16x6xf32>
    %6 = vector.shape_cast %0 : vector<16x6xf32> to vector<1x16x6xf32>
    tpu.vector_store %arg8[%c17, %c8_1, %c0_2], %6 {strides = array<i32>} : memref<18x32x6xf32, #tpu.memory_space<vmem>>, vector<1x16x6xf32>,
    %cst_3 = arith.constant 0.000000e+00 : f32
    %7 = vector.broadcast %cst_3 : f32 to vector<18x8x6xf32>
    %c0_4 = arith.constant 0 : index
    %c0_5 = arith.constant 0 : index
    %c0_6 = arith.constant 0 : index
    %8 = vector.load %arg8[%c0_4, %c0_5, %c0_6] : memref<18x32x6xf32, #tpu.memory_space<vmem>>, vector<18x8x6xf32>
    tpu.vector_store %arg8[%c0_4, %c0_5, %c0_6], %7 {strides = array<i32>} : memref<18x32x6xf32, #tpu.memory_space<vmem>>, vector<18x8x6xf32>,
    %c0_7 = arith.constant 0 : index
    %c24 = arith.constant 24 : index
    %c0_8 = arith.constant 0 : index
    %9 = vector.load %arg8[%c0_7, %c24, %c0_8] : memref<18x32x6xf32, #tpu.memory_space<vmem>>, vector<18x8x6xf32>
    tpu.vector_store %arg8[%c0_7, %c24, %c0_8], %7 {strides = array<i32>} : memref<18x32x6xf32, #tpu.memory_space<vmem>>, vector<18x8x6xf32>,
    %cst_9 = arith.constant 0.000000e+00 : f32
    %10 = vector.broadcast %cst_9 : f32 to vector<16x32xf32>
    %c0_10 = arith.constant 0 : index
    %c8_11 = arith.constant 8 : index
    %c0_12 = arith.constant 0 : index
    %11 = vector.load %arg9[%c0_10, %c8_11, %c0_12] : memref<18x32x32xf32, #tpu.memory_space<vmem>>, vector<1x16x32xf32>
    %12 = vector.shape_cast %11 : vector<1x16x32xf32> to vector<16x32xf32>
    %13 = vector.shape_cast %10 : vector<16x32xf32> to vector<1x16x32xf32>
    tpu.vector_store %arg9[%c0_10, %c8_11, %c0_12], %13 {strides = array<i32>} : memref<18x32x32xf32, #tpu.memory_space<vmem>>, vector<1x16x32xf32>,
    %c17_13 = arith.constant 17 : index
    %c8_14 = arith.constant 8 : index
    %c0_15 = arith.constant 0 : index
    %14 = vector.load %arg9[%c17_13, %c8_14, %c0_15] : memref<18x32x32xf32, #tpu.memory_space<vmem>>, vector<1x16x32xf32>
    %15 = vector.shape_cast %14 : vector<1x16x32xf32> to vector<16x32xf32>
    %16 = vector.shape_cast %10 : vector<16x32xf32> to vector<1x16x32xf32>
    tpu.vector_store %arg9[%c17_13, %c8_14, %c0_15], %16 {strides = array<i32>} : memref<18x32x32xf32, #tpu.memory_space<vmem>>, vector<1x16x32xf32>,
    %cst_16 = arith.constant 0.000000e+00 : f32
    %17 = vector.broadcast %cst_16 : f32 to vector<18x8x32xf32>
    %c0_17 = arith.constant 0 : index
    %c0_18 = arith.constant 0 : index
    %c0_19 = arith.constant 0 : index
    %18 = vector.load %arg9[%c0_17, %c0_18, %c0_19] : memref<18x32x32xf32, #tpu.memory_space<vmem>>, vector<18x8x32xf32>
    tpu.vector_store %arg9[%c0_17, %c0_18, %c0_19], %17 {strides = array<i32>} : memref<18x32x32xf32, #tpu.memory_space<vmem>>, vector<18x8x32xf32>,
    %c0_20 = arith.constant 0 : index
    %c24_21 = arith.constant 24 : index
    %c0_22 = arith.constant 0 : index
    %19 = vector.load %arg9[%c0_20, %c24_21, %c0_22] : memref<18x32x32xf32, #tpu.memory_space<vmem>>, vector<18x8x32xf32>
    tpu.vector_store %arg9[%c0_20, %c24_21, %c0_22], %17 {strides = array<i32>} : memref<18x32x32xf32, #tpu.memory_space<vmem>>, vector<18x8x32xf32>,
    %cst_23 = arith.constant 0.000000e+00 : f32
    %20 = vector.broadcast %cst_23 : f32 to vector<16x32xf32>
    %c0_24 = arith.constant 0 : index
    %c8_25 = arith.constant 8 : index
    %c0_26 = arith.constant 0 : index
    %21 = vector.load %arg10[%c0_24, %c8_25, %c0_26] : memref<18x32x32xf32, #tpu.memory_space<vmem>>, vector<1x16x32xf32>
    %22 = vector.shape_cast %21 : vector<1x16x32xf32> to vector<16x32xf32>
    %23 = vector.shape_cast %20 : vector<16x32xf32> to vector<1x16x32xf32>
    tpu.vector_store %arg10[%c0_24, %c8_25, %c0_26], %23 {strides = array<i32>} : memref<18x32x32xf32, #tpu.memory_space<vmem>>, vector<1x16x32xf32>,
    %c17_27 = arith.constant 17 : index
    %c8_28 = arith.constant 8 : index
    %c0_29 = arith.constant 0 : index
    %24 = vector.load %arg10[%c17_27, %c8_28, %c0_29] : memref<18x32x32xf32, #tpu.memory_space<vmem>>, vector<1x16x32xf32>
    %25 = vector.shape_cast %24 : vector<1x16x32xf32> to vector<16x32xf32>
    %26 = vector.shape_cast %20 : vector<16x32xf32> to vector<1x16x32xf32>
    tpu.vector_store %arg10[%c17_27, %c8_28, %c0_29], %26 {strides = array<i32>} : memref<18x32x32xf32, #tpu.memory_space<vmem>>, vector<1x16x32xf32>,
    %cst_30 = arith.constant 0.000000e+00 : f32
    %27 = vector.broadcast %cst_30 : f32 to vector<18x8x32xf32>
    %c0_31 = arith.constant 0 : index
    %c0_32 = arith.constant 0 : index
    %c0_33 = arith.constant 0 : index
    %28 = vector.load %arg10[%c0_31, %c0_32, %c0_33] : memref<18x32x32xf32, #tpu.memory_space<vmem>>, vector<18x8x32xf32>
    tpu.vector_store %arg10[%c0_31, %c0_32, %c0_33], %27 {strides = array<i32>} : memref<18x32x32xf32, #tpu.memory_space<vmem>>, vector<18x8x32xf32>,
    %c0_34 = arith.constant 0 : index
    %c24_35 = arith.constant 24 : index
    %c0_36 = arith.constant 0 : index
    %29 = vector.load %arg10[%c0_34, %c24_35, %c0_36] : memref<18x32x32xf32, #tpu.memory_space<vmem>>, vector<18x8x32xf32>
    tpu.vector_store %arg10[%c0_34, %c24_35, %c0_36], %27 {strides = array<i32>} : memref<18x32x32xf32, #tpu.memory_space<vmem>>, vector<18x8x32xf32>,
    %c0_37 = arith.constant 0 : index
    %c0_38 = arith.constant 0 : index
    %c0_39 = arith.constant 0 : index
    %c0_40 = arith.constant 0 : index
    %30 = vector.load %arg1[%c0_37, %c0_38, %c0_39, %c0_40] : memref<1x16x16x6xf32, #tpu.memory_space<vmem>>, vector<1x16x16x6xf32>
    %31 = vector.shape_cast %30 : vector<1x16x16x6xf32> to vector<16x16x6xf32>
    %c1 = arith.constant 1 : index
    %c8_41 = arith.constant 8 : index
    %c0_42 = arith.constant 0 : index
    %32 = vector.load %arg8[%c1, %c8_41, %c0_42] : memref<18x32x6xf32, #tpu.memory_space<vmem>>, vector<16x16x6xf32>
    tpu.vector_store %arg8[%c1, %c8_41, %c0_42], %31 {strides = array<i32>} : memref<18x32x6xf32, #tpu.memory_space<vmem>>, vector<16x16x6xf32>,
    %c0_43 = arith.constant 0 : index
    %c0_44 = arith.constant 0 : index
    %33 = vector.load %arg3[%c0_43, %c0_44] : memref<1x32xf32, #tpu.memory_space<vmem>>, vector<1x32xf32>
    %c0_45 = arith.constant 0 : index
    %c7 = arith.constant 7 : index
    %c0_46 = arith.constant 0 : index
    %34 = vector.load %arg8[%c0_45, %c7, %c0_46] : memref<18x32x6xf32, #tpu.memory_space<vmem>>, vector<18x16x6xf32>
    %c0_47 = arith.constant 0 : index
    %c8_48 = arith.constant 8 : index
    %c0_49 = arith.constant 0 : index
    %35 = vector.load %arg8[%c0_47, %c8_48, %c0_49] : memref<18x32x6xf32, #tpu.memory_space<vmem>>, vector<18x16x6xf32>
    %c0_50 = arith.constant 0 : index
    %c9 = arith.constant 9 : index
    %c0_51 = arith.constant 0 : index
    %36 = vector.load %arg8[%c0_50, %c9, %c0_51] : memref<18x32x6xf32, #tpu.memory_space<vmem>>, vector<18x16x6xf32>
    %37 = tpu.concatenate %34, %35, %36 in 2 : vector<18x16x6xf32>, vector<18x16x6xf32>, vector<18x16x6xf32> -> vector<18x16x18xf32>
    %38 = arith.truncf %37 : vector<18x16x18xf32> to vector<18x16x18xbf16>
    %cst_52 = arith.constant 0.000000e+00 : f32
    %39 = vector.broadcast %cst_52 : f32 to vector<256x32xf32>
    %40 = vector.extract_strided_slice %38 {offsets = [0, 0, 0], sizes = [16, 16, 18], strides = [1, 1, 1]} : vector<18x16x18xbf16> to vector<16x16x18xbf16>
    %41 = vector.shape_cast %40 : vector<16x16x18xbf16> to vector<256x18xbf16>
    %c0_53 = arith.constant 0 : index
    %c0_54 = arith.constant 0 : index
    %c0_55 = arith.constant 0 : index
    %42 = vector.load %arg2[%c0_53, %c0_54, %c0_55] : memref<3x18x32xbf16, #tpu.memory_space<vmem>>, vector<1x18x32xbf16>
    %43 = vector.shape_cast %42 : vector<1x18x32xbf16> to vector<18x32xbf16>
    %cst_56 = arith.constant dense<0.000000e+00> : vector<256x32xf32>
    %44 = tpu.matmul %41, %43, %cst_56 {dimension_numbers = #tpu.dot_dimension_numbers<[1], [0], [0], [1], [0, 0, 1, 1], [], []>} : vector<256x18xbf16>, vector<18x32xbf16>, vector<256x32xf32> -> vector<256x32xf32>
    %45 = arith.addf %39, %44 : vector<256x32xf32>
    %46 = vector.extract_strided_slice %38 {offsets = [1, 0, 0], sizes = [16, 16, 18], strides = [1, 1, 1]} : vector<18x16x18xbf16> to vector<16x16x18xbf16>
    %47 = vector.shape_cast %46 : vector<16x16x18xbf16> to vector<256x18xbf16>
    %c1_57 = arith.constant 1 : index
    %c0_58 = arith.constant 0 : index
    %c0_59 = arith.constant 0 : index
    %48 = vector.load %arg2[%c1_57, %c0_58, %c0_59] : memref<3x18x32xbf16, #tpu.memory_space<vmem>>, vector<1x18x32xbf16>
    %49 = vector.shape_cast %48 : vector<1x18x32xbf16> to vector<18x32xbf16>
    %cst_60 = arith.constant dense<0.000000e+00> : vector<256x32xf32>
    %50 = tpu.matmul %47, %49, %cst_60 {dimension_numbers = #tpu.dot_dimension_numbers<[1], [0], [0], [1], [0, 0, 1, 1], [], []>} : vector<256x18xbf16>, vector<18x32xbf16>, vector<256x32xf32> -> vector<256x32xf32>
    %51 = arith.addf %45, %50 : vector<256x32xf32>
    %52 = vector.extract_strided_slice %38 {offsets = [2, 0, 0], sizes = [16, 16, 18], strides = [1, 1, 1]} : vector<18x16x18xbf16> to vector<16x16x18xbf16>
    %53 = vector.shape_cast %52 : vector<16x16x18xbf16> to vector<256x18xbf16>
    %c2 = arith.constant 2 : index
    %c0_61 = arith.constant 0 : index
    %c0_62 = arith.constant 0 : index
    %54 = vector.load %arg2[%c2, %c0_61, %c0_62] : memref<3x18x32xbf16, #tpu.memory_space<vmem>>, vector<1x18x32xbf16>
    %55 = vector.shape_cast %54 : vector<1x18x32xbf16> to vector<18x32xbf16>
    %cst_63 = arith.constant dense<0.000000e+00> : vector<256x32xf32>
    %56 = tpu.matmul %53, %55, %cst_63 {dimension_numbers = #tpu.dot_dimension_numbers<[1], [0], [0], [1], [0, 0, 1, 1], [], []>} : vector<256x18xbf16>, vector<18x32xbf16>, vector<256x32xf32> -> vector<256x32xf32>
    %57 = arith.addf %51, %56 : vector<256x32xf32>
    %58 = vector.broadcast %33 : vector<1x32xf32> to vector<256x32xf32>
    %59 = arith.addf %57, %58 : vector<256x32xf32>
    %cst_64 = arith.constant 0.000000e+00 : f32
    %60 = vector.broadcast %cst_64 : f32 to vector<256x32xf32>
    %61 = arith.maximumf %59, %60 : vector<256x32xf32>
    %62 = vector.shape_cast %61 : vector<256x32xf32> to vector<16x16x32xf32>
    %c1_65 = arith.constant 1 : index
    %c8_66 = arith.constant 8 : index
    %c0_67 = arith.constant 0 : index
    %63 = vector.load %arg9[%c1_65, %c8_66, %c0_67] : memref<18x32x32xf32, #tpu.memory_space<vmem>>, vector<16x16x32xf32>
    tpu.vector_store %arg9[%c1_65, %c8_66, %c0_67], %62 {strides = array<i32>} : memref<18x32x32xf32, #tpu.memory_space<vmem>>, vector<16x16x32xf32>,
    %c0_i32 = arith.constant 0 : i32
    %c2_i32 = arith.constant 2 : i32
    %64 = arith.addi %c0_i32, %c2_i32 : i32
    %c1_i32 = arith.constant 1 : i32
    scf.for %arg11 = %c0_i32 to %64 step %c1_i32  : i32 {
      %96 = arith.index_cast %arg11 : i32 to index
      %c0_99 = arith.constant 0 : index
      %c0_100 = arith.constant 0 : index
      %c0_101 = arith.constant 0 : index
      %97 = vector.load %arg5[%96, %c0_99, %c0_100, %c0_101] : memref<2x2x1x32xf32, #tpu.memory_space<vmem>>, vector<1x1x1x32xf32>
      %98 = vector.shape_cast %97 : vector<1x1x1x32xf32> to vector<1x32xf32>
      %c0_102 = arith.constant 0 : index
      %c7_103 = arith.constant 7 : index
      %c0_104 = arith.constant 0 : index
      %99 = vector.load %arg9[%c0_102, %c7_103, %c0_104] : memref<18x32x32xf32, #tpu.memory_space<vmem>>, vector<18x16x32xf32>
      %c0_105 = arith.constant 0 : index
      %c8_106 = arith.constant 8 : index
      %c0_107 = arith.constant 0 : index
      %100 = vector.load %arg9[%c0_105, %c8_106, %c0_107] : memref<18x32x32xf32, #tpu.memory_space<vmem>>, vector<18x16x32xf32>
      %c0_108 = arith.constant 0 : index
      %c9_109 = arith.constant 9 : index
      %c0_110 = arith.constant 0 : index
      %101 = vector.load %arg9[%c0_108, %c9_109, %c0_110] : memref<18x32x32xf32, #tpu.memory_space<vmem>>, vector<18x16x32xf32>
      %102 = tpu.concatenate %99, %100, %101 in 2 : vector<18x16x32xf32>, vector<18x16x32xf32>, vector<18x16x32xf32> -> vector<18x16x96xf32>
      %103 = arith.truncf %102 : vector<18x16x96xf32> to vector<18x16x96xbf16>
      %cst_111 = arith.constant 0.000000e+00 : f32
      %104 = vector.broadcast %cst_111 : f32 to vector<256x32xf32>
      %105 = vector.extract_strided_slice %103 {offsets = [0, 0, 0], sizes = [16, 16, 96], strides = [1, 1, 1]} : vector<18x16x96xbf16> to vector<16x16x96xbf16>
      %106 = vector.shape_cast %105 : vector<16x16x96xbf16> to vector<256x96xbf16>
      %107 = arith.index_cast %arg11 : i32 to index
      %c0_112 = arith.constant 0 : index
      %c0_113 = arith.constant 0 : index
      %c0_114 = arith.constant 0 : index
      %108 = vector.load %arg4[%107, %c0_112, %c0_113, %c0_114] : memref<2x6x96x32xbf16, #tpu.memory_space<vmem>>, vector<1x1x96x32xbf16>
      %109 = vector.shape_cast %108 : vector<1x1x96x32xbf16> to vector<96x32xbf16>
      %cst_115 = arith.constant dense<0.000000e+00> : vector<256x32xf32>
      %110 = tpu.matmul %106, %109, %cst_115 {dimension_numbers = #tpu.dot_dimension_numbers<[1], [0], [0], [1], [0, 0, 1, 1], [], []>} : vector<256x96xbf16>, vector<96x32xbf16>, vector<256x32xf32> -> vector<256x32xf32>
      %111 = arith.addf %104, %110 : vector<256x32xf32>
      %112 = vector.extract_strided_slice %103 {offsets = [1, 0, 0], sizes = [16, 16, 96], strides = [1, 1, 1]} : vector<18x16x96xbf16> to vector<16x16x96xbf16>
      %113 = vector.shape_cast %112 : vector<16x16x96xbf16> to vector<256x96xbf16>
      %114 = arith.index_cast %arg11 : i32 to index
      %c1_116 = arith.constant 1 : index
      %c0_117 = arith.constant 0 : index
      %c0_118 = arith.constant 0 : index
      %115 = vector.load %arg4[%114, %c1_116, %c0_117, %c0_118] : memref<2x6x96x32xbf16, #tpu.memory_space<vmem>>, vector<1x1x96x32xbf16>
      %116 = vector.shape_cast %115 : vector<1x1x96x32xbf16> to vector<96x32xbf16>
      %cst_119 = arith.constant dense<0.000000e+00> : vector<256x32xf32>
      %117 = tpu.matmul %113, %116, %cst_119 {dimension_numbers = #tpu.dot_dimension_numbers<[1], [0], [0], [1], [0, 0, 1, 1], [], []>} : vector<256x96xbf16>, vector<96x32xbf16>, vector<256x32xf32> -> vector<256x32xf32>
      %118 = arith.addf %111, %117 : vector<256x32xf32>
      %119 = vector.extract_strided_slice %103 {offsets = [2, 0, 0], sizes = [16, 16, 96], strides = [1, 1, 1]} : vector<18x16x96xbf16> to vector<16x16x96xbf16>
      %120 = vector.shape_cast %119 : vector<16x16x96xbf16> to vector<256x96xbf16>
      %121 = arith.index_cast %arg11 : i32 to index
      %c2_120 = arith.constant 2 : index
      %c0_121 = arith.constant 0 : index
      %c0_122 = arith.constant 0 : index
      %122 = vector.load %arg4[%121, %c2_120, %c0_121, %c0_122] : memref<2x6x96x32xbf16, #tpu.memory_space<vmem>>, vector<1x1x96x32xbf16>
      %123 = vector.shape_cast %122 : vector<1x1x96x32xbf16> to vector<96x32xbf16>
      %cst_123 = arith.constant dense<0.000000e+00> : vector<256x32xf32>
      %124 = tpu.matmul %120, %123, %cst_123 {dimension_numbers = #tpu.dot_dimension_numbers<[1], [0], [0], [1], [0, 0, 1, 1], [], []>} : vector<256x96xbf16>, vector<96x32xbf16>, vector<256x32xf32> -> vector<256x32xf32>
      %125 = arith.addf %118, %124 : vector<256x32xf32>
      %126 = vector.broadcast %98 : vector<1x32xf32> to vector<256x32xf32>
      %127 = arith.addf %125, %126 : vector<256x32xf32>
      %cst_124 = arith.constant 0.000000e+00 : f32
      %128 = vector.broadcast %cst_124 : f32 to vector<256x32xf32>
      %129 = arith.maximumf %127, %128 : vector<256x32xf32>
      %130 = vector.shape_cast %129 : vector<256x32xf32> to vector<16x16x32xf32>
      %c1_125 = arith.constant 1 : index
      %c8_126 = arith.constant 8 : index
      %c0_127 = arith.constant 0 : index
      %131 = vector.load %arg10[%c1_125, %c8_126, %c0_127] : memref<18x32x32xf32, #tpu.memory_space<vmem>>, vector<16x16x32xf32>
      tpu.vector_store %arg10[%c1_125, %c8_126, %c0_127], %130 {strides = array<i32>} : memref<18x32x32xf32, #tpu.memory_space<vmem>>, vector<16x16x32xf32>,
      %132 = arith.index_cast %arg11 : i32 to index
      %c1_128 = arith.constant 1 : index
      %c0_129 = arith.constant 0 : index
      %c0_130 = arith.constant 0 : index
      %133 = vector.load %arg5[%132, %c1_128, %c0_129, %c0_130] : memref<2x2x1x32xf32, #tpu.memory_space<vmem>>, vector<1x1x1x32xf32>
      %134 = vector.shape_cast %133 : vector<1x1x1x32xf32> to vector<1x32xf32>
      %c0_131 = arith.constant 0 : index
      %c7_132 = arith.constant 7 : index
      %c0_133 = arith.constant 0 : index
      %135 = vector.load %arg10[%c0_131, %c7_132, %c0_133] : memref<18x32x32xf32, #tpu.memory_space<vmem>>, vector<18x16x32xf32>
      %c0_134 = arith.constant 0 : index
      %c8_135 = arith.constant 8 : index
      %c0_136 = arith.constant 0 : index
      %136 = vector.load %arg10[%c0_134, %c8_135, %c0_136] : memref<18x32x32xf32, #tpu.memory_space<vmem>>, vector<18x16x32xf32>
      %c0_137 = arith.constant 0 : index
      %c9_138 = arith.constant 9 : index
      %c0_139 = arith.constant 0 : index
      %137 = vector.load %arg10[%c0_137, %c9_138, %c0_139] : memref<18x32x32xf32, #tpu.memory_space<vmem>>, vector<18x16x32xf32>
      %138 = tpu.concatenate %135, %136, %137 in 2 : vector<18x16x32xf32>, vector<18x16x32xf32>, vector<18x16x32xf32> -> vector<18x16x96xf32>
      %139 = arith.truncf %138 : vector<18x16x96xf32> to vector<18x16x96xbf16>
      %cst_140 = arith.constant 0.000000e+00 : f32
      %140 = vector.broadcast %cst_140 : f32 to vector<256x32xf32>
      %141 = vector.extract_strided_slice %139 {offsets = [0, 0, 0], sizes = [16, 16, 96], strides = [1, 1, 1]} : vector<18x16x96xbf16> to vector<16x16x96xbf16>
      %142 = vector.shape_cast %141 : vector<16x16x96xbf16> to vector<256x96xbf16>
      %143 = arith.index_cast %arg11 : i32 to index
      %c3 = arith.constant 3 : index
      %c0_141 = arith.constant 0 : index
      %c0_142 = arith.constant 0 : index
      %144 = vector.load %arg4[%143, %c3, %c0_141, %c0_142] : memref<2x6x96x32xbf16, #tpu.memory_space<vmem>>, vector<1x1x96x32xbf16>
      %145 = vector.shape_cast %144 : vector<1x1x96x32xbf16> to vector<96x32xbf16>
      %cst_143 = arith.constant dense<0.000000e+00> : vector<256x32xf32>
      %146 = tpu.matmul %142, %145, %cst_143 {dimension_numbers = #tpu.dot_dimension_numbers<[1], [0], [0], [1], [0, 0, 1, 1], [], []>} : vector<256x96xbf16>, vector<96x32xbf16>, vector<256x32xf32> -> vector<256x32xf32>
      %147 = arith.addf %140, %146 : vector<256x32xf32>
      %148 = vector.extract_strided_slice %139 {offsets = [1, 0, 0], sizes = [16, 16, 96], strides = [1, 1, 1]} : vector<18x16x96xbf16> to vector<16x16x96xbf16>
      %149 = vector.shape_cast %148 : vector<16x16x96xbf16> to vector<256x96xbf16>
      %150 = arith.index_cast %arg11 : i32 to index
      %c4 = arith.constant 4 : index
      %c0_144 = arith.constant 0 : index
      %c0_145 = arith.constant 0 : index
      %151 = vector.load %arg4[%150, %c4, %c0_144, %c0_145] : memref<2x6x96x32xbf16, #tpu.memory_space<vmem>>, vector<1x1x96x32xbf16>
      %152 = vector.shape_cast %151 : vector<1x1x96x32xbf16> to vector<96x32xbf16>
      %cst_146 = arith.constant dense<0.000000e+00> : vector<256x32xf32>
      %153 = tpu.matmul %149, %152, %cst_146 {dimension_numbers = #tpu.dot_dimension_numbers<[1], [0], [0], [1], [0, 0, 1, 1], [], []>} : vector<256x96xbf16>, vector<96x32xbf16>, vector<256x32xf32> -> vector<256x32xf32>
      %154 = arith.addf %147, %153 : vector<256x32xf32>
      %155 = vector.extract_strided_slice %139 {offsets = [2, 0, 0], sizes = [16, 16, 96], strides = [1, 1, 1]} : vector<18x16x96xbf16> to vector<16x16x96xbf16>
      %156 = vector.shape_cast %155 : vector<16x16x96xbf16> to vector<256x96xbf16>
      %157 = arith.index_cast %arg11 : i32 to index
      %c5 = arith.constant 5 : index
      %c0_147 = arith.constant 0 : index
      %c0_148 = arith.constant 0 : index
      %158 = vector.load %arg4[%157, %c5, %c0_147, %c0_148] : memref<2x6x96x32xbf16, #tpu.memory_space<vmem>>, vector<1x1x96x32xbf16>
      %159 = vector.shape_cast %158 : vector<1x1x96x32xbf16> to vector<96x32xbf16>
      %cst_149 = arith.constant dense<0.000000e+00> : vector<256x32xf32>
      %160 = tpu.matmul %156, %159, %cst_149 {dimension_numbers = #tpu.dot_dimension_numbers<[1], [0], [0], [1], [0, 0, 1, 1], [], []>} : vector<256x96xbf16>, vector<96x32xbf16>, vector<256x32xf32> -> vector<256x32xf32>
      %161 = arith.addf %154, %160 : vector<256x32xf32>
      %162 = vector.broadcast %134 : vector<1x32xf32> to vector<256x32xf32>
      %163 = arith.addf %161, %162 : vector<256x32xf32>
      %c1_150 = arith.constant 1 : index
      %c8_151 = arith.constant 8 : index
      %c0_152 = arith.constant 0 : index
      %164 = vector.load %arg9[%c1_150, %c8_151, %c0_152] : memref<18x32x32xf32, #tpu.memory_space<vmem>>, vector<16x16x32xf32>
      %165 = vector.shape_cast %163 : vector<256x32xf32> to vector<16x16x32xf32>
      %cst_153 = arith.constant 1.000000e-01 : f32
      %166 = vector.broadcast %cst_153 : f32 to vector<16x16x32xf32>
      %167 = arith.mulf %166, %165 : vector<16x16x32xf32>
      %168 = arith.addf %164, %167 : vector<16x16x32xf32>
      %c1_154 = arith.constant 1 : index
      %c8_155 = arith.constant 8 : index
      %c0_156 = arith.constant 0 : index
      %169 = vector.load %arg9[%c1_154, %c8_155, %c0_156] : memref<18x32x32xf32, #tpu.memory_space<vmem>>, vector<16x16x32xf32>
      tpu.vector_store %arg9[%c1_154, %c8_155, %c0_156], %168 {strides = array<i32>} : memref<18x32x32xf32, #tpu.memory_space<vmem>>, vector<16x16x32xf32>,
    }
    %c2_i32_68 = arith.constant 2 : i32
    %c0_69 = arith.constant 0 : index
    %c7_70 = arith.constant 7 : index
    %c0_71 = arith.constant 0 : index
    %65 = vector.load %arg9[%c0_69, %c7_70, %c0_71] : memref<18x32x32xf32, #tpu.memory_space<vmem>>, vector<18x16x32xf32>
    %c0_72 = arith.constant 0 : index
    %c8_73 = arith.constant 8 : index
    %c0_74 = arith.constant 0 : index
    %66 = vector.load %arg9[%c0_72, %c8_73, %c0_74] : memref<18x32x32xf32, #tpu.memory_space<vmem>>, vector<18x16x32xf32>
    %c0_75 = arith.constant 0 : index
    %c9_76 = arith.constant 9 : index
    %c0_77 = arith.constant 0 : index
    %67 = vector.load %arg9[%c0_75, %c9_76, %c0_77] : memref<18x32x32xf32, #tpu.memory_space<vmem>>, vector<18x16x32xf32>
    %68 = tpu.concatenate %65, %66, %67 in 2 : vector<18x16x32xf32>, vector<18x16x32xf32>, vector<18x16x32xf32> -> vector<18x16x96xf32>
    %69 = arith.truncf %68 : vector<18x16x96xf32> to vector<18x16x96xbf16>
    %cst_78 = arith.constant 0.000000e+00 : f32
    %70 = vector.broadcast %cst_78 : f32 to vector<256x4xf32>
    %71 = vector.extract_strided_slice %69 {offsets = [0, 0, 0], sizes = [16, 16, 96], strides = [1, 1, 1]} : vector<18x16x96xbf16> to vector<16x16x96xbf16>
    %72 = vector.shape_cast %71 : vector<16x16x96xbf16> to vector<256x96xbf16>
    %c0_79 = arith.constant 0 : index
    %c0_80 = arith.constant 0 : index
    %c0_81 = arith.constant 0 : index
    %73 = vector.load %arg6[%c0_79, %c0_80, %c0_81] : memref<3x96x4xbf16, #tpu.memory_space<vmem>>, vector<1x96x4xbf16>
    %74 = vector.shape_cast %73 : vector<1x96x4xbf16> to vector<96x4xbf16>
    %cst_82 = arith.constant dense<0.000000e+00> : vector<256x4xf32>
    %75 = tpu.matmul %72, %74, %cst_82 {dimension_numbers = #tpu.dot_dimension_numbers<[1], [0], [0], [1], [0, 0, 1, 1], [], []>} : vector<256x96xbf16>, vector<96x4xbf16>, vector<256x4xf32> -> vector<256x4xf32>
    %76 = arith.addf %70, %75 : vector<256x4xf32>
    %77 = vector.extract_strided_slice %69 {offsets = [1, 0, 0], sizes = [16, 16, 96], strides = [1, 1, 1]} : vector<18x16x96xbf16> to vector<16x16x96xbf16>
    %78 = vector.shape_cast %77 : vector<16x16x96xbf16> to vector<256x96xbf16>
    %c1_83 = arith.constant 1 : index
    %c0_84 = arith.constant 0 : index
    %c0_85 = arith.constant 0 : index
    %79 = vector.load %arg6[%c1_83, %c0_84, %c0_85] : memref<3x96x4xbf16, #tpu.memory_space<vmem>>, vector<1x96x4xbf16>
    %80 = vector.shape_cast %79 : vector<1x96x4xbf16> to vector<96x4xbf16>
    %cst_86 = arith.constant dense<0.000000e+00> : vector<256x4xf32>
    %81 = tpu.matmul %78, %80, %cst_86 {dimension_numbers = #tpu.dot_dimension_numbers<[1], [0], [0], [1], [0, 0, 1, 1], [], []>} : vector<256x96xbf16>, vector<96x4xbf16>, vector<256x4xf32> -> vector<256x4xf32>
    %82 = arith.addf %76, %81 : vector<256x4xf32>
    %83 = vector.extract_strided_slice %69 {offsets = [2, 0, 0], sizes = [16, 16, 96], strides = [1, 1, 1]} : vector<18x16x96xbf16> to vector<16x16x96xbf16>
    %84 = vector.shape_cast %83 : vector<16x16x96xbf16> to vector<256x96xbf16>
    %c2_87 = arith.constant 2 : index
    %c0_88 = arith.constant 0 : index
    %c0_89 = arith.constant 0 : index
    %85 = vector.load %arg6[%c2_87, %c0_88, %c0_89] : memref<3x96x4xbf16, #tpu.memory_space<vmem>>, vector<1x96x4xbf16>
    %86 = vector.shape_cast %85 : vector<1x96x4xbf16> to vector<96x4xbf16>
    %cst_90 = arith.constant dense<0.000000e+00> : vector<256x4xf32>
    %87 = tpu.matmul %84, %86, %cst_90 {dimension_numbers = #tpu.dot_dimension_numbers<[1], [0], [0], [1], [0, 0, 1, 1], [], []>} : vector<256x96xbf16>, vector<96x4xbf16>, vector<256x4xf32> -> vector<256x4xf32>
    %88 = arith.addf %82, %87 : vector<256x4xf32>
    %c0_91 = arith.constant 0 : index
    %c0_92 = arith.constant 0 : index
    %c0_93 = arith.constant 0 : index
    %c2_94 = arith.constant 2 : index
    %89 = vector.load %arg1[%c0_91, %c0_92, %c0_93, %c2_94] : memref<1x16x16x6xf32, #tpu.memory_space<vmem>>, vector<1x16x16x4xf32>
    %90 = vector.shape_cast %89 : vector<1x16x16x4xf32> to vector<16x16x4xf32>
    %91 = vector.shape_cast %88 : vector<256x4xf32> to vector<16x16x4xf32>
    %92 = arith.addf %91, %90 : vector<16x16x4xf32>
    %c0_95 = arith.constant 0 : index
    %c0_96 = arith.constant 0 : index
    %c0_97 = arith.constant 0 : index
    %c0_98 = arith.constant 0 : index
    %93 = vector.load %arg7[%c0_95, %c0_96, %c0_97, %c0_98] : memref<1x16x16x4xf32, #tpu.memory_space<vmem>>, vector<1x16x16x4xf32>
    %94 = vector.shape_cast %93 : vector<1x16x16x4xf32> to vector<16x16x4xf32>
    %95 = vector.shape_cast %92 : vector<16x16x4xf32> to vector<1x16x16x4xf32>
    tpu.vector_store %arg7[%c0_95, %c0_96, %c0_97, %c0_98], %95 {strides = array<i32>} : memref<1x16x16x4xf32, #tpu.memory_space<vmem>>, vector<1x16x16x4xf32>,
    return
  }
  func.func @transform_0(%arg0: i32) -> (i32, i32, i32, i32) {
    %c0_i32 = arith.constant 0 : i32
    %c0_i32_0 = arith.constant 0 : i32
    %c0_i32_1 = arith.constant 0 : i32
    %c0_i32_2 = arith.constant 0 : i32
    return %arg0, %c0_i32, %c0_i32_0, %c0_i32_1 : i32, i32, i32, i32
  }
  func.func @transform_1(%arg0: i32) -> (i32, i32, i32) {
    %c0_i32 = arith.constant 0 : i32
    %c0_i32_0 = arith.constant 0 : i32
    %c0_i32_1 = arith.constant 0 : i32
    %c0_i32_2 = arith.constant 0 : i32
    return %c0_i32, %c0_i32_0, %c0_i32_1 : i32, i32, i32
  }
  func.func @transform_2(%arg0: i32) -> (i32, i32) {
    %c0_i32 = arith.constant 0 : i32
    %c0_i32_0 = arith.constant 0 : i32
    %c0_i32_1 = arith.constant 0 : i32
    return %c0_i32, %c0_i32_0 : i32, i32
  }
  func.func @transform_3(%arg0: i32) -> (i32, i32, i32, i32) {
    %c0_i32 = arith.constant 0 : i32
    %c0_i32_0 = arith.constant 0 : i32
    %c0_i32_1 = arith.constant 0 : i32
    %c0_i32_2 = arith.constant 0 : i32
    %c0_i32_3 = arith.constant 0 : i32
    return %c0_i32, %c0_i32_0, %c0_i32_1, %c0_i32_2 : i32, i32, i32, i32
  }
  func.func @transform_4(%arg0: i32) -> (i32, i32, i32, i32) {
    %c0_i32 = arith.constant 0 : i32
    %c0_i32_0 = arith.constant 0 : i32
    %c0_i32_1 = arith.constant 0 : i32
    %c0_i32_2 = arith.constant 0 : i32
    %c0_i32_3 = arith.constant 0 : i32
    return %c0_i32, %c0_i32_0, %c0_i32_1, %c0_i32_2 : i32, i32, i32, i32
  }
  func.func @transform_5(%arg0: i32) -> (i32, i32, i32) {
    %c0_i32 = arith.constant 0 : i32
    %c0_i32_0 = arith.constant 0 : i32
    %c0_i32_1 = arith.constant 0 : i32
    %c0_i32_2 = arith.constant 0 : i32
    return %c0_i32, %c0_i32_0, %c0_i32_1 : i32, i32, i32
  }
  func.func @transform_6(%arg0: i32) -> (i32, i32, i32, i32) {
    %c0_i32 = arith.constant 0 : i32
    %c0_i32_0 = arith.constant 0 : i32
    %c0_i32_1 = arith.constant 0 : i32
    %c0_i32_2 = arith.constant 0 : i32
    return %arg0, %c0_i32, %c0_i32_0, %c0_i32_1 : i32, i32, i32, i32
  }
}

</mosaic_0001>

<bundles_post_ra>
// kernel: tpu_custom_call.1
= control target key start
LH: loop header
LB: loop body
LE: loop exit
PB: predicated region body
PF: predicated region fallthrough
CT: control target
= control target key end

     0   :  { %s8129_s21 = smov 0   ;;  %s9937_s0 = inlined_call_operand.vmem [shape: f32[2,16,16,6], index: 0, kind: input, shape index: {}]   ;;  %s9938_s1 = inlined_call_operand.vmem [shape: bf16[3,18,32], index: 1, kind: input, shape index: {}]   ;;  %s9939_s2 = inlined_call_operand.vmem [shape: f32[1,32], index: 2, kind: input, shape index: {}]   ;;  %s9940_s3 = inlined_call_operand.vmem [shape: bf16[2,6,96,32], index: 3, kind: input, shape index: {}]   ;;  %s9941_s4 = inlined_call_operand.vmem [shape: f32[2,2,1,32], index: 4, kind: input, shape index: {}]   ;;  %s9942_s5 = inlined_call_operand.vmem [shape: bf16[3,96,4], index: 5, kind: input, shape index: {}]   ;;  %s9943_s6 = inlined_call_operand.vmem [shape: f32[2,16,16,4], index: 6, kind: output, shape index: {}]  }
   0x1 LB: > { %s5866_s22 = sadd.s32 4294967295, %s8080_s21   ;;  %p5870_p0 = scmp.ge.s32.totalorder %s8080_s21, 1  ;;  %s8080_s21 = sphi %s8129_s21, %s16_s21  }
   0x2   : > { %p212_p1 = scmp.lt.s32.totalorder %s8080_s21, 3 }
   0x4   : > { %p213_p2 = pnand %p5870_p0, %p212_p1 }
   0x5   : > { %vm253_vm0 = vcmask (!%p213_p2), 48128   ;;  %v8086_v0 = vmov (!%p213_p2), 0.0   ;;  %p242_p3 = scmp.lt.s32.totalorder (!%p213_p2), %s5866_s22, 1  ;;  %v8234_v1 = vld [vmem:[%s9938_s1] sm:$0xff] (!%p213_p2)   ;;  %s8087_s8 = smov (!%p213_p2), 12   ;;  %vm996_vm1 = vcmask (!%p213_p2), 1040384  }
   0x6   : > { %216 = sbr.rel (%p213_p2) target bundleno = 1923 (0x783), region = 44  ;;  %254 = vst.msk [vmem:[#allocation2 + $0x8] sm:$0xff] (!%p213_p2), %vm253_vm0, %v8086_v0  ;;  %255 = vst.msk [vmem:[#allocation2 + $0x10] sm:$0xff] (!%p213_p2), %vm253_vm0, %v8086_v0  ;;  %6522 = vmatprep.subr.bf16.mxu0 (!%p213_p2), %v8234_v1  ;;  %s8088_s9 = smov (!%p213_p2), 6   ;;  %vm876_vm2 = vcmask (!%p213_p2), 97280   ;;  %vm947_vm3 = vcmask (!%p213_p2), 146432  }
   0x7   : > { %277 = vst.msk [vmem:[#allocation2 + $0x18] sm:$0xff] (!%p213_p2), %vm253_vm0, %v8086_v0  ;;  %257 = vst.msk [vmem:[#allocation2 + $0x228] sm:$0xff] (!%p213_p2), %vm253_vm0, %v8086_v0  ;;  %6523 = vmatpush3.bf16.msra.mxu0 (!%p213_p2), %v8234_v1  ;;  %vm295_vm4 = vcmask (!%p213_p2), 261120  }
   0x8   : > { %258 = vst.msk [vmem:[#allocation2 + $0x230] sm:$0xff] (!%p213_p2), %vm253_vm0, %v8086_v0  ;;  %259 = vst.msk [vmem:[#allocation2] sm:$0xff] (!%p213_p2), %vm253_vm0, %v8086_v0 }
   0x9   : > { %260 = vst.msk [vmem:[#allocation2 + $0x20] sm:$0xff] (!%p213_p2), %vm253_vm0, %v8086_v0  ;;  %261 = vst.msk [vmem:[#allocation2 + $0x40] sm:$0xff] (!%p213_p2), %vm253_vm0, %v8086_v0 }
   0xa   : > { %262 = vst.msk [vmem:[#allocation2 + $0x60] sm:$0xff] (!%p213_p2), %vm253_vm0, %v8086_v0  ;;  %263 = vst.msk [vmem:[#allocation2 + $0x80] sm:$0xff] (!%p213_p2), %vm253_vm0, %v8086_v0 }
   0xb   : > { %264 = vst.msk [vmem:[#allocation2 + $0xa0] sm:$0xff] (!%p213_p2), %vm253_vm0, %v8086_v0  ;;  %265 = vst.msk [vmem:[#allocation2 + $0xc0] sm:$0xff] (!%p213_p2), %vm253_vm0, %v8086_v0 }
   0xc   : > { %266 = vst.msk [vmem:[#allocation2 + $0xe0] sm:$0xff] (!%p213_p2), %vm253_vm0, %v8086_v0  ;;  %267 = vst.msk [vmem:[#allocation2 + $0x100] sm:$0xff] (!%p213_p2), %vm253_vm0, %v8086_v0 }
   0xd   : > { %268 = vst.msk [vmem:[#allocation2 + $0x120] sm:$0xff] %vm253_vm0, %v8086_v0  ;;  %269 = vst.msk [vmem:[#allocation2 + $0x140] sm:$0xff] %vm253_vm0, %v8086_v0  ;;  %s9945_s22 = smov (!%p242_p3, %s5866_s22), 1  ;;  %v516_v5 = vld [vmem:[#allocation2 + $0x9] sm:$0xff] }
   0xe   : > { %270 = vst.msk [vmem:[#allocation2 + $0x160] sm:$0xff] %vm253_vm0, %v8086_v0  ;;  %271 = vst.msk [vmem:[#allocation2 + $0x180] sm:$0xff] %vm253_vm0, %v8086_v0  ;;  %s6231_s23 = sshll.u32 %s9945_s22, 8  ;;  %v517_v6 = vld [vmem:[#allocation2 + $0x11] sm:$0xff]  ;;  %v480_v7 = vld [vmem:[#allocation2 + $0x8] sm:$0xff] }
   0xf   : > { %272 = vst.msk [vmem:[#allocation2 + $0x1a0] sm:$0xff] %vm253_vm0, %v8086_v0  ;;  %273 = vst.msk [vmem:[#allocation2 + $0x1c0] sm:$0xff] %vm253_vm0, %v8086_v0  ;;  %s8224_s26 = scalar_lea.vmem %s9937_s0, %s6231_s23  ;;  %s8229_s29 = scalar_lea.vmem %s9943_s6, %s6231_s23  ;;  %v7295_v8 = vpack.i.bf16 %v517_v6, %v516_v5  ;;  %v481_v9 = vld [vmem:[#allocation2 + $0x10] sm:$0xff] }
  0x10   : > { %274 = vst.msk [vmem:[#allocation2 + $0x1e0] sm:$0xff] %vm253_vm0, %v8086_v0  ;;  %275 = vst.msk [vmem:[#allocation2 + $0x200] sm:$0xff] %vm253_vm0, %v8086_v0  ;;  %v380_v2 = vld [vmem:[%s8224_s26 + $0x10] sm:$0xff]  ;;  %v381_v3 = vld [vmem:[%s8224_s26 + $0x18] sm:$0xff]  ;;  %v7290_v12 = vpack.i.bf16 %v481_v9, %v480_v7  ;;  %s8791_s23 = smov 0  }
  0x11   : > { %276 = vst.msk [vmem:[#allocation2 + $0x220] sm:$0xff] %vm253_vm0, %v8086_v0  ;;  %278 = vst.msk [vmem:[#allocation2 + $0x38] sm:$0xff] %vm253_vm0, %v8086_v0  ;;  %v378_v4 = vld [vmem:[%s8224_s26] sm:$0xff]  ;;  %v379_v10 = vld [vmem:[%s8224_s26 + $0x8] sm:$0xff]  ;;  %7296 = vrot.lane.b32.xlu1 %v7295_v8, %s8087_s8 }
  0x12   : > { %279 = vst.msk [vmem:[#allocation2 + $0x58] sm:$0xff] %vm253_vm0, %v8086_v0  ;;  %280 = vst.msk [vmem:[#allocation2 + $0x78] sm:$0xff] %vm253_vm0, %v8086_v0  ;;  %v384_v11 = vld [vmem:[%s8224_s26 + $0x30] sm:$0xff]  ;;  %v385_v13 = vld [vmem:[%s8224_s26 + $0x38] sm:$0xff]  ;;  %7291 = vrot.lane.b32.xlu0 %v7290_v12, %s8088_s9 }
  0x13   : > { %281 = vst.msk [vmem:[#allocation2 + $0x98] sm:$0xff] %vm253_vm0, %v8086_v0  ;;  %282 = vst.msk [vmem:[#allocation2 + $0xb8] sm:$0xff] %vm253_vm0, %v8086_v0  ;;  %v382_v14 = vld [vmem:[%s8224_s26 + $0x20] sm:$0xff]  ;;  %v383_v15 = vld [vmem:[%s8224_s26 + $0x28] sm:$0xff] }
  0x14   : > { %283 = vst.msk [vmem:[#allocation2 + $0xd8] sm:$0xff] %vm253_vm0, %v8086_v0  ;;  %284 = vst.msk [vmem:[#allocation2 + $0xf8] sm:$0xff] %vm253_vm0, %v8086_v0  ;;  %v388_v16 = vld [vmem:[%s8224_s26 + $0x50] sm:$0xff]  ;;  %v389_v17 = vld [vmem:[%s8224_s26 + $0x58] sm:$0xff] }
  0x15   : > { %285 = vst.msk [vmem:[#allocation2 + $0x118] sm:$0xff] %vm253_vm0, %v8086_v0  ;;  %286 = vst.msk [vmem:[#allocation2 + $0x138] sm:$0xff] %vm253_vm0, %v8086_v0  ;;  %v386_v18 = vld [vmem:[%s8224_s26 + $0x40] sm:$0xff]  ;;  %v387_v19 = vld [vmem:[%s8224_s26 + $0x48] sm:$0xff] }
  0x16   : > { %287 = vst.msk [vmem:[#allocation2 + $0x158] sm:$0xff] %vm253_vm0, %v8086_v0  ;;  %288 = vst.msk [vmem:[#allocation2 + $0x178] sm:$0xff] %vm253_vm0, %v8086_v0  ;;  %v392_v20 = vld [vmem:[%s8224_s26 + $0x70] sm:$0xff]  ;;  %v393_v21 = vld [vmem:[%s8224_s26 + $0x78] sm:$0xff] }
  0x17   : > { %289 = vst.msk [vmem:[#allocation2 + $0x198] sm:$0xff] %vm253_vm0, %v8086_v0  ;;  %290 = vst.msk [vmem:[#allocation2 + $0x1b8] sm:$0xff] %vm253_vm0, %v8086_v0  ;;  %v390_v22 = vld [vmem:[%s8224_s26 + $0x60] sm:$0xff]  ;;  %v391_v23 = vld [vmem:[%s8224_s26 + $0x68] sm:$0xff] }
  0x18   : > { %291 = vst.msk [vmem:[#allocation2 + $0x1d8] sm:$0xff] %vm253_vm0, %v8086_v0  ;;  %292 = vst.msk [vmem:[#allocation2 + $0x1f8] sm:$0xff] %vm253_vm0, %v8086_v0  ;;  %v396_v24 = vld [vmem:[%s8224_s26 + $0x90] sm:$0xff]  ;;  %v397_v25 = vld [vmem:[%s8224_s26 + $0x98] sm:$0xff] }
  0x19   : > { %293 = vst.msk [vmem:[#allocation2 + $0x218] sm:$0xff] %vm253_vm0, %v8086_v0  ;;  %294 = vst.msk [vmem:[#allocation2 + $0x238] sm:$0xff] %vm253_vm0, %v8086_v0  ;;  %v394_v26 = vld [vmem:[%s8224_s26 + $0x80] sm:$0xff]  ;;  %v395_v27 = vld [vmem:[%s8224_s26 + $0x88] sm:$0xff] }
  0x1a   : > { %413 = vst.msk [vmem:[#allocation2 + $0x48] sm:$0xff] %vm253_vm0, %v380_v2  ;;  %414 = vst.msk [vmem:[#allocation2 + $0x50] sm:$0xff] %vm253_vm0, %v381_v3  ;;  %v400_v34 = vld [vmem:[%s8224_s26 + $0xb0] sm:$0xff]  ;;  %v401_v57 = vld [vmem:[%s8224_s26 + $0xb8] sm:$0xff] }
  0x1b   : > { %411 = vst.msk [vmem:[#allocation2 + $0x28] sm:$0xff] %vm253_vm0, %v378_v4  ;;  %412 = vst.msk [vmem:[#allocation2 + $0x30] sm:$0xff] %vm253_vm0, %v379_v10  ;;  %v398_v60 = vld [vmem:[%s8224_s26 + $0xa0] sm:$0xff]  ;;  %v399_v61 = vld [vmem:[%s8224_s26 + $0xa8] sm:$0xff] }
  0x1c   : > { %417 = vst.msk [vmem:[#allocation2 + $0x88] sm:$0xff] %vm253_vm0, %v384_v11  ;;  %418 = vst.msk [vmem:[#allocation2 + $0x90] sm:$0xff] %vm253_vm0, %v385_v13  ;;  %v404_v63 = vld [vmem:[%s8224_s26 + $0xd0] sm:$0xff]  ;;  %v405_v2 = vld [vmem:[%s8224_s26 + $0xd8] sm:$0xff] }
  0x1d   : > { %415 = vst.msk [vmem:[#allocation2 + $0x68] sm:$0xff] %vm253_vm0, %v382_v14  ;;  %416 = vst.msk [vmem:[#allocation2 + $0x70] sm:$0xff] %vm253_vm0, %v383_v15  ;;  %v402_v3 = vld [vmem:[%s8224_s26 + $0xc0] sm:$0xff]  ;;  %v403_v4 = vld [vmem:[%s8224_s26 + $0xc8] sm:$0xff] }
  0x1e   : > { %421 = vst.msk [vmem:[#allocation2 + $0xc8] sm:$0xff] %vm253_vm0, %v388_v16  ;;  %422 = vst.msk [vmem:[#allocation2 + $0xd0] sm:$0xff] %vm253_vm0, %v389_v17  ;;  %v408_v5 = vld [vmem:[%s8224_s26 + $0xf0] sm:$0xff]  ;;  %v409_v6 = vld [vmem:[%s8224_s26 + $0xf8] sm:$0xff] }
  0x1f   : > { %419 = vst.msk [vmem:[#allocation2 + $0xa8] sm:$0xff] %vm253_vm0, %v386_v18  ;;  %420 = vst.msk [vmem:[#allocation2 + $0xb0] sm:$0xff] %vm253_vm0, %v387_v19  ;;  %v406_v8 = vld [vmem:[%s8224_s26 + $0xe0] sm:$0xff]  ;;  %v407_v9 = vld [vmem:[%s8224_s26 + $0xe8] sm:$0xff] }
  0x20   : > { %425 = vst.msk [vmem:[#allocation2 + $0x108] sm:$0xff] %vm253_vm0, %v392_v20  ;;  %426 = vst.msk [vmem:[#allocation2 + $0x110] sm:$0xff] %vm253_vm0, %v393_v21  ;;  %v7470_v13 = vld [vmem:[%s9938_s1 + $0xc] sm:$0xff]   ;;  %v7472_v16 = vld [vmem:[%s9938_s1 + $0x14] ss:$0 sps:$4 sm:$0x11]  }
  0x21   : > { %423 = vst.msk [vmem:[#allocation2 + $0xe8] sm:$0xff] %vm253_vm0, %v390_v22  ;;  %424 = vst.msk [vmem:[#allocation2 + $0xf0] sm:$0xff] %vm253_vm0, %v391_v23  ;;  %v484_v28 = vld [vmem:[#allocation2 + $0x48] sm:$0xff]  ;;  %v485_v29 = vld [vmem:[#allocation2 + $0x50] sm:$0xff]  ;;  %6486 = vmatprep.subr.bf16.mxu1 %v7470_v13  ;;  %v998_v21 = vsel %vm996_vm1, %v7472_v16, 0 }
  0x22   : > { %429 = vst.msk [vmem:[#allocation2 + $0x148] sm:$0xff] %vm253_vm0, %v396_v24  ;;  %v482_v30 = vld [vmem:[#allocation2 + $0x28] sm:$0xff]  ;;  %430 = vst.msk [vmem:[#allocation2 + $0x150] sm:$0xff] %vm253_vm0, %v397_v25  ;;  %v7305_v31 = vpack.i.bf16 %v485_v29, %v484_v28  ;;  %v521_v33 = vld [vmem:[#allocation2 + $0x51] sm:$0xff]  ;;  %6487 = vmatpush3.bf16.msra.mxu1 %v7470_v13 }
  0x23   : > { %427 = vst.msk [vmem:[#allocation2 + $0x128] sm:$0xff] %vm253_vm0, %v394_v26  ;;  %428 = vst.msk [vmem:[#allocation2 + $0x130] sm:$0xff] %vm253_vm0, %v395_v27  ;;  %v520_v32 = vld [vmem:[#allocation2 + $0x49] sm:$0xff]  ;;  %v519_v37 = vld [vmem:[#allocation2 + $0x31] sm:$0xff]  ;;  %7262 = vmatprep.subr.msk.bf16.mxu1 %vm996_vm1, %v7472_v16 }
  0x24   : > { %v483_v35 = vld [vmem:[#allocation2 + $0x30] sm:$0xff]  ;;  %433 = vst.msk [vmem:[#allocation2 + $0x188] sm:$0xff] %vm253_vm0, %v400_v34  ;;  %7306 = vrot.lane.b32.xlu1 %v7305_v31, %s8088_s9  ;;  %v7315_v39 = vpack.i.bf16 %v521_v33, %v520_v32  ;;  %v488_v40 = vld [vmem:[#allocation2 + $0x88] sm:$0xff]  ;;  %434 = vst.msk [vmem:[#allocation2 + $0x190] sm:$0xff] %vm253_vm0, %v401_v57 }
  0x25   : > { %v518_v36 = vld [vmem:[#allocation2 + $0x29] sm:$0xff]  ;;  %v7300_v38 = vpack.i.bf16 %v483_v35, %v482_v30  ;;  %v525_v47 = vld [vmem:[#allocation2 + $0x91] sm:$0xff]  ;;  %431 = vst.msk [vmem:[#allocation2 + $0x168] sm:$0xff] %vm253_vm0, %v398_v60  ;;  %432 = vst.msk [vmem:[#allocation2 + $0x170] sm:$0xff] %vm253_vm0, %v399_v61 }
  0x26   : > { %v489_v41 = vld [vmem:[#allocation2 + $0x90] sm:$0xff]  ;;  %v7310_v42 = vpack.i.bf16 %v519_v37, %v518_v36  ;;  %v486_v43 = vld [vmem:[#allocation2 + $0x68] sm:$0xff]  ;;  %437 = vst.msk [vmem:[#allocation2 + $0x1c8] sm:$0xff] %vm253_vm0, %v404_v63  ;;  %438 = vst.msk [vmem:[#allocation2 + $0x1d0] sm:$0xff] %vm253_vm0, %v405_v2  ;;  %6489 = vmatpush3.bf16.msra.mxu1 %v998_v21 }
  0x27   : > { %7301 = vrot.lane.b32.xlu0 %v7300_v38, %s8088_s9  ;;  %v487_v44 = vld [vmem:[#allocation2 + $0x70] sm:$0xff]  ;;  %v7325_v45 = vpack.i.bf16 %v489_v41, %v488_v40  ;;  %v492_v52 = vld [vmem:[#allocation2 + $0xc8] sm:$0xff]  ;;  %435 = vst.msk [vmem:[#allocation2 + $0x1a8] sm:$0xff] %vm253_vm0, %v402_v3  ;;  %436 = vst.msk [vmem:[#allocation2 + $0x1b0] sm:$0xff] %vm253_vm0, %v403_v4  ;;  %6990 = vmatprep.subr.bf16.mxu1 %v8234_v1 }
  0x28   : > { %7316 = vrot.lane.b32.xlu1 %v7315_v39, %s8087_s8  ;;  %v524_v46 = vld [vmem:[#allocation2 + $0x89] sm:$0xff]  ;;  %v7320_v48 = vpack.i.bf16 %v487_v44, %v486_v43  ;;  %v523_v50 = vld [vmem:[#allocation2 + $0x71] sm:$0xff]  ;;  %441 = vst.msk [vmem:[#allocation2 + $0x208] sm:$0xff] %vm253_vm0, %v408_v5  ;;  %442 = vst.msk [vmem:[#allocation2 + $0x210] sm:$0xff] %vm253_vm0, %v409_v6 }
  0x29   : > { %v522_v49 = vld [vmem:[#allocation2 + $0x69] sm:$0xff]  ;;  %v7335_v51 = vpack.i.bf16 %v525_v47, %v524_v46  ;;  %v529_v59 = vld [vmem:[#allocation2 + $0xd1] sm:$0xff]  ;;  %439 = vst.msk [vmem:[#allocation2 + $0x1e8] sm:$0xff] %vm253_vm0, %v406_v8  ;;  %440 = vst.msk [vmem:[#allocation2 + $0x1f0] sm:$0xff] %vm253_vm0, %v407_v9 }
  0x2a   : > { %v493_v53 = vld [vmem:[#allocation2 + $0xd0] sm:$0xff]  ;;  %v7330_v54 = vpack.i.bf16 %v523_v50, %v522_v49  ;;  %v490_v55 = vld [vmem:[#allocation2 + $0xa8] sm:$0xff]  ;;  %v8343_v36 = vld [vmem:[%s9938_s1 + $0x18] sm:$0xff]   ;;  %296 = vst.msk [vmem:[#allocation3 + $0x8] sm:$0xff] %vm295_vm4, %v8086_v0 }
  0x2b   : > { %7311 = vrot.lane.b32.xlu0 %v7310_v42, %s8087_s8  ;;  %v491_v56 = vld [vmem:[#allocation2 + $0xb0] sm:$0xff]  ;;  %v7345_v62 = vpack.i.bf16 %v493_v53, %v492_v52  ;;  %v496_v14 = vld [vmem:[#allocation2 + $0x108] sm:$0xff]  ;;  %297 = vst.msk [vmem:[#allocation3 + $0x10] sm:$0xff] %vm295_vm4, %v8086_v0  ;;  %299 = vst.msk [vmem:[#allocation3 + $0x228] sm:$0xff] %vm295_vm4, %v8086_v0 }
  0x2c   : > { %7326 = vrot.lane.b32.xlu1 %v7325_v45, %s8088_s9  ;;  %v528_v58 = vld [vmem:[#allocation2 + $0xc9] sm:$0xff]  ;;  %v7340_v7 = vpack.i.bf16 %v491_v56, %v490_v55  ;;  %v527_v11 = vld [vmem:[#allocation2 + $0xb1] sm:$0xff]  ;;  %v8329_v30 = vld [vmem:[%s9938_s1 + $0x8] ss:$0 sps:$4 sm:$0x11]   ;;  %300 = vst.msk [vmem:[#allocation3 + $0x230] sm:$0xff] %vm295_vm4, %v8086_v0 }
  0x2d   : > { %v526_v10 = vld [vmem:[#allocation2 + $0xa9] sm:$0xff]  ;;  %v7355_v12 = vpack.i.bf16 %v529_v59, %v528_v58  ;;  %v533_v23 = vld [vmem:[#allocation2 + $0x111] sm:$0xff]  ;;  %7263 = vmatprep.subr.msk.bf16.mxu0 %vm996_vm1, %v8329_v30  ;;  %v8336_v34 = vsel %vm996_vm1, %v8329_v30, 0  ;;  %301 = vst.msk [vmem:[#allocation3] sm:$0xff] %vm295_vm4, %v8086_v0  ;;  %302 = vst.msk [vmem:[#allocation3 + $0x20] sm:$0xff] %vm295_vm4, %v8086_v0 }
  0x2e   : > { %v497_v15 = vld [vmem:[#allocation2 + $0x110] sm:$0xff]  ;;  %v7350_v17 = vpack.i.bf16 %v527_v11, %v526_v10  ;;  %v494_v18 = vld [vmem:[#allocation2 + $0xe8] sm:$0xff]  ;;  %6525 = vmatpush3.bf16.msra.mxu0 %v8336_v34  ;;  %303 = vst.msk [vmem:[#allocation3 + $0x40] sm:$0xff] %vm295_vm4, %v8086_v0  ;;  %304 = vst.msk [vmem:[#allocation3 + $0x60] sm:$0xff] %vm295_vm4, %v8086_v0 }
  0x2f   : > { %7321 = vrot.lane.b32.xlu0 %v7320_v48, %s8088_s9  ;;  %v495_v19 = vld [vmem:[#allocation2 + $0xf0] sm:$0xff]  ;;  %v7365_v20 = vpack.i.bf16 %v497_v15, %v496_v14  ;;  %v500_v28 = vld [vmem:[#allocation2 + $0x148] sm:$0xff]  ;;  %6558 = vmatprep.subr.bf16.mxu0 %v8343_v36  ;;  %305 = vst.msk [vmem:[#allocation3 + $0x80] sm:$0xff] %vm295_vm4, %v8086_v0  ;;  %306 = vst.msk [vmem:[#allocation3 + $0xa0] sm:$0xff] %vm295_vm4, %v8086_v0 }
  0x30   : > { %7336 = vrot.lane.b32.xlu1 %v7335_v51, %s8087_s8  ;;  %v532_v22 = vld [vmem:[#allocation2 + $0x109] sm:$0xff]  ;;  %v7360_v24 = vpack.i.bf16 %v495_v19, %v494_v18  ;;  %v531_v26 = vld [vmem:[#allocation2 + $0xf1] sm:$0xff]  ;;  %307 = vst.msk [vmem:[#allocation3 + $0xc0] sm:$0xff] %vm295_vm4, %v8086_v0  ;;  %308 = vst.msk [vmem:[#allocation3 + $0xe0] sm:$0xff] %vm295_vm4, %v8086_v0 }
  0x31   : > { %v530_v25 = vld [vmem:[#allocation2 + $0xe9] sm:$0xff]  ;;  %v7375_v27 = vpack.i.bf16 %v533_v23, %v532_v22  ;;  %v537_v38 = vld [vmem:[#allocation2 + $0x151] sm:$0xff]  ;;  %309 = vst.msk [vmem:[#allocation3 + $0x100] sm:$0xff] %vm295_vm4, %v8086_v0  ;;  %310 = vst.msk [vmem:[#allocation3 + $0x120] sm:$0xff] %vm295_vm4, %v8086_v0 }
  0x32   : > { %v501_v29 = vld [vmem:[#allocation2 + $0x150] sm:$0xff]  ;;  %v7370_v31 = vpack.i.bf16 %v531_v26, %v530_v25  ;;  %v498_v32 = vld [vmem:[#allocation2 + $0x128] sm:$0xff]  ;;  %311 = vst.msk [vmem:[#allocation3 + $0x140] sm:$0xff] %vm295_vm4, %v8086_v0  ;;  %312 = vst.msk [vmem:[#allocation3 + $0x160] sm:$0xff] %vm295_vm4, %v8086_v0 }
  0x33   : > { %7331 = vrot.lane.b32.xlu0 %v7330_v54, %s8087_s8  ;;  %v499_v33 = vld [vmem:[#allocation2 + $0x130] sm:$0xff]  ;;  %v7385_v35 = vpack.i.bf16 %v501_v29, %v500_v28  ;;  %v504_v43 = vld [vmem:[#allocation2 + $0x188] sm:$0xff]  ;;  %313 = vst.msk [vmem:[#allocation3 + $0x180] sm:$0xff] %vm295_vm4, %v8086_v0  ;;  %314 = vst.msk [vmem:[#allocation3 + $0x1a0] sm:$0xff] %vm295_vm4, %v8086_v0 }
  0x34   : > { %7346 = vrot.lane.b32.xlu1 %v7345_v62, %s8088_s9  ;;  %v536_v37 = vld [vmem:[#allocation2 + $0x149] sm:$0xff]  ;;  %v7380_v39 = vpack.i.bf16 %v499_v33, %v498_v32  ;;  %v535_v41 = vld [vmem:[#allocation2 + $0x131] sm:$0xff]  ;;  %315 = vst.msk [vmem:[#allocation3 + $0x1c0] sm:$0xff] %vm295_vm4, %v8086_v0  ;;  %316 = vst.msk [vmem:[#allocation3 + $0x1e0] sm:$0xff] %vm295_vm4, %v8086_v0 }
  0x35   : > { %v534_v40 = vld [vmem:[#allocation2 + $0x129] sm:$0xff]  ;;  %v7395_v42 = vpack.i.bf16 %v537_v38, %v536_v37  ;;  %v541_v50 = vld [vmem:[#allocation2 + $0x191] sm:$0xff]  ;;  %317 = vst.msk [vmem:[#allocation3 + $0x200] sm:$0xff] %vm295_vm4, %v8086_v0  ;;  %318 = vst.msk [vmem:[#allocation3 + $0x220] sm:$0xff] %vm295_vm4, %v8086_v0 }
  0x36   : > { %v505_v44 = vld [vmem:[#allocation2 + $0x190] sm:$0xff]  ;;  %v7390_v45 = vpack.i.bf16 %v535_v41, %v534_v40  ;;  %v502_v46 = vld [vmem:[#allocation2 + $0x168] sm:$0xff]  ;;  %319 = vst.msk [vmem:[#allocation3 + $0x18] sm:$0xff] %vm295_vm4, %v8086_v0  ;;  %320 = vst.msk [vmem:[#allocation3 + $0x38] sm:$0xff] %vm295_vm4, %v8086_v0 }
  0x37   : > { %7341 = vrot.lane.b32.xlu0 %v7340_v7, %s8088_s9  ;;  %v503_v47 = vld [vmem:[#allocation2 + $0x170] sm:$0xff]  ;;  %v7405_v48 = vpack.i.bf16 %v505_v44, %v504_v43  ;;  %v508_v55 = vld [vmem:[#allocation2 + $0x1c8] sm:$0xff]  ;;  %321 = vst.msk [vmem:[#allocation3 + $0x58] sm:$0xff] %vm295_vm4, %v8086_v0  ;;  %322 = vst.msk [vmem:[#allocation3 + $0x78] sm:$0xff] %vm295_vm4, %v8086_v0 }
  0x38   : > { %7356 = vrot.lane.b32.xlu1 %v7355_v12, %s8087_s8  ;;  %v540_v49 = vld [vmem:[#allocation2 + $0x189] sm:$0xff]  ;;  %v7400_v51 = vpack.i.bf16 %v503_v47, %v502_v46  ;;  %v539_v53 = vld [vmem:[#allocation2 + $0x171] sm:$0xff]  ;;  %323 = vst.msk [vmem:[#allocation3 + $0x98] sm:$0xff] %vm295_vm4, %v8086_v0  ;;  %324 = vst.msk [vmem:[#allocation3 + $0xb8] sm:$0xff] %vm295_vm4, %v8086_v0 }
  0x39   : > { %v538_v52 = vld [vmem:[#allocation2 + $0x169] sm:$0xff]  ;;  %v7415_v54 = vpack.i.bf16 %v541_v50, %v540_v49  ;;  %v545_v62 = vld [vmem:[#allocation2 + $0x1d1] sm:$0xff]  ;;  %325 = vst.msk [vmem:[#allocation3 + $0xd8] sm:$0xff] %vm295_vm4, %v8086_v0  ;;  %326 = vst.msk [vmem:[#allocation3 + $0xf8] sm:$0xff] %vm295_vm4, %v8086_v0 }
  0x3a   : > { %v509_v56 = vld [vmem:[#allocation2 + $0x1d0] sm:$0xff]  ;;  %v7410_v57 = vpack.i.bf16 %v539_v53, %v538_v52  ;;  %v506_v58 = vld [vmem:[#allocation2 + $0x1a8] sm:$0xff]  ;;  %327 = vst.msk [vmem:[#allocation3 + $0x118] sm:$0xff] %vm295_vm4, %v8086_v0  ;;  %328 = vst.msk [vmem:[#allocation3 + $0x138] sm:$0xff] %vm295_vm4, %v8086_v0 }
  0x3b   : > { %7351 = vrot.lane.b32.xlu0 %v7350_v17, %s8087_s8  ;;  %v507_v59 = vld [vmem:[#allocation2 + $0x1b0] sm:$0xff]  ;;  %v7425_v60 = vpack.i.bf16 %v509_v56, %v508_v55  ;;  %v512_v5 = vld [vmem:[#allocation2 + $0x208] sm:$0xff]  ;;  %329 = vst.msk [vmem:[#allocation3 + $0x158] sm:$0xff] %vm295_vm4, %v8086_v0  ;;  %330 = vst.msk [vmem:[#allocation3 + $0x178] sm:$0xff] %vm295_vm4, %v8086_v0 }
  0x3c   : > { %7366 = vrot.lane.b32.xlu1 %v7365_v20, %s8088_s9  ;;  %v544_v61 = vld [vmem:[#allocation2 + $0x1c9] sm:$0xff]  ;;  %v7420_v63 = vpack.i.bf16 %v507_v59, %v506_v58  ;;  %v543_v3 = vld [vmem:[#allocation2 + $0x1b1] sm:$0xff]  ;;  %331 = vst.msk [vmem:[#allocation3 + $0x198] sm:$0xff] %vm295_vm4, %v8086_v0  ;;  %332 = vst.msk [vmem:[#allocation3 + $0x1b8] sm:$0xff] %vm295_vm4, %v8086_v0 }
  0x3d   : > { %v542_v2 = vld [vmem:[#allocation2 + $0x1a9] sm:$0xff]  ;;  %v7435_v4 = vpack.i.bf16 %v545_v62, %v544_v61  ;;  %v549_v12 = vld [vmem:[#allocation2 + $0x211] sm:$0xff]  ;;  %333 = vst.msk [vmem:[#allocation3 + $0x1d8] sm:$0xff] %vm295_vm4, %v8086_v0  ;;  %334 = vst.msk [vmem:[#allocation3 + $0x1f8] sm:$0xff] %vm295_vm4, %v8086_v0 }
  0x3e   : > { %v513_v6 = vld [vmem:[#allocation2 + $0x210] sm:$0xff]  ;;  %v7430_v7 = vpack.i.bf16 %v543_v3, %v542_v2  ;;  %v510_v8 = vld [vmem:[#allocation2 + $0x1e8] sm:$0xff]  ;;  %335 = vst.msk [vmem:[#allocation3 + $0x218] sm:$0xff] %vm295_vm4, %v8086_v0  ;;  %336 = vst.msk [vmem:[#allocation3 + $0x238] sm:$0xff] %vm295_vm4, %v8086_v0 }
  0x3f   : > { %7361 = vrot.lane.b32.xlu0 %v7360_v24, %s8088_s9  ;;  %v511_v9 = vld [vmem:[#allocation2 + $0x1f0] sm:$0xff]  ;;  %v7445_v10 = vpack.i.bf16 %v513_v6, %v512_v5  ;;  %v514_v20 = vld [vmem:[#allocation2 + $0x228] sm:$0xff]  ;;  %337 = vst.msk [vmem:[#allocation4 + $0x8] sm:$0xff] %vm295_vm4, %v8086_v0  ;;  %338 = vst.msk [vmem:[#allocation4 + $0x10] sm:$0xff] %vm295_vm4, %v8086_v0 }
  0x40   : > { %7376 = vrot.lane.b32.xlu1 %v7375_v27, %s8087_s8  ;;  %v548_v11 = vld [vmem:[#allocation2 + $0x209] sm:$0xff]  ;;  %v7440_v13 = vpack.i.bf16 %v511_v9, %v510_v8  ;;  %v547_v15 = vld [vmem:[#allocation2 + $0x1f1] sm:$0xff]  ;;  %v7475_v8 = vld [vmem:[%s9938_s1 + $0x20] ss:$0 sps:$4 sm:$0x11]   ;;  %340 = vst.msk [vmem:[#allocation4 + $0x228] sm:$0xff] %vm295_vm4, %v8086_v0 }
  0x41   : > { %v546_v14 = vld [vmem:[#allocation2 + $0x1e9] sm:$0xff]  ;;  %v7455_v16 = vpack.i.bf16 %v549_v12, %v548_v11  ;;  %v551_v18 = vld [vmem:[#allocation2 + $0x231] sm:$0xff]  ;;  %341 = vst.msk [vmem:[#allocation4 + $0x230] sm:$0xff] %vm295_vm4, %v8086_v0  ;;  %342 = vst.msk [vmem:[#allocation4] sm:$0xff] %vm295_vm4, %v8086_v0 }
  0x42   : > { %v550_v17 = vld [vmem:[#allocation2 + $0x229] sm:$0xff]  ;;  %v7450_v19 = vpack.i.bf16 %v547_v15, %v546_v14  ;;  %343 = vst.msk [vmem:[#allocation4 + $0x20] sm:$0xff] %vm295_vm4, %v8086_v0  ;;  %344 = vst.msk [vmem:[#allocation4 + $0x40] sm:$0xff] %vm295_vm4, %v8086_v0 }
  0x43   : > { %7371 = vrot.lane.b32.xlu0 %v7370_v31, %s8087_s8  ;;  %v515_v21 = vld [vmem:[#allocation2 + $0x230] sm:$0xff]  ;;  %v7465_v22 = vpack.i.bf16 %v551_v18, %v550_v17  ;;  %v444_v28 = vld [vmem:[#allocation2 + $0x7] sm:$0xff]  ;;  %345 = vst.msk [vmem:[#allocation4 + $0x60] sm:$0xff] %vm295_vm4, %v8086_v0  ;;  %346 = vst.msk [vmem:[#allocation4 + $0x80] sm:$0xff] %vm295_vm4, %v8086_v0 }
  0x44   : > { %7386 = vrot.lane.b32.xlu1 %v7385_v35, %s8088_s9  ;;  %v7460_v23 = vpack.i.bf16 %v515_v21, %v514_v20  ;;  %v445_v29 = vld [vmem:[#allocation2 + $0xf] sm:$0xff]  ;;  %v448_v44 = vld [vmem:[#allocation2 + $0x47] sm:$0xff]  ;;  %v1354_v21 = vsel %vm996_vm1, %v7475_v8, 0  ;;  %347 = vst.msk [vmem:[#allocation4 + $0xa0] sm:$0xff] %vm295_vm4, %v8086_v0  ;;  %348 = vst.msk [vmem:[#allocation4 + $0xc0] sm:$0xff] %vm295_vm4, %v8086_v0 }
  0x45   : > { %v447_v52 = vld [vmem:[#allocation2 + $0x2f] sm:$0xff]  ;;  %v452_v9 = vld [vmem:[#allocation2 + $0x87] sm:$0xff]  ;;  %349 = vst.msk [vmem:[#allocation4 + $0xe0] sm:$0xff] %vm295_vm4, %v8086_v0  ;;  %350 = vst.msk [vmem:[#allocation4 + $0x100] sm:$0xff] %vm295_vm4, %v8086_v0 }
  0x46   : > { %v450_v14 = vld [vmem:[#allocation2 + $0x67] sm:$0xff]  ;;  %v451_v15 = vld [vmem:[#allocation2 + $0x6f] sm:$0xff]  ;;  %351 = vst.msk [vmem:[#allocation4 + $0x120] sm:$0xff] %vm295_vm4, %v8086_v0  ;;  %352 = vst.msk [vmem:[#allocation4 + $0x140] sm:$0xff] %vm295_vm4, %v8086_v0 }
  0x47   : > { %7381 = vrot.lane.b32.xlu0 %v7380_v39, %s8088_s9  ;;  %353 = vst.msk [vmem:[#allocation4 + $0x160] sm:$0xff] %vm295_vm4, %v8086_v0  ;;  %354 = vst.msk [vmem:[#allocation4 + $0x180] sm:$0xff] %vm295_vm4, %v8086_v0 }
  0x48   : > { %7396 = vrot.lane.b32.xlu1 %v7395_v42, %s8087_s8  ;;  %355 = vst.msk [vmem:[#allocation4 + $0x1a0] sm:$0xff] %vm295_vm4, %v8086_v0  ;;  %356 = vst.msk [vmem:[#allocation4 + $0x1c0] sm:$0xff] %vm295_vm4, %v8086_v0 }
  0x49   : > { %357 = vst.msk [vmem:[#allocation4 + $0x1e0] sm:$0xff] %vm295_vm4, %v8086_v0  ;;  %358 = vst.msk [vmem:[#allocation4 + $0x200] sm:$0xff] %vm295_vm4, %v8086_v0 }
  0x4a   : > { %359 = vst.msk [vmem:[#allocation4 + $0x220] sm:$0xff] %vm295_vm4, %v8086_v0  ;;  %360 = vst.msk [vmem:[#allocation4 + $0x18] sm:$0xff] %vm295_vm4, %v8086_v0 }
  0x4b   : > { %7391 = vrot.lane.b32.xlu0 %v7390_v45, %s8087_s8  ;;  %v449_v45 = vld [vmem:[#allocation2 + $0x4f] sm:$0xff]  ;;  %361 = vst.msk [vmem:[#allocation4 + $0x38] sm:$0xff] %vm295_vm4, %v8086_v0  ;;  %362 = vst.msk [vmem:[#allocation4 + $0x58] sm:$0xff] %vm295_vm4, %v8086_v0 }
  0x4c   : > { %7406 = vrot.lane.b32.xlu1 %v7405_v48, %s8088_s9  ;;  %363 = vst.msk [vmem:[#allocation4 + $0x78] sm:$0xff] %vm295_vm4, %v8086_v0  ;;  %364 = vst.msk [vmem:[#allocation4 + $0x98] sm:$0xff] %vm295_vm4, %v8086_v0 }
  0x4d   : > { %365 = vst.msk [vmem:[#allocation4 + $0xb8] sm:$0xff] %vm295_vm4, %v8086_v0  ;;  %366 = vst.msk [vmem:[#allocation4 + $0xd8] sm:$0xff] %vm295_vm4, %v8086_v0 }
  0x4e   : > { %367 = vst.msk [vmem:[#allocation4 + $0xf8] sm:$0xff] %vm295_vm4, %v8086_v0  ;;  %368 = vst.msk [vmem:[#allocation4 + $0x118] sm:$0xff] %vm295_vm4, %v8086_v0 }
  0x4f   : > { %7401 = vrot.lane.b32.xlu0 %v7400_v51, %s8088_s9  ;;  %v446_v51 = vld [vmem:[#allocation2 + $0x27] sm:$0xff]  ;;  %369 = vst.msk [vmem:[#allocation4 + $0x138] sm:$0xff] %vm295_vm4, %v8086_v0  ;;  %370 = vst.msk [vmem:[#allocation4 + $0x158] sm:$0xff] %vm295_vm4, %v8086_v0 }
  0x50   : > { %7416 = vrot.lane.b32.xlu1 %v7415_v54, %s8087_s8  ;;  %371 = vst.msk [vmem:[#allocation4 + $0x178] sm:$0xff] %vm295_vm4, %v8086_v0  ;;  %372 = vst.msk [vmem:[#allocation4 + $0x198] sm:$0xff] %vm295_vm4, %v8086_v0 }
  0x51   : > { %373 = vst.msk [vmem:[#allocation4 + $0x1b8] sm:$0xff] %vm295_vm4, %v8086_v0  ;;  %374 = vst.msk [vmem:[#allocation4 + $0x1d8] sm:$0xff] %vm295_vm4, %v8086_v0 }
  0x52   : > { %375 = vst.msk [vmem:[#allocation4 + $0x1f8] sm:$0xff] %vm295_vm4, %v8086_v0  ;;  %376 = vst.msk [vmem:[#allocation4 + $0x218] sm:$0xff] %vm295_vm4, %v8086_v0 }
  0x53   : > { %7411 = vrot.lane.b32.xlu0 %v7410_v57, %s8087_s8  ;;  %377 = vst.msk [vmem:[#allocation4 + $0x238] sm:$0xff] %vm295_vm4, %v8086_v0  ;;  %v8721_v0 = vld [vmem:[%s9939_s2] ss:$0 sm:$0xff] }
  0x54   : > { %7426 = vrot.lane.b32.xlu1 %v7425_v60, %s8088_s9 }
  0x57   : > { %7421 = vrot.lane.b32.xlu0 %v7420_v63, %s8088_s9 }
  0x58   : > { %7436 = vrot.lane.b32.xlu1 %v7435_v4, %s8087_s8 }
  0x5b   : > { %7431 = vrot.lane.b32.xlu0 %v7430_v7, %s8087_s8 }
  0x5c   : > { %7446 = vrot.lane.b32.xlu1 %v7445_v10, %s8088_s9  ;;  %v453_v10 = vld [vmem:[#allocation2 + $0x8f] sm:$0xff] }
  0x5f   : > { %7441 = vrot.lane.b32.xlu0 %v7440_v13, %s8088_s9 }
  0x60   : > { %7456 = vrot.lane.b32.xlu1 %v7455_v16, %s8087_s8 }
  0x63   : > { %7451 = vrot.lane.b32.xlu0 %v7450_v19, %s8087_s8 }
  0x64   : > { %7466 = vrot.lane.b32.xlu1 %v7465_v22, %s8087_s8 }
  0x67   : > { %7461 = vrot.lane.b32.xlu0 %v7460_v23, %s8088_s9 }
  0x83   : > { %v7297_v24 = vpop.permute.xlu1 %7296 }
  0x84   : > { %v7299_v25 = vunpack.i.h.bf16 %v7297_v24  ;;  %v7298_v26 = vunpack.i.l.bf16 %v7297_v24  ;;  %v7292_v27 = vpop.permute.xlu0 %7291 }
  0x85   : > { %v7294_v31 = vunpack.i.h.bf16 %v7292_v27  ;;  %v7293_v32 = vunpack.i.l.bf16 %v7292_v27 }
  0x87   : > { %v840_v33 = vsel %vm253_vm0, %v444_v28, %v7293_v32  ;;  %v841_v35 = vsel %vm253_vm0, %v445_v29, %v7294_v31 }
  0x88   : > { %v877_v37 = vsel %vm876_vm2, %v840_v33, %v7298_v26  ;;  %v878_v38 = vsel %vm876_vm2, %v841_v35, %v7299_v25 }
  0x89   : > { %v913_v39 = vpack.c.bf16 %v878_v38, %v877_v37  ;;  %v457_v37 = vld [vmem:[#allocation2 + $0xcf] sm:$0xff] }
  0x8b   : > { %6526 = vmatprep.mubr.msk.bf16.mxu0 %vm947_vm3, %v913_v39 }
  0x96   : > { %v7307_v40 = vpop.permute.xlu1 %7306 }
  0x97   : > { %v7309_v41 = vunpack.i.h.bf16 %v7307_v40  ;;  %v7308_v42 = vunpack.i.l.bf16 %v7307_v40 }
  0x99   : > { %v7302_v43 = vpop.permute.xlu0 %7301  ;;  %v844_v53 = vsel %vm253_vm0, %v448_v44, %v7308_v42  ;;  %v845_v54 = vsel %vm253_vm0, %v449_v45, %v7309_v41  ;;  %v454_v41 = vld [vmem:[#allocation2 + $0xa7] sm:$0xff]  ;;  %v455_v42 = vld [vmem:[#allocation2 + $0xaf] sm:$0xff] }
  0x9a   : > { %v7304_v46 = vunpack.i.h.bf16 %v7302_v43  ;;  %v7303_v47 = vunpack.i.l.bf16 %v7302_v43  ;;  %v7317_v48 = vpop.permute.xlu1 %7316 }
  0x9b   : > { %v7319_v49 = vunpack.i.h.bf16 %v7317_v48  ;;  %v7318_v50 = vunpack.i.l.bf16 %v7317_v48 }
  0x9c   : > { %v842_v61 = vsel %vm253_vm0, %v446_v51, %v7303_v47  ;;  %v843_v62 = vsel %vm253_vm0, %v447_v52, %v7304_v46 }
  0x9d   : > { %v7312_v55 = vpop.permute.xlu0 %7311  ;;  %v881_v56 = vsel %vm876_vm2, %v844_v53, %v7318_v50  ;;  %v882_v57 = vsel %vm876_vm2, %v845_v54, %v7319_v49 }
  0x9e   : > { %v7314_v58 = vunpack.i.h.bf16 %v7312_v55  ;;  %v7313_v59 = vunpack.i.l.bf16 %v7312_v55  ;;  %v7327_v60 = vpop.permute.xlu1 %7326  ;;  %v8376_v63 = vpack.c.bf16 %v882_v57, %v881_v56 }
  0x9f   : > { %v7329_v4 = vunpack.i.h.bf16 %v7327_v60  ;;  %v7328_v5 = vunpack.i.l.bf16 %v7327_v60 }
  0xa0   : > { %v879_v2 = vsel %vm876_vm2, %v842_v61, %v7313_v59  ;;  %v880_v3 = vsel %vm876_vm2, %v843_v62, %v7314_v58  ;;  %v460_v61 = vld [vmem:[#allocation2 + $0x107] sm:$0xff]  ;;  %v461_v62 = vld [vmem:[#allocation2 + $0x10f] sm:$0xff] }
  0xa1   : > { %v7322_v6 = vpop.permute.xlu0 %7321  ;;  %v914_v7 = vpack.c.bf16 %v880_v3, %v879_v2  ;;  %v849_v18 = vsel %vm253_vm0, %v453_v10, %v7329_v4  ;;  %v848_v19 = vsel %vm253_vm0, %v452_v9, %v7328_v5  ;;  %v458_v5 = vld [vmem:[#allocation2 + $0xe7] sm:$0xff] }
  0xa2   : > { %v7324_v11 = vunpack.i.h.bf16 %v7322_v6  ;;  %v7323_v12 = vunpack.i.l.bf16 %v7322_v6  ;;  %v7337_v13 = vpop.permute.xlu1 %7336  ;;  %v459_v6 = vld [vmem:[#allocation2 + $0xef] sm:$0xff] }
  0xa3   : > { %6490 = vmatprep.mubr.msk.bf16.mxu1 %vm947_vm3, %v914_v7  ;;  %6527 = vmatmul.mubr.msk.bf16.vlgmr.msra.gmra.mrb[0].mxu0 %vm947_vm3, %v914_v7  ;;  %v7339_v16 = vunpack.i.h.bf16 %v7337_v13  ;;  %v7338_v17 = vunpack.i.l.bf16 %v7337_v13 }
  0xa4   : > { %6491 = vmatmul.mubr.msk.bf16.vlgmr.msra.gmra.mrb[0].mxu1 %vm947_vm3, %v8376_v63  ;;  %6530 = vmatprep.mubr.msk.bf16.mxu0 %vm947_vm3, %v8376_v63  ;;  %v847_v26 = vsel %vm253_vm0, %v451_v15, %v7324_v11 }
  0xa5   : > { %6992 = vmatpush3.bf16.msra.mxu1 %v8234_v1  ;;  %6559 = vmatpush3.bf16.msra.mxu0 %v8343_v36  ;;  %v7332_v20 = vpop.permute.xlu0 %7331  ;;  %v885_v22 = vsel %vm876_vm2, %v848_v19, %v7338_v17  ;;  %v886_v23 = vsel %vm876_vm2, %v849_v18, %v7339_v16  ;;  %v846_v1 = vsel %vm253_vm0, %v450_v14, %v7323_v12 }
  0xa6   : > { %v7334_v24 = vunpack.i.h.bf16 %v7332_v20  ;;  %v7333_v25 = vunpack.i.l.bf16 %v7332_v20  ;;  %7265 = vmatprep.subr.msk.bf16.mxu0 %vm996_vm1, %v7475_v8  ;;  %7264 = vmatprep.subr.msk.bf16.mxu1 %vm996_vm1, %v8329_v30  ;;  %v7347_v27 = vpop.permute.xlu1 %7346  ;;  %v8401_v36 = vpack.c.bf16 %v886_v23, %v885_v22  ;;  %v456_v30 = vld [vmem:[#allocation2 + $0xc7] sm:$0xff] }
  0xa7   : > { %v7349_v32 = vunpack.i.h.bf16 %v7347_v27  ;;  %v7348_v33 = vunpack.i.l.bf16 %v7347_v27 }
  0xa8   : > { %v883_v28 = vsel %vm876_vm2, %v846_v1, %v7333_v25  ;;  %v884_v29 = vsel %vm876_vm2, %v847_v26, %v7334_v24  ;;  %v464_v26 = vld [vmem:[#allocation2 + $0x147] sm:$0xff]  ;;  %v465_v1 = vld [vmem:[#allocation2 + $0x14f] sm:$0xff] }
  0xa9   : > { %v8405_v31 = vpack.c.bf16 %v884_v29, %v883_v28  ;;  %v7342_v35 = vpop.permute.xlu0 %7341  ;;  %6561 = vmatpush3.bf16.msra.mxu0 %v1354_v21  ;;  %6993 = vmatpush3.bf16.msra.mxu1 %v8336_v34  ;;  %v853_v44 = vsel %vm253_vm0, %v457_v37, %v7349_v32  ;;  %v852_v45 = vsel %vm253_vm0, %v456_v30, %v7348_v33  ;;  %v462_v32 = vld [vmem:[#allocation2 + $0x127] sm:$0xff]  ;;  %v463_v33 = vld [vmem:[#allocation2 + $0x12f] sm:$0xff] }
  0xaa   : > { %v7344_v38 = vunpack.i.h.bf16 %v7342_v35  ;;  %v7343_v39 = vunpack.i.l.bf16 %v7342_v35  ;;  %v7357_v40 = vpop.permute.xlu1 %7356 }
  0xab   : > { %6494 = vmatprep.mubr.msk.bf16.mxu1 %vm947_vm3, %v8405_v31  ;;  %6531 = vmatmul.mubr.msk.bf16.gmra.mrb[4].mxu0 %vm947_vm3, %v8405_v31  ;;  %v7359_v34 = vunpack.i.h.bf16 %v7357_v40  ;;  %v7358_v43 = vunpack.i.l.bf16 %v7357_v40 }
  0xac   : > { %6495 = vmatmul.mubr.msk.bf16.gmra.mrb[4].mxu1 %vm947_vm3, %v8401_v36  ;;  %6534 = vmatprep.mubr.msk.bf16.mxu0 %vm947_vm3, %v8401_v36  ;;  %v851_v51 = vsel %vm253_vm0, %v455_v42, %v7344_v38  ;;  %v850_v52 = vsel %vm253_vm0, %v454_v41, %v7343_v39 }
  0xad   : > { %v7352_v46 = vpop.permute.xlu0 %7351  ;;  %v889_v47 = vsel %vm876_vm2, %v852_v45, %v7358_v43  ;;  %v890_v48 = vsel %vm876_vm2, %v853_v44, %v7359_v34 }
  0xae   : > { %v7354_v49 = vunpack.i.h.bf16 %v7352_v46  ;;  %v7353_v50 = vunpack.i.l.bf16 %v7352_v46  ;;  %v7367_v53 = vpop.permute.xlu1 %7366  ;;  %v8422_v54 = vpack.c.bf16 %v890_v48, %v889_v47 }
  0xaf   : > { %v7369_v58 = vunpack.i.h.bf16 %v7367_v53  ;;  %v7368_v59 = vunpack.i.l.bf16 %v7367_v53  ;;  %v469_v53 = vld [vmem:[#allocation2 + $0x18f] sm:$0xff] }
  0xb0   : > { %v887_v55 = vsel %vm876_vm2, %v850_v52, %v7353_v50  ;;  %v888_v56 = vsel %vm876_vm2, %v851_v51, %v7354_v49  ;;  %v468_v52 = vld [vmem:[#allocation2 + $0x187] sm:$0xff] }
  0xb1   : > { %v8426_v57 = vpack.c.bf16 %v888_v56, %v887_v55  ;;  %v7362_v60 = vpop.permute.xlu0 %7361  ;;  %v857_v9 = vsel %vm253_vm0, %v461_v62, %v7369_v58  ;;  %v856_v10 = vsel %vm253_vm0, %v460_v61, %v7368_v59  ;;  %v466_v59 = vld [vmem:[#allocation2 + $0x167] sm:$0xff] }
  0xb2   : > { %v7364_v2 = vunpack.i.h.bf16 %v7362_v60  ;;  %v7363_v3 = vunpack.i.l.bf16 %v7362_v60  ;;  %v7377_v4 = vpop.permute.xlu1 %7376  ;;  %v467_v60 = vld [vmem:[#allocation2 + $0x16f] sm:$0xff] }
  0xb3   : > { %6498 = vmatprep.mubr.msk.bf16.mxu1 %vm947_vm3, %v8426_v57  ;;  %6535 = vmatmul.mubr.msk.bf16.gmra.mrb[8].mxu0 %vm947_vm3, %v8426_v57  ;;  %v7379_v7 = vunpack.i.h.bf16 %v7377_v4  ;;  %v7378_v8 = vunpack.i.l.bf16 %v7377_v4 }
  0xb4   : > { %6499 = vmatmul.mubr.msk.bf16.gmra.mrb[8].mxu1 %vm947_vm3, %v8422_v54  ;;  %6538 = vmatprep.mubr.msk.bf16.mxu0 %vm947_vm3, %v8422_v54  ;;  %v855_v16 = vsel %vm253_vm0, %v459_v6, %v7364_v2  ;;  %v854_v17 = vsel %vm253_vm0, %v458_v5, %v7363_v3 }
  0xb5   : > { %v7372_v11 = vpop.permute.xlu0 %7371  ;;  %v893_v12 = vsel %vm876_vm2, %v856_v10, %v7378_v8  ;;  %v894_v13 = vsel %vm876_vm2, %v857_v9, %v7379_v7 }
  0xb6   : > { %v7374_v14 = vunpack.i.h.bf16 %v7372_v11  ;;  %v7373_v15 = vunpack.i.l.bf16 %v7372_v11  ;;  %v7387_v18 = vpop.permute.xlu1 %7386  ;;  %v8442_v19 = vpack.c.bf16 %v894_v13, %v893_v12 }
  0xb7   : > { %v7389_v23 = vunpack.i.h.bf16 %v7387_v18  ;;  %v7388_v24 = vunpack.i.l.bf16 %v7387_v18  ;;  %v473_v18 = vld [vmem:[#allocation2 + $0x1cf] sm:$0xff] }
  0xb8   : > { %v891_v20 = vsel %vm876_vm2, %v854_v17, %v7373_v15  ;;  %v892_v21 = vsel %vm876_vm2, %v855_v16, %v7374_v14  ;;  %v472_v17 = vld [vmem:[#allocation2 + $0x1c7] sm:$0xff] }
  0xb9   : > { %v8446_v22 = vpack.c.bf16 %v892_v21, %v891_v20  ;;  %v7382_v25 = vpop.permute.xlu0 %7381  ;;  %v861_v37 = vsel %vm253_vm0, %v465_v1, %v7389_v23  ;;  %v860_v38 = vsel %vm253_vm0, %v464_v26, %v7388_v24  ;;  %v470_v24 = vld [vmem:[#allocation2 + $0x1a7] sm:$0xff] }
  0xba   : > { %v7384_v27 = vunpack.i.h.bf16 %v7382_v25  ;;  %v7383_v28 = vunpack.i.l.bf16 %v7382_v25  ;;  %v7397_v29 = vpop.permute.xlu1 %7396  ;;  %v471_v25 = vld [vmem:[#allocation2 + $0x1af] sm:$0xff] }
  0xbb   : > { %6502 = vmatprep.mubr.msk.bf16.mxu1 %vm947_vm3, %v8446_v22  ;;  %6539 = vmatmul.mubr.msk.bf16.gmra.mrb[12].mxu0 %vm947_vm3, %v8446_v22  ;;  %v7399_v35 = vunpack.i.h.bf16 %v7397_v29  ;;  %v7398_v30 = vunpack.i.l.bf16 %v7397_v29 }
  0xbc   : > { %6503 = vmatmul.mubr.msk.bf16.gmra.mrb[12].mxu1 %vm947_vm3, %v8442_v19  ;;  %6562 = vmatprep.mubr.msk.bf16.mxu0 %vm947_vm3, %v8376_v63  ;;  %v859_v43 = vsel %vm253_vm0, %v463_v33, %v7384_v27  ;;  %v858_v44 = vsel %vm253_vm0, %v462_v32, %v7383_v28 }
  0xbd   : > { %v7392_v39 = vpop.permute.xlu0 %7391  ;;  %v897_v40 = vsel %vm876_vm2, %v860_v38, %v7398_v30  ;;  %v898_v41 = vsel %vm876_vm2, %v861_v37, %v7399_v35 }
  0xbe   : > { %v7394_v42 = vunpack.i.h.bf16 %v7392_v39  ;;  %v7393_v34 = vunpack.i.l.bf16 %v7392_v39  ;;  %v7407_v45 = vpop.permute.xlu1 %7406  ;;  %v8462_v46 = vpack.c.bf16 %v898_v41, %v897_v40 }
  0xbf   : > { %v7409_v49 = vunpack.i.h.bf16 %v7407_v45  ;;  %v7408_v50 = vunpack.i.l.bf16 %v7407_v45  ;;  %v477_v45 = vld [vmem:[#allocation2 + $0x20f] sm:$0xff] }
  0xc0   : > { %v895_v63 = vsel %vm876_vm2, %v858_v44, %v7393_v34  ;;  %v896_v47 = vsel %vm876_vm2, %v859_v43, %v7394_v42  ;;  %v476_v44 = vld [vmem:[#allocation2 + $0x207] sm:$0xff] }
  0xc1   : > { %v8466_v48 = vpack.c.bf16 %v896_v47, %v895_v63  ;;  %v7402_v51 = vpop.permute.xlu0 %7401  ;;  %v865_v2 = vsel %vm253_vm0, %v469_v53, %v7409_v49  ;;  %v864_v3 = vsel %vm253_vm0, %v468_v52, %v7408_v50  ;;  %v474_v50 = vld [vmem:[#allocation2 + $0x1e7] sm:$0xff] }
  0xc2   : > { %v7404_v55 = vunpack.i.h.bf16 %v7402_v51  ;;  %v7403_v56 = vunpack.i.l.bf16 %v7402_v51  ;;  %v7417_v58 = vpop.permute.xlu1 %7416  ;;  %v475_v51 = vld [vmem:[#allocation2 + $0x1ef] sm:$0xff] }
  0xc3   : > { %6506 = vmatprep.mubr.msk.bf16.mxu1 %vm947_vm3, %v8466_v48  ;;  %6563 = vmatmul.mubr.msk.bf16.vlgmr.msra.gmra.mrb[0].mxu0 %vm947_vm3, %v8405_v31  ;;  %v7419_v61 = vunpack.i.h.bf16 %v7417_v58  ;;  %v7418_v62 = vunpack.i.l.bf16 %v7417_v58 }
  0xc4   : > { %6507 = vmatmul.mubr.msk.bf16.gmra.mrb[16].mxu1 %vm947_vm3, %v8462_v46  ;;  %6566 = vmatprep.mubr.msk.bf16.mxu0 %vm947_vm3, %v8401_v36  ;;  %v863_v8 = vsel %vm253_vm0, %v467_v60, %v7404_v55  ;;  %v862_v9 = vsel %vm253_vm0, %v466_v59, %v7403_v56 }
  0xc5   : > { %v7412_v4 = vpop.permute.xlu0 %7411  ;;  %v901_v5 = vsel %vm876_vm2, %v864_v3, %v7418_v62  ;;  %v902_v31 = vsel %vm876_vm2, %v865_v2, %v7419_v61 }
  0xc6   : > { %v7414_v6 = vunpack.i.h.bf16 %v7412_v4  ;;  %v7413_v7 = vunpack.i.l.bf16 %v7412_v4  ;;  %v7427_v10 = vpop.permute.xlu1 %7426  ;;  %v8482_v11 = vpack.c.bf16 %v902_v31, %v901_v5 }
  0xc7   : > { %v7429_v14 = vunpack.i.h.bf16 %v7427_v10  ;;  %v7428_v15 = vunpack.i.l.bf16 %v7427_v10 }
  0xc8   : > { %v899_v36 = vsel %vm876_vm2, %v862_v9, %v7413_v7  ;;  %v900_v12 = vsel %vm876_vm2, %v863_v8, %v7414_v6  ;;  %v478_v8 = vld [vmem:[#allocation2 + $0x227] sm:$0xff]  ;;  %v479_v9 = vld [vmem:[#allocation2 + $0x22f] sm:$0xff] }
  0xc9   : > { %v8486_v13 = vpack.c.bf16 %v900_v12, %v899_v36  ;;  %v7422_v16 = vpop.permute.xlu0 %7421  ;;  %v869_v27 = vsel %vm253_vm0, %v473_v18, %v7429_v14  ;;  %v868_v28 = vsel %vm253_vm0, %v472_v17, %v7428_v15 }
  0xca   : > { %v7424_v20 = vunpack.i.h.bf16 %v7422_v16  ;;  %v7423_v21 = vunpack.i.l.bf16 %v7422_v16  ;;  %v7437_v23 = vpop.permute.xlu1 %7436 }
  0xcb   : > { %6510 = vmatprep.mubr.msk.bf16.mxu1 %vm947_vm3, %v8486_v13  ;;  %6567 = vmatmul.mubr.msk.bf16.gmra.mrb[4].mxu0 %vm947_vm3, %v8426_v57  ;;  %v7439_v26 = vunpack.i.h.bf16 %v7437_v23  ;;  %v7438_v1 = vunpack.i.l.bf16 %v7437_v23 }
  0xcc   : > { %6511 = vmatmul.mubr.msk.bf16.gmra.mrb[20].mxu1 %vm947_vm3, %v8482_v11  ;;  %6570 = vmatprep.mubr.msk.bf16.mxu0 %vm947_vm3, %v8422_v54  ;;  %v867_v30 = vsel %vm253_vm0, %v471_v25, %v7424_v20  ;;  %v866_v37 = vsel %vm253_vm0, %v470_v24, %v7423_v21 }
  0xcd   : > { %v7432_v29 = vpop.permute.xlu0 %7431  ;;  %v905_v32 = vsel %vm876_vm2, %v868_v28, %v7438_v1  ;;  %v906_v57 = vsel %vm876_vm2, %v869_v27, %v7439_v26 }
  0xce   : > { %v7434_v33 = vunpack.i.h.bf16 %v7432_v29  ;;  %v7433_v35 = vunpack.i.l.bf16 %v7432_v29  ;;  %v7447_v38 = vpop.permute.xlu1 %7446  ;;  %v927_v39 = vpack.c.bf16 %v906_v57, %v905_v32 }
  0xcf   : > { %v7449_v42 = vunpack.i.h.bf16 %v7447_v38  ;;  %v7448_v34 = vunpack.i.l.bf16 %v7447_v38 }
  0xd0   : > { %v903_v54 = vsel %vm876_vm2, %v866_v37, %v7433_v35  ;;  %v904_v40 = vsel %vm876_vm2, %v867_v30, %v7434_v33 }
  0xd1   : > { %v926_v41 = vpack.c.bf16 %v904_v40, %v903_v54  ;;  %v7442_v43 = vpop.permute.xlu0 %7441  ;;  %v873_v55 = vsel %vm253_vm0, %v477_v45, %v7449_v42  ;;  %v872_v56 = vsel %vm253_vm0, %v476_v44, %v7448_v34 }
  0xd2   : > { %v7444_v63 = vunpack.i.h.bf16 %v7442_v43  ;;  %v7443_v47 = vunpack.i.l.bf16 %v7442_v43  ;;  %v7457_v49 = vpop.permute.xlu1 %7456 }
  0xd3   : > { %6514 = vmatprep.mubr.msk.bf16.mxu1 %vm947_vm3, %v926_v41  ;;  %6571 = vmatmul.mubr.msk.bf16.gmra.mrb[8].mxu0 %vm947_vm3, %v8446_v22  ;;  %v7459_v52 = vunpack.i.h.bf16 %v7457_v49  ;;  %v7458_v53 = vunpack.i.l.bf16 %v7457_v49 }
  0xd4   : > { %6515 = vmatmul.mubr.msk.bf16.gmra.mrb[24].mxu1 %vm947_vm3, %v927_v39  ;;  %6574 = vmatprep.mubr.msk.bf16.mxu0 %vm947_vm3, %v8442_v19  ;;  %v871_v62 = vsel %vm253_vm0, %v475_v51, %v7444_v63  ;;  %v870_v2 = vsel %vm253_vm0, %v474_v50, %v7443_v47 }
  0xd5   : > { %v7452_v58 = vpop.permute.xlu0 %7451  ;;  %v909_v59 = vsel %vm876_vm2, %v872_v56, %v7458_v53  ;;  %v910_v60 = vsel %vm876_vm2, %v873_v55, %v7459_v52 }
  0xd6   : > { %v7454_v22 = vunpack.i.h.bf16 %v7452_v58  ;;  %v7453_v61 = vunpack.i.l.bf16 %v7452_v58  ;;  %v929_v3 = vpack.c.bf16 %v910_v60, %v909_v59 }
  0xd8   : > { %v907_v4 = vsel %vm876_vm2, %v870_v2, %v7453_v61  ;;  %v908_v5 = vsel %vm876_vm2, %v871_v62, %v7454_v22 }
  0xd9   : > { %v928_v31 = vpack.c.bf16 %v908_v5, %v907_v4  ;;  %v7462_v6 = vpop.permute.xlu0 %7461 }
  0xda   : > { %v7463_v7 = vunpack.i.l.bf16 %v7462_v6 }
  0xdb   : > { %6518 = vmatprep.mubr.msk.bf16.mxu1 %vm947_vm3, %v928_v31  ;;  %6575 = vmatmul.mubr.msk.bf16.gmra.mrb[12].mxu0 %vm947_vm3, %v8466_v48 }
  0xdc   : > { %6519 = vmatmul.mubr.msk.bf16.gmra.mrb[28].mxu1 %vm947_vm3, %v929_v3  ;;  %6578 = vmatprep.mubr.msk.bf16.mxu0 %vm947_vm3, %v8462_v46  ;;  %v874_v12 = vsel %vm253_vm0, %v478_v8, %v7463_v7 }
  0xdd   : > { %6542 = vmatprep.mubr.msk.bf16.mxu1 %vm947_vm3, %v8442_v19  ;;  %v7464_v19 = vunpack.i.h.bf16 %v7462_v6 }
  0xe3   : > { %6579 = vmatmul.mubr.msk.bf16.gmra.mrb[16].mxu0 %vm947_vm3, %v8486_v13 }
  0xe4   : > { %6543 = vmatmul.mubr.msk.bf16.vlgmr.msra.gmra.mrb[16].mxu1 %vm947_vm3, %v8466_v48  ;;  %6582 = vmatprep.mubr.msk.bf16.mxu0 %vm947_vm3, %v8482_v11  ;;  %v7467_v48 = vpop.permute.xlu1 %7466 }
  0xe5   : > { %6546 = vmatprep.mubr.msk.bf16.mxu1 %vm947_vm3, %v8462_v46  ;;  %v7469_v10 = vunpack.i.h.bf16 %v7467_v48  ;;  %v7468_v36 = vunpack.i.l.bf16 %v7467_v48  ;;  %v875_v46 = vsel %vm253_vm0, %v479_v9, %v7464_v19 }
  0xeb   : > { %6583 = vmatmul.mubr.msk.bf16.gmra.mrb[20].mxu0 %vm947_vm3, %v926_v41 }
  0xec   : > { %6547 = vmatmul.mubr.msk.bf16.gmra.mrb[20].mxu1 %vm947_vm3, %v8486_v13  ;;  %6586 = vmatprep.mubr.msk.bf16.mxu0 %vm947_vm3, %v927_v39  ;;  %v911_v13 = vsel %vm876_vm2, %v874_v12, %v7468_v36 }
  0xed   : > { %6550 = vmatprep.mubr.msk.bf16.mxu1 %vm947_vm3, %v8482_v11  ;;  %v912_v11 = vsel %vm876_vm2, %v875_v46, %v7469_v10 }
  0xee   : > { %v930_v14 = vpack.c.bf16 %v912_v11, %v911_v13 }
  0xf3   : > { %6587 = vmatmul.mubr.msk.bf16.gmra.mrb[24].mxu0 %vm947_vm3, %v928_v31 }
  0xf4   : > { %6551 = vmatmul.mubr.msk.bf16.gmra.mrb[24].mxu1 %vm947_vm3, %v926_v41  ;;  %6590 = vmatprep.mubr.msk.bf16.mxu0 %vm947_vm3, %v929_v3 }
  0xf5   : > { %6554 = vmatprep.mubr.msk.bf16.mxu1 %vm947_vm3, %v927_v39 }
  0xfb   : > { %6591 = vmatmul.mubr.msk.bf16.gmra.mrb[28].mxu0 %vm947_vm3, %v930_v14 }
  0xfc   : > { %6555 = vmatmul.mubr.msk.bf16.gmra.mrb[28].mxu1 %vm947_vm3, %v928_v31 }
 0x177   : > { %v6492_v15 = vpop.f32.mrb[0].mxu1 }
 0x178   : > { %v1034_v16 = vpop.f32.mrb[1].mxu1 }
 0x179   : > { %v6493_v17 = vpop.f32.mrb[2].mxu1 }
 0x17a   : > { %v1037_v18 = vpop.f32.mrb[3].mxu1 }
 0x17f   : > { %v6496_v20 = vpop.f32.mrb[4].mxu1 }
 0x180   : > { %v1050_v21 = vpop.f32.mrb[5].mxu1 }
 0x181   : > { %v6497_v23 = vpop.f32.mrb[6].mxu1 }
 0x182   : > { %v1053_v24 = vpop.f32.mrb[7].mxu1 }
 0x187   : > { %v6500_v25 = vpop.f32.mrb[8].mxu1 }
 0x188   : > { %v1066_v26 = vpop.f32.mrb[9].mxu1 }
 0x189   : > { %v6501_v1 = vpop.f32.mrb[10].mxu1 }
 0x18a   : > { %v1069_v27 = vpop.f32.mrb[11].mxu1 }
 0x18f   : > { %v8710_v28 = vpop.f32.mrb[12].mxu1 }
 0x190   : > { %v8712_v29 = vpop.f32.mrb[13].mxu1 }
 0x191   : > { %v8714_v32 = vpop.f32.mrb[14].mxu1 }
 0x192   : > { %v8716_v57 = vpop.f32.mrb[15].mxu1 }
 0x196   : > { %v6564_v33 = vpop.f32.mrb[0].mxu0 }
 0x197   : > { %v6994_v35 = vadd.f32 %v6564_v33, %v6492_v15  ;;  %v1390_v30 = vpop.f32.mrb[1].mxu0 }
 0x198   : > { %v6995_v37 = vadd.f32 %v1390_v30, %v1034_v16  ;;  %v6565_v38 = vpop.f32.mrb[2].mxu0 }
 0x199   : > { %v1557_v39 = vadd.f32 %v6994_v35, %v8721_v0  ;;  %v6996_v54 = vadd.f32 %v6565_v38, %v6493_v17  ;;  %v1393_v40 = vpop.f32.mrb[3].mxu0 }
 0x19a   : > { %v1555_v41 = vadd.f32 %v6995_v37, %v8721_v0  ;;  %v6997_v42 = vadd.f32 %v1393_v40, %v1037_v18 }
 0x19b   : > { %v1589_v34 = vmax.f32 %v1557_v39, 0.0  ;;  %v1558_v43 = vadd.f32 %v6996_v54, %v8721_v0 }
 0x19c   : > { %v1587_v44 = vmax.f32 %v1555_v41, 0.0  ;;  %v1556_v45 = vadd.f32 %v6997_v42, %v8721_v0 }
 0x19d   : > { %1622 = vst.msk [vmem:[#allocation3 + $0x48] sm:$0xff] %vm295_vm4, %v1589_v34  ;;  %v1590_v63 = vmax.f32 %v1558_v43, 0.0 }
 0x19e   : > { %1620 = vst.msk [vmem:[#allocation3 + $0x28] sm:$0xff] %vm295_vm4, %v1587_v44  ;;  %v1588_v47 = vmax.f32 %v1556_v45, 0.0  ;;  %v6568_v49 = vpop.f32.mrb[4].mxu0 }
 0x19f   : > { %1623 = vst.msk [vmem:[#allocation3 + $0x50] sm:$0xff] %vm295_vm4, %v1590_v63  ;;  %v6998_v50 = vadd.f32 %v6568_v49, %v6496_v20  ;;  %v1406_v51 = vpop.f32.mrb[5].mxu0 }
 0x1a0   : > { %1621 = vst.msk [vmem:[#allocation3 + $0x30] sm:$0xff] %vm295_vm4, %v1588_v47  ;;  %v6999_v52 = vadd.f32 %v1406_v51, %v1050_v21  ;;  %v6569_v53 = vpop.f32.mrb[6].mxu0 }
 0x1a1   : > { %v1561_v55 = vadd.f32 %v6998_v50, %v8721_v0  ;;  %v7000_v56 = vadd.f32 %v6569_v53, %v6497_v23  ;;  %v1409_v58 = vpop.f32.mrb[7].mxu0 }
 0x1a2   : > { %v1559_v59 = vadd.f32 %v6999_v52, %v8721_v0  ;;  %v7001_v60 = vadd.f32 %v1409_v58, %v1053_v24 }
 0x1a3   : > { %v1593_v22 = vmax.f32 %v1561_v55, 0.0  ;;  %v1562_v61 = vadd.f32 %v7000_v56, %v8721_v0 }
 0x1a4   : > { %v1591_v62 = vmax.f32 %v1559_v59, 0.0  ;;  %v1560_v2 = vadd.f32 %v7001_v60, %v8721_v0 }
 0x1a5   : > { %1626 = vst.msk [vmem:[#allocation3 + $0x88] sm:$0xff] %vm295_vm4, %v1593_v22  ;;  %v1594_v3 = vmax.f32 %v1562_v61, 0.0 }
 0x1a6   : > { %1624 = vst.msk [vmem:[#allocation3 + $0x68] sm:$0xff] %vm295_vm4, %v1591_v62  ;;  %v1592_v4 = vmax.f32 %v1560_v2, 0.0  ;;  %v6572_v5 = vpop.f32.mrb[8].mxu0 }
 0x1a7   : > { %1627 = vst.msk [vmem:[#allocation3 + $0x90] sm:$0xff] %vm295_vm4, %v1594_v3  ;;  %v7002_v31 = vadd.f32 %v6572_v5, %v6500_v25  ;;  %v1422_v6 = vpop.f32.mrb[9].mxu0 }
 0x1a8   : > { %1625 = vst.msk [vmem:[#allocation3 + $0x70] sm:$0xff] %vm295_vm4, %v1592_v4  ;;  %v7003_v19 = vadd.f32 %v1422_v6, %v1066_v26  ;;  %v6573_v7 = vpop.f32.mrb[10].mxu0 }
 0x1a9   : > { %v1565_v48 = vadd.f32 %v7002_v31, %v8721_v0  ;;  %v7004_v8 = vadd.f32 %v6573_v7, %v6501_v1  ;;  %v1425_v9 = vpop.f32.mrb[11].mxu0 }
 0x1aa   : > { %v1563_v10 = vadd.f32 %v7003_v19, %v8721_v0  ;;  %v7005_v36 = vadd.f32 %v1425_v9, %v1069_v27 }
 0x1ab   : > { %v1597_v46 = vmax.f32 %v1565_v48, 0.0  ;;  %v1566_v12 = vadd.f32 %v7004_v8, %v8721_v0 }
 0x1ac   : > { %v1595_v13 = vmax.f32 %v1563_v10, 0.0  ;;  %v1564_v11 = vadd.f32 %v7005_v36, %v8721_v0 }
 0x1ad   : > { %1630 = vst.msk [vmem:[#allocation3 + $0xc8] sm:$0xff] %vm295_vm4, %v1597_v46  ;;  %v1598_v14 = vmax.f32 %v1566_v12, 0.0 }
 0x1ae   : > { %1628 = vst.msk [vmem:[#allocation3 + $0xa8] sm:$0xff] %vm295_vm4, %v1595_v13  ;;  %v1596_v15 = vmax.f32 %v1564_v11, 0.0  ;;  %v6576_v16 = vpop.f32.mrb[12].mxu0 }
 0x1af   : > { %1631 = vst.msk [vmem:[#allocation3 + $0xd0] sm:$0xff] %vm295_vm4, %v1598_v14  ;;  %v7006_v17 = vadd.f32 %v6576_v16, %v8710_v28  ;;  %v1438_v18 = vpop.f32.mrb[13].mxu0 }
 0x1b0   : > { %1629 = vst.msk [vmem:[#allocation3 + $0xb0] sm:$0xff] %vm295_vm4, %v1596_v15  ;;  %v7007_v20 = vadd.f32 %v1438_v18, %v8712_v29  ;;  %v6577_v21 = vpop.f32.mrb[14].mxu0 }
 0x1b1   : > { %v1569_v23 = vadd.f32 %v7006_v17, %v8721_v0  ;;  %v7008_v24 = vadd.f32 %v6577_v21, %v8714_v32  ;;  %v1441_v25 = vpop.f32.mrb[15].mxu0 }
 0x1b2   : > { %v1567_v26 = vadd.f32 %v7007_v20, %v8721_v0  ;;  %v7009_v1 = vadd.f32 %v1441_v25, %v8716_v57 }
 0x1b3   : > { %v1601_v27 = vmax.f32 %v1569_v23, 0.0  ;;  %v1570_v33 = vadd.f32 %v7008_v24, %v8721_v0 }
 0x1b4   : > { %v1599_v35 = vmax.f32 %v1567_v26, 0.0  ;;  %v1568_v28 = vadd.f32 %v7009_v1, %v8721_v0 }
 0x1b5   : > { %1634 = vst.msk [vmem:[#allocation3 + $0x108] sm:$0xff] %vm295_vm4, %v1601_v27  ;;  %v1602_v30 = vmax.f32 %v1570_v33, 0.0 }
 0x1b6   : > { %1632 = vst.msk [vmem:[#allocation3 + $0xe8] sm:$0xff] %vm295_vm4, %v1599_v35  ;;  %v1600_v29 = vmax.f32 %v1568_v28, 0.0  ;;  %v6580_v37 = vpop.f32.mrb[16].mxu0 }
 0x1b7   : > { %1635 = vst.msk [vmem:[#allocation3 + $0x110] sm:$0xff] %vm295_vm4, %v1602_v30  ;;  %v6544_v32 = vpop.f32.mrb[16].mxu1  ;;  %v1454_v38 = vpop.f32.mrb[17].mxu0 }
 0x1b8   : > { %1633 = vst.msk [vmem:[#allocation3 + $0xf0] sm:$0xff] %vm295_vm4, %v1600_v29  ;;  %v7010_v57 = vadd.f32 %v6580_v37, %v6544_v32  ;;  %v1274_v39 = vpop.f32.mrb[17].mxu1  ;;  %v6581_v54 = vpop.f32.mrb[18].mxu0 }
 0x1b9   : > { %v7011_v40 = vadd.f32 %v1454_v38, %v1274_v39  ;;  %v6545_v41 = vpop.f32.mrb[18].mxu1  ;;  %v1457_v42 = vpop.f32.mrb[19].mxu0 }
 0x1ba   : > { %v1573_v34 = vadd.f32 %v7010_v57, %v8721_v0  ;;  %v7012_v43 = vadd.f32 %v6581_v54, %v6545_v41  ;;  %v1277_v44 = vpop.f32.mrb[19].mxu1 }
 0x1bb   : > { %v1571_v45 = vadd.f32 %v7011_v40, %v8721_v0  ;;  %v7013_v63 = vadd.f32 %v1457_v42, %v1277_v44 }
 0x1bc   : > { %v1605_v47 = vmax.f32 %v1573_v34, 0.0  ;;  %v1574_v49 = vadd.f32 %v7012_v43, %v8721_v0 }
 0x1bd   : > { %v1603_v50 = vmax.f32 %v1571_v45, 0.0  ;;  %v1572_v51 = vadd.f32 %v7013_v63, %v8721_v0 }
 0x1be   : > { %1638 = vst.msk [vmem:[#allocation3 + $0x148] sm:$0xff] %vm295_vm4, %v1605_v47  ;;  %v1606_v52 = vmax.f32 %v1574_v49, 0.0  ;;  %v6584_v53 = vpop.f32.mrb[20].mxu0 }
 0x1bf   : > { %1636 = vst.msk [vmem:[#allocation3 + $0x128] sm:$0xff] %vm295_vm4, %v1603_v50  ;;  %v1604_v55 = vmax.f32 %v1572_v51, 0.0  ;;  %v6548_v56 = vpop.f32.mrb[20].mxu1  ;;  %v1470_v58 = vpop.f32.mrb[21].mxu0 }
 0x1c0   : > { %1639 = vst.msk [vmem:[#allocation3 + $0x150] sm:$0xff] %vm295_vm4, %v1606_v52  ;;  %v7014_v59 = vadd.f32 %v6584_v53, %v6548_v56  ;;  %v1290_v60 = vpop.f32.mrb[21].mxu1  ;;  %v6585_v22 = vpop.f32.mrb[22].mxu0 }
 0x1c1   : > { %1637 = vst.msk [vmem:[#allocation3 + $0x130] sm:$0xff] %vm295_vm4, %v1604_v55  ;;  %v7015_v61 = vadd.f32 %v1470_v58, %v1290_v60  ;;  %v6549_v62 = vpop.f32.mrb[22].mxu1  ;;  %v1473_v2 = vpop.f32.mrb[23].mxu0 }
 0x1c2   : > { %v1577_v3 = vadd.f32 %v7014_v59, %v8721_v0  ;;  %v7016_v4 = vadd.f32 %v6585_v22, %v6549_v62  ;;  %v1293_v5 = vpop.f32.mrb[23].mxu1 }
 0x1c3   : > { %v1575_v31 = vadd.f32 %v7015_v61, %v8721_v0  ;;  %v7017_v6 = vadd.f32 %v1473_v2, %v1293_v5 }
 0x1c4   : > { %v1609_v19 = vmax.f32 %v1577_v3, 0.0  ;;  %v1578_v7 = vadd.f32 %v7016_v4, %v8721_v0 }
 0x1c5   : > { %v1607_v48 = vmax.f32 %v1575_v31, 0.0  ;;  %v1576_v8 = vadd.f32 %v7017_v6, %v8721_v0 }
 0x1c6   : > { %1642 = vst.msk [vmem:[#allocation3 + $0x188] sm:$0xff] %vm295_vm4, %v1609_v19  ;;  %v1610_v9 = vmax.f32 %v1578_v7, 0.0  ;;  %v6588_v10 = vpop.f32.mrb[24].mxu0 }
 0x1c7   : > { %1640 = vst.msk [vmem:[#allocation3 + $0x168] sm:$0xff] %vm295_vm4, %v1607_v48  ;;  %v1608_v36 = vmax.f32 %v1576_v8, 0.0  ;;  %v6552_v46 = vpop.f32.mrb[24].mxu1  ;;  %v1486_v12 = vpop.f32.mrb[25].mxu0 }
 0x1c8   : > { %1643 = vst.msk [vmem:[#allocation3 + $0x190] sm:$0xff] %vm295_vm4, %v1610_v9  ;;  %v7018_v13 = vadd.f32 %v6588_v10, %v6552_v46  ;;  %v1306_v11 = vpop.f32.mrb[25].mxu1  ;;  %v6589_v14 = vpop.f32.mrb[26].mxu0 }
 0x1c9   : > { %1641 = vst.msk [vmem:[#allocation3 + $0x170] sm:$0xff] %vm295_vm4, %v1608_v36  ;;  %v7019_v15 = vadd.f32 %v1486_v12, %v1306_v11  ;;  %v6553_v16 = vpop.f32.mrb[26].mxu1  ;;  %v1489_v17 = vpop.f32.mrb[27].mxu0 }
 0x1ca   : > { %v1581_v18 = vadd.f32 %v7018_v13, %v8721_v0  ;;  %v7020_v20 = vadd.f32 %v6589_v14, %v6553_v16  ;;  %v1309_v21 = vpop.f32.mrb[27].mxu1 }
 0x1cb   : > { %v1579_v23 = vadd.f32 %v7019_v15, %v8721_v0  ;;  %v7021_v24 = vadd.f32 %v1489_v17, %v1309_v21 }
 0x1cc   : > { %v1613_v25 = vmax.f32 %v1581_v18, 0.0  ;;  %v1582_v26 = vadd.f32 %v7020_v20, %v8721_v0 }
 0x1cd   : > { %v1611_v1 = vmax.f32 %v1579_v23, 0.0  ;;  %v1580_v27 = vadd.f32 %v7021_v24, %v8721_v0 }
 0x1ce   : > { %1646 = vst.msk [vmem:[#allocation3 + $0x1c8] sm:$0xff] %vm295_vm4, %v1613_v25  ;;  %v1614_v33 = vmax.f32 %v1582_v26, 0.0  ;;  %v6592_v35 = vpop.f32.mrb[28].mxu0 }
 0x1cf   : > { %1644 = vst.msk [vmem:[#allocation3 + $0x1a8] sm:$0xff] %vm295_vm4, %v1611_v1  ;;  %v1612_v28 = vmax.f32 %v1580_v27, 0.0  ;;  %v6556_v30 = vpop.f32.mrb[28].mxu1  ;;  %v1502_v29 = vpop.f32.mrb[29].mxu0 }
 0x1d0   : > { %1647 = vst.msk [vmem:[#allocation3 + $0x1d0] sm:$0xff] %vm295_vm4, %v1614_v33  ;;  %v7022_v37 = vadd.f32 %v6592_v35, %v6556_v30  ;;  %v1322_v32 = vpop.f32.mrb[29].mxu1  ;;  %v6593_v38 = vpop.f32.mrb[30].mxu0 }
 0x1d1   : > { %1645 = vst.msk [vmem:[#allocation3 + $0x1b0] sm:$0xff] %vm295_vm4, %v1612_v28  ;;  %v7023_v57 = vadd.f32 %v1502_v29, %v1322_v32  ;;  %v6557_v39 = vpop.f32.mrb[30].mxu1  ;;  %v1505_v54 = vpop.f32.mrb[31].mxu0 }
 0x1d2   : > { %v1585_v40 = vadd.f32 %v7022_v37, %v8721_v0  ;;  %v7024_v41 = vadd.f32 %v6593_v38, %v6557_v39  ;;  %v1325_v42 = vpop.f32.mrb[31].mxu1 }
 0x1d3   : > { %v1583_v34 = vadd.f32 %v7023_v57, %v8721_v0  ;;  %v7025_v43 = vadd.f32 %v1505_v54, %v1325_v42 }
 0x1d4   : > { %v1617_v44 = vmax.f32 %v1585_v40, 0.0  ;;  %v1586_v45 = vadd.f32 %v7024_v41, %v8721_v0 }
 0x1d5   : > { %v1615_v63 = vmax.f32 %v1583_v34, 0.0  ;;  %v1584_v47 = vadd.f32 %v7025_v43, %v8721_v0 }
 0x1d6   : > { %1650 = vst.msk [vmem:[#allocation3 + $0x208] sm:$0xff] %vm295_vm4, %v1617_v44  ;;  %v1618_v49 = vmax.f32 %v1586_v45, 0.0 }
 0x1d7   : > { %1648 = vst.msk [vmem:[#allocation3 + $0x1e8] sm:$0xff] %vm295_vm4, %v1615_v63  ;;  %v1616_v50 = vmax.f32 %v1584_v47, 0.0 }
 0x1d8   : > { %1651 = vst.msk [vmem:[#allocation3 + $0x210] sm:$0xff] %vm295_vm4, %v1618_v49 }
 0x1d9   : > { %1649 = vst.msk [vmem:[#allocation3 + $0x1f0] sm:$0xff] %vm295_vm4, %v1616_v50 }
 0x1da LB: >> { %v1735_v51 = vld [vmem:[#allocation3 + $0x29] sm:$0xff]  ;;  %v1736_v52 = vld [vmem:[#allocation3 + $0x31] sm:$0xff]  ;;  %s8089_s24 = smov 64   ;;  %s8090_s25 = smov 32   ;;  %vm2093_vm5 = vcmask 523264   ;;  %vm2214_vm6 = vcmask 785408   ;;  %s8084_s23 = sphi %s8791_s23, %s1657_s23  }
 0x1db   : >> { %v1699_v0 = vld [vmem:[#allocation3 + $0x28] sm:$0xff]  ;;  %v7486_v53 = vpack.i.bf16 %v1736_v52, %v1735_v51  ;;  %v1700_v55 = vld [vmem:[#allocation3 + $0x30] sm:$0xff]  ;;  %s6233_s27 = smul.u32 288, %s8084_s23  ;;  %s5936_s8 = sshll.u32 %s8084_s23, 1 }
 0x1dc   : >> { %v1737_v56 = vld [vmem:[#allocation3 + $0x49] sm:$0xff]  ;;  %v1738_v58 = vld [vmem:[#allocation3 + $0x51] sm:$0xff]  ;;  %v7476_v59 = vpack.i.bf16 %v1700_v55, %v1699_v0  ;;  %s9070_s11 = scalar_lea.vmem %s9941_s4, %s5936_s8  ;;  %s1657_s23 = sadd.s32 1, %s8084_s23  }
 0x1dd   : >> { %v1701_v60 = vld [vmem:[#allocation3 + $0x48] sm:$0xff]  ;;  %v1702_v22 = vld [vmem:[#allocation3 + $0x50] sm:$0xff]  ;;  %7487 = vrot.lane.b32.xlu1 %v7486_v53, %s8089_s24  ;;  %v7491_v61 = vpack.i.bf16 %v1738_v58, %v1737_v56  ;;  %s8810_s7 = scalar_lea.vmem %s9940_s3, %s6233_s27  ;;  %p1654_p4 = scmp.ge.s32.totalorder %s1657_s23, 2  }
 0x1de   : >> { %7477 = vrot.lane.b32.xlu0 %v7476_v59, %s8090_s25  ;;  %v7481_v62 = vpack.i.bf16 %v1702_v22, %v1701_v60  ;;  %v1705_v2 = vld [vmem:[#allocation3 + $0x88] sm:$0xff]  ;;  %v1706_v3 = vld [vmem:[#allocation3 + $0x90] sm:$0xff]  ;;  %v7837_v29 = vld [vmem:[%s8810_s7 + $0x38] sm:$0xff]   ;;  %s8091_s12 = smov (%p1654_p4), 32   ;;  %s8092_s13 = smov (%p1654_p4), 64   ;;  %vm5746_vm7 = vcmask (%p1654_p4), 31744  }
 0x1df   : >> { %v1703_v4 = vld [vmem:[#allocation3 + $0x68] sm:$0xff]  ;;  %v1704_v5 = vld [vmem:[#allocation3 + $0x70] sm:$0xff]  ;;  %v7501_v31 = vpack.i.bf16 %v1706_v3, %v1705_v2  ;;  %v7838_v38 = vld [vmem:[%s8810_s7 + $0x40] sm:$0xff]   ;;  %s8093_s22 = smov (%p1654_p4), 126  }
 0x1e0   : >> { %v7496_v6 = vpack.i.bf16 %v1704_v5, %v1703_v4  ;;  %v1741_v19 = vld [vmem:[#allocation3 + $0x89] sm:$0xff]  ;;  %v1742_v7 = vld [vmem:[#allocation3 + $0x91] sm:$0xff]  ;;  %v8829_v2 = vld [vmem:[%s8810_s7] sm:$0xff]  }
 0x1e1   : >> { %7492 = vrot.lane.b32.xlu1 %v7491_v61, %s8089_s24  ;;  %v1739_v48 = vld [vmem:[#allocation3 + $0x69] sm:$0xff]  ;;  %v1740_v8 = vld [vmem:[#allocation3 + $0x71] sm:$0xff]  ;;  %v7511_v9 = vpack.i.bf16 %v1742_v7, %v1741_v19 }
 0x1e2   : >> { %7482 = vrot.lane.b32.xlu0 %v7481_v62, %s8090_s25  ;;  %v7506_v10 = vpack.i.bf16 %v1740_v8, %v1739_v48  ;;  %v1709_v36 = vld [vmem:[#allocation3 + $0xc8] sm:$0xff]  ;;  %v1710_v46 = vld [vmem:[#allocation3 + $0xd0] sm:$0xff]  ;;  %v7841_v58 = vld [vmem:[%s8810_s7 + $0x58] sm:$0xff]  }
 0x1e3   : >> { %v1707_v12 = vld [vmem:[#allocation3 + $0xa8] sm:$0xff]  ;;  %v1708_v13 = vld [vmem:[#allocation3 + $0xb0] sm:$0xff]  ;;  %v7521_v11 = vpack.i.bf16 %v1710_v46, %v1709_v36 }
 0x1e4   : >> { %v7516_v14 = vpack.i.bf16 %v1708_v13, %v1707_v12  ;;  %v1745_v15 = vld [vmem:[#allocation3 + $0xc9] sm:$0xff]  ;;  %v1746_v16 = vld [vmem:[#allocation3 + $0xd1] sm:$0xff] }
 0x1e5   : >> { %7502 = vrot.lane.b32.xlu1 %v7501_v31, %s8090_s25  ;;  %v1743_v17 = vld [vmem:[#allocation3 + $0xa9] sm:$0xff]  ;;  %v1744_v18 = vld [vmem:[#allocation3 + $0xb1] sm:$0xff]  ;;  %v7531_v20 = vpack.i.bf16 %v1746_v16, %v1745_v15 }
 0x1e6   : >> { %7497 = vrot.lane.b32.xlu0 %v7496_v6, %s8090_s25  ;;  %v7526_v21 = vpack.i.bf16 %v1744_v18, %v1743_v17  ;;  %v1713_v23 = vld [vmem:[#allocation3 + $0x108] sm:$0xff]  ;;  %v1714_v24 = vld [vmem:[#allocation3 + $0x110] sm:$0xff] }
 0x1e7   : >> { %v1711_v25 = vld [vmem:[#allocation3 + $0xe8] sm:$0xff]  ;;  %v1712_v26 = vld [vmem:[#allocation3 + $0xf0] sm:$0xff]  ;;  %v7541_v33 = vpack.i.bf16 %v1714_v24, %v1713_v23 }
 0x1e8   : >> { %v1749_v1 = vld [vmem:[#allocation3 + $0x109] sm:$0xff]  ;;  %v1750_v27 = vld [vmem:[#allocation3 + $0x111] sm:$0xff]  ;;  %v7536_v30 = vpack.i.bf16 %v1712_v26, %v1711_v25 }
 0x1e9   : >> { %7512 = vrot.lane.b32.xlu1 %v7511_v9, %s8089_s24  ;;  %v1747_v35 = vld [vmem:[#allocation3 + $0xe9] sm:$0xff]  ;;  %v1748_v37 = vld [vmem:[#allocation3 + $0xf1] sm:$0xff]  ;;  %v7551_v32 = vpack.i.bf16 %v1750_v27, %v1749_v1 }
 0x1ea   : >> { %7507 = vrot.lane.b32.xlu0 %v7506_v10, %s8089_s24  ;;  %v7836_v28 = vld [vmem:[%s8810_s7 + $0x30] sm:$0xff]   ;;  %v7546_v57 = vpack.i.bf16 %v1748_v37, %v1747_v35  ;;  %v1717_v39 = vld [vmem:[#allocation3 + $0x148] sm:$0xff] }
 0x1eb   : >> { %6594 = vmatprep.subr.bf16.mxu0 %v7836_v28  ;;  %v1718_v54 = vld [vmem:[#allocation3 + $0x150] sm:$0xff]  ;;  %v1715_v40 = vld [vmem:[#allocation3 + $0x128] sm:$0xff] }
 0x1ec   : >> { %6595 = vmatpush3.bf16.msra.mxu0 %v7836_v28  ;;  %v1716_v41 = vld [vmem:[#allocation3 + $0x130] sm:$0xff]  ;;  %v7561_v42 = vpack.i.bf16 %v1718_v54, %v1717_v39  ;;  %v7839_v34 = vld [vmem:[%s8810_s7 + $0x48] sm:$0xff]  }
 0x1ed   : >> { %7522 = vrot.lane.b32.xlu1 %v7521_v11, %s8090_s25  ;;  %6596 = vmatprep.subr.bf16.mxu0 %v7837_v29  ;;  %v7556_v43 = vpack.i.bf16 %v1716_v41, %v1715_v40  ;;  %v1753_v44 = vld [vmem:[#allocation3 + $0x149] sm:$0xff]  ;;  %v1754_v45 = vld [vmem:[#allocation3 + $0x151] sm:$0xff] }
 0x1ee   : >> { %7517 = vrot.lane.b32.xlu0 %v7516_v14, %s8090_s25  ;;  %v1751_v63 = vld [vmem:[#allocation3 + $0x129] sm:$0xff]  ;;  %v1752_v47 = vld [vmem:[#allocation3 + $0x131] sm:$0xff]  ;;  %v7571_v49 = vpack.i.bf16 %v1754_v45, %v1753_v44 }
 0x1ef   : >> { %v7840_v50 = vld [vmem:[%s8810_s7 + $0x50] sm:$0xff]   ;;  %v7566_v51 = vpack.i.bf16 %v1752_v47, %v1751_v63  ;;  %v1721_v52 = vld [vmem:[#allocation3 + $0x188] sm:$0xff] }
 0x1f0   : >> { %6597 = vmatpush3.bf16.msra.mxu0 %v7837_v29  ;;  %v1722_v0 = vld [vmem:[#allocation3 + $0x190] sm:$0xff]  ;;  %v1719_v53 = vld [vmem:[#allocation3 + $0x168] sm:$0xff] }
 0x1f1   : >> { %7532 = vrot.lane.b32.xlu1 %v7531_v20, %s8089_s24  ;;  %6598 = vmatprep.subr.bf16.mxu0 %v7838_v38  ;;  %v1720_v55 = vld [vmem:[#allocation3 + $0x170] sm:$0xff]  ;;  %v7581_v56 = vpack.i.bf16 %v1722_v0, %v1721_v52  ;;  %v1725_v3 = vld [vmem:[#allocation3 + $0x1c8] sm:$0xff] }
 0x1f2   : >> { %7527 = vrot.lane.b32.xlu0 %v7526_v21, %s8089_s24  ;;  %v7576_v59 = vpack.i.bf16 %v1720_v55, %v1719_v53  ;;  %v1757_v60 = vld [vmem:[#allocation3 + $0x189] sm:$0xff]  ;;  %v1758_v22 = vld [vmem:[#allocation3 + $0x191] sm:$0xff] }
 0x1f3   : >> { %v1755_v61 = vld [vmem:[#allocation3 + $0x169] sm:$0xff]  ;;  %v1756_v62 = vld [vmem:[#allocation3 + $0x171] sm:$0xff]  ;;  %v7591_v5 = vpack.i.bf16 %v1758_v22, %v1757_v60 }
 0x1f4   : >> { %6599 = vmatpush3.bf16.msra.mxu0 %v7838_v38  ;;  %v1726_v4 = vld [vmem:[#allocation3 + $0x1d0] sm:$0xff]  ;;  %v1723_v31 = vld [vmem:[#allocation3 + $0x1a8] sm:$0xff]  ;;  %v7586_v19 = vpack.i.bf16 %v1756_v62, %v1755_v61 }
 0x1f5   : >> { %7542 = vrot.lane.b32.xlu1 %v7541_v33, %s8090_s25  ;;  %6600 = vmatprep.subr.bf16.mxu0 %v7839_v34  ;;  %v1724_v6 = vld [vmem:[#allocation3 + $0x1b0] sm:$0xff]  ;;  %v7601_v8 = vpack.i.bf16 %v1726_v4, %v1725_v3  ;;  %v1729_v46 = vld [vmem:[#allocation3 + $0x208] sm:$0xff] }
 0x1f6   : >> { %7537 = vrot.lane.b32.xlu0 %v7536_v30, %s8090_s25  ;;  %v1761_v7 = vld [vmem:[#allocation3 + $0x1c9] sm:$0xff]  ;;  %v1762_v48 = vld [vmem:[#allocation3 + $0x1d1] sm:$0xff]  ;;  %v7596_v9 = vpack.i.bf16 %v1724_v6, %v1723_v31 }
 0x1f7   : >> { %v1759_v10 = vld [vmem:[#allocation3 + $0x1a9] sm:$0xff]  ;;  %v1760_v36 = vld [vmem:[#allocation3 + $0x1b1] sm:$0xff]  ;;  %v7611_v13 = vpack.i.bf16 %v1762_v48, %v1761_v7 }
 0x1f8   : >> { %6601 = vmatpush3.bf16.msra.mxu0 %v7839_v34  ;;  %v1730_v12 = vld [vmem:[#allocation3 + $0x210] sm:$0xff]  ;;  %v1727_v11 = vld [vmem:[#allocation3 + $0x1e8] sm:$0xff]  ;;  %v7606_v15 = vpack.i.bf16 %v1760_v36, %v1759_v10 }
 0x1f9   : >> { %7552 = vrot.lane.b32.xlu1 %v7551_v32, %s8089_s24  ;;  %6602 = vmatprep.subr.bf16.mxu0 %v7840_v50  ;;  %v1728_v14 = vld [vmem:[#allocation3 + $0x1f0] sm:$0xff]  ;;  %v7621_v18 = vpack.i.bf16 %v1730_v12, %v1729_v46  ;;  %v1697_v27 = vld [vmem:[#allocation3 + $0x8] sm:$0xff] }
 0x1fa   : >> { %7547 = vrot.lane.b32.xlu0 %v7546_v57, %s8089_s24  ;;  %v1765_v16 = vld [vmem:[#allocation3 + $0x209] sm:$0xff]  ;;  %v1766_v17 = vld [vmem:[#allocation3 + $0x211] sm:$0xff]  ;;  %v7616_v20 = vpack.i.bf16 %v1728_v14, %v1727_v11 }
 0x1fb   : >> { %v1763_v21 = vld [vmem:[#allocation3 + $0x1e9] sm:$0xff]  ;;  %v1764_v23 = vld [vmem:[#allocation3 + $0x1f1] sm:$0xff]  ;;  %v7631_v24 = vpack.i.bf16 %v1766_v17, %v1765_v16 }
 0x1fc   : >> { %6603 = vmatpush3.bf16.msra.mxu0 %v7840_v50  ;;  %v1733_v25 = vld [vmem:[#allocation3 + $0x9] sm:$0xff]  ;;  %v1734_v26 = vld [vmem:[#allocation3 + $0x11] sm:$0xff]  ;;  %v7626_v1 = vpack.i.bf16 %v1764_v23, %v1763_v21 }
 0x1fd   : >> { %7562 = vrot.lane.b32.xlu1 %v7561_v42, %s8090_s25  ;;  %6604 = vmatprep.subr.bf16.mxu0 %v7841_v58  ;;  %v1698_v33 = vld [vmem:[#allocation3 + $0x10] sm:$0xff]  ;;  %v7641_v35 = vpack.i.bf16 %v1734_v26, %v1733_v25  ;;  %v1731_v37 = vld [vmem:[#allocation3 + $0x228] sm:$0xff] }
 0x1fe   : >> { %7557 = vrot.lane.b32.xlu0 %v7556_v43, %s8090_s25  ;;  %v7636_v28 = vpack.i.bf16 %v1698_v33, %v1697_v27  ;;  %v1767_v30 = vld [vmem:[#allocation3 + $0x229] sm:$0xff]  ;;  %v1768_v29 = vld [vmem:[#allocation3 + $0x231] sm:$0xff] }
 0x1ff   : >> { %v1732_v32 = vld [vmem:[#allocation3 + $0x230] sm:$0xff]  ;;  %v7651_v38 = vpack.i.bf16 %v1768_v29, %v1767_v30  ;;  %v1663_v42 = vld [vmem:[#allocation3 + $0x27] sm:$0xff]  ;;  %v7845_v30 = vld [vmem:[%s8810_s7 + $0x18] sm:$0xff]  }
 0x200   : >> { %6605 = vmatpush3.bf16.msra.mxu0 %v7841_v58  ;;  %v7646_v57 = vpack.i.bf16 %v1732_v32, %v1731_v37  ;;  %v1664_v34 = vld [vmem:[#allocation3 + $0x2f] sm:$0xff]  ;;  %v1665_v52 = vld [vmem:[#allocation3 + $0x47] sm:$0xff] }
 0x201   : >> { %7572 = vrot.lane.b32.xlu1 %v7571_v49, %s8089_s24  ;;  %6638 = vmatprep.subr.bf16.mxu0 %v8829_v2  ;;  %v1666_v0 = vld [vmem:[#allocation3 + $0x4f] sm:$0xff]  ;;  %v1669_v7 = vld [vmem:[#allocation3 + $0x87] sm:$0xff] }
 0x202   : >> { %7567 = vrot.lane.b32.xlu0 %v7566_v51, %s8089_s24  ;;  %v1670_v48 = vld [vmem:[#allocation3 + $0x8f] sm:$0xff]  ;;  %v1667_v10 = vld [vmem:[#allocation3 + $0x67] sm:$0xff] }
 0x203   : >> { %v1668_v36 = vld [vmem:[#allocation3 + $0x6f] sm:$0xff]  ;;  %v1673_v29 = vld [vmem:[#allocation3 + $0xc7] sm:$0xff] }
 0x204   : >> { %v1674_v37 = vld [vmem:[#allocation3 + $0xcf] sm:$0xff] }
 0x205   : >> { %7582 = vrot.lane.b32.xlu1 %v7581_v56, %s8090_s25 }
 0x206   : >> { %7577 = vrot.lane.b32.xlu0 %v7576_v59, %s8090_s25 }
 0x209   : >> { %7592 = vrot.lane.b32.xlu1 %v7591_v5, %s8089_s24 }
 0x20a   : >> { %7587 = vrot.lane.b32.xlu0 %v7586_v19, %s8089_s24  ;;  %v7843_v19 = vld [vmem:[%s8810_s7 + $0x8] sm:$0xff]  }
 0x20d   : >> { %7602 = vrot.lane.b32.xlu1 %v7601_v8, %s8090_s25 }
 0x20e   : >> { %7597 = vrot.lane.b32.xlu0 %v7596_v9, %s8090_s25 }
 0x211   : >> { %7612 = vrot.lane.b32.xlu1 %v7611_v13, %s8089_s24 }
 0x212   : >> { %7607 = vrot.lane.b32.xlu0 %v7606_v15, %s8089_s24 }
 0x215   : >> { %7622 = vrot.lane.b32.xlu1 %v7621_v18, %s8090_s25  ;;  %v7844_v18 = vld [vmem:[%s8810_s7 + $0x10] sm:$0xff]  }
 0x216   : >> { %7617 = vrot.lane.b32.xlu0 %v7616_v20, %s8090_s25 }
 0x219   : >> { %7632 = vrot.lane.b32.xlu1 %v7631_v24, %s8089_s24 }
 0x21a   : >> { %7627 = vrot.lane.b32.xlu0 %v7626_v1, %s8089_s24 }
 0x21d   : >> { %7642 = vrot.lane.b32.xlu1 %v7641_v35, %s8089_s24 }
 0x21e   : >> { %7637 = vrot.lane.b32.xlu0 %v7636_v28, %s8090_s25 }
 0x221   : >> { %7652 = vrot.lane.b32.xlu1 %v7651_v38, %s8089_s24 }
 0x222   : >> { %7647 = vrot.lane.b32.xlu0 %v7646_v57, %s8090_s25  ;;  %v1671_v57 = vld [vmem:[#allocation3 + $0xa7] sm:$0xff] }
 0x24f   : >> { %v7488_v39 = vpop.permute.xlu1 %7487 }
 0x250   : >> { %v7490_v54 = vunpack.i.h.bf16 %v7488_v39  ;;  %v7489_v40 = vunpack.i.l.bf16 %v7488_v39  ;;  %v7478_v41 = vpop.permute.xlu0 %7477  ;;  %v1672_v39 = vld [vmem:[#allocation3 + $0xaf] sm:$0xff] }
 0x251   : >> { %v7480_v43 = vunpack.i.h.bf16 %v7478_v41  ;;  %v7479_v44 = vunpack.i.l.bf16 %v7478_v41 }
 0x253   : >> { %v2059_v45 = vsel %vm295_vm4, %v1663_v42, %v7479_v44  ;;  %v2060_v63 = vsel %vm295_vm4, %v1664_v34, %v7480_v43  ;;  %v7493_v47 = vpop.permute.xlu1 %7492 }
 0x254   : >> { %v7495_v49 = vunpack.i.h.bf16 %v7493_v47  ;;  %v7494_v50 = vunpack.i.l.bf16 %v7493_v47  ;;  %v7483_v51 = vpop.permute.xlu0 %7482  ;;  %v2096_v53 = vsel %vm2093_vm5, %v2059_v45, %v7489_v40  ;;  %v2097_v55 = vsel %vm2093_vm5, %v2060_v63, %v7490_v54  ;;  %v7846_v63 = vld [vmem:[%s8810_s7 + $0x20] sm:$0xff]  }
 0x255   : >> { %v7485_v56 = vunpack.i.h.bf16 %v7483_v51  ;;  %v7484_v58 = vunpack.i.l.bf16 %v7483_v51  ;;  %v8852_v59 = vpack.c.bf16 %v2097_v55, %v2096_v53 }
 0x257   : >> { %v2061_v60 = vsel %vm295_vm4, %v1665_v52, %v7484_v58  ;;  %v2062_v22 = vsel %vm295_vm4, %v1666_v0, %v7485_v56  ;;  %6606 = vmatprep.mubr.msk.bf16.mxu0 %vm2214_vm6, %v8852_v59  ;;  %v7503_v61 = vpop.permute.xlu1 %7502 }
 0x258   : >> { %v2098_v62 = vsel %vm2093_vm5, %v2061_v60, %v7494_v50  ;;  %v2099_v3 = vsel %vm2093_vm5, %v2062_v22, %v7495_v49  ;;  %v7498_v4 = vpop.permute.xlu0 %7497  ;;  %v7505_v31 = vunpack.i.h.bf16 %v7503_v61  ;;  %v7504_v6 = vunpack.i.l.bf16 %v7503_v61  ;;  %v7847_v61 = vld [vmem:[%s8810_s7 + $0x28] sm:$0xff]  }
 0x259   : >> { %v8860_v5 = vpack.c.bf16 %v2099_v3, %v2098_v62  ;;  %v7500_v8 = vunpack.i.h.bf16 %v7498_v4  ;;  %v7499_v9 = vunpack.i.l.bf16 %v7498_v4  ;;  %v1677_v62 = vld [vmem:[#allocation3 + $0x107] sm:$0xff]  ;;  %v1678_v3 = vld [vmem:[#allocation3 + $0x10f] sm:$0xff] }
 0x25a   : >> { %v2065_v14 = vsel %vm295_vm4, %v1669_v7, %v7504_v6  ;;  %v2066_v15 = vsel %vm295_vm4, %v1670_v48, %v7505_v31  ;;  %v1675_v6 = vld [vmem:[#allocation3 + $0xe7] sm:$0xff] }
 0x25b   : >> { %6607 = vmatmul.mubr.msk.bf16.vlgmr.msra.gmra.mrb[0].mxu0 %vm2214_vm6, %v8860_v5  ;;  %v7513_v46 = vpop.permute.xlu1 %7512  ;;  %v2063_v20 = vsel %vm295_vm4, %v1667_v10, %v7499_v9  ;;  %v2064_v21 = vsel %vm295_vm4, %v1668_v36, %v7500_v8 }
 0x25c   : >> { %6639 = vmatpush3.bf16.msra.mxu0 %v8829_v2  ;;  %v7515_v12 = vunpack.i.h.bf16 %v7513_v46  ;;  %v7514_v13 = vunpack.i.l.bf16 %v7513_v46  ;;  %v7508_v11 = vpop.permute.xlu0 %7507 }
 0x25d   : >> { %v7510_v16 = vunpack.i.h.bf16 %v7508_v11  ;;  %v7509_v17 = vunpack.i.l.bf16 %v7508_v11  ;;  %6640 = vmatprep.subr.bf16.mxu0 %v7843_v19 }
 0x25e   : >> { %v2102_v23 = vsel %vm2093_vm5, %v2065_v14, %v7514_v13  ;;  %v2103_v2 = vsel %vm2093_vm5, %v2066_v15, %v7515_v12  ;;  %v8905_v13 = vld [vmem:[%s8810_s7 + $0x60] sm:$0xff]  }
 0x25f   : >> { %v8873_v24 = vpack.c.bf16 %v2103_v2, %v2102_v23  ;;  %v2100_v25 = vsel %vm2093_vm5, %v2063_v20, %v7509_v17  ;;  %v2101_v26 = vsel %vm2093_vm5, %v2064_v21, %v7510_v16  ;;  %v7523_v1 = vpop.permute.xlu1 %7522 }
 0x260   : >> { %v8877_v27 = vpack.c.bf16 %v2101_v26, %v2100_v25  ;;  %v7518_v33 = vpop.permute.xlu0 %7517  ;;  %6641 = vmatpush3.bf16.msra.mxu0 %v7843_v19  ;;  %v7525_v35 = vunpack.i.h.bf16 %v7523_v1  ;;  %v7524_v28 = vunpack.i.l.bf16 %v7523_v1  ;;  %v1676_v19 = vld [vmem:[#allocation3 + $0xef] sm:$0xff]  ;;  %v1681_v1 = vld [vmem:[#allocation3 + $0x147] sm:$0xff] }
 0x261   : >> { %6642 = vmatprep.subr.bf16.mxu0 %v7844_v18  ;;  %v7520_v32 = vunpack.i.h.bf16 %v7518_v33  ;;  %v7519_v38 = vunpack.i.l.bf16 %v7518_v33  ;;  %v1682_v33 = vld [vmem:[#allocation3 + $0x14f] sm:$0xff] }
 0x262   : >> { %6610 = vmatprep.mubr.msk.bf16.mxu0 %vm2214_vm6, %v8877_v27  ;;  %v2069_v34 = vsel %vm295_vm4, %v1673_v29, %v7524_v28  ;;  %v2070_v43 = vsel %vm295_vm4, %v1674_v37, %v7525_v35  ;;  %v1680_v29 = vld [vmem:[#allocation3 + $0x12f] sm:$0xff] }
 0x263   : >> { %6611 = vmatmul.mubr.msk.bf16.gmra.mrb[4].mxu0 %vm2214_vm6, %v8873_v24  ;;  %v7533_v54 = vpop.permute.xlu1 %7532  ;;  %v2067_v47 = vsel %vm295_vm4, %v1671_v57, %v7519_v38  ;;  %v2068_v49 = vsel %vm295_vm4, %v1672_v39, %v7520_v32 }
 0x264   : >> { %v7535_v40 = vunpack.i.h.bf16 %v7533_v54  ;;  %v7534_v41 = vunpack.i.l.bf16 %v7533_v54  ;;  %v7528_v42 = vpop.permute.xlu0 %7527  ;;  %6643 = vmatpush3.bf16.msra.mxu0 %v7844_v18 }
 0x265   : >> { %v7530_v44 = vunpack.i.h.bf16 %v7528_v42  ;;  %v7529_v45 = vunpack.i.l.bf16 %v7528_v42  ;;  %6644 = vmatprep.subr.bf16.mxu0 %v7845_v30 }
 0x266   : >> { %v2106_v50 = vsel %vm2093_vm5, %v2069_v34, %v7534_v41  ;;  %v2107_v51 = vsel %vm2093_vm5, %v2070_v43, %v7535_v40 }
 0x267   : >> { %v8891_v52 = vpack.c.bf16 %v2107_v51, %v2106_v50  ;;  %v2104_v0 = vsel %vm2093_vm5, %v2067_v47, %v7529_v45  ;;  %v2105_v53 = vsel %vm2093_vm5, %v2068_v49, %v7530_v44  ;;  %v7543_v55 = vpop.permute.xlu1 %7542 }
 0x268   : >> { %v8895_v56 = vpack.c.bf16 %v2105_v53, %v2104_v0  ;;  %v7538_v58 = vpop.permute.xlu0 %7537  ;;  %6645 = vmatpush3.bf16.msra.mxu0 %v7845_v30  ;;  %v7545_v60 = vunpack.i.h.bf16 %v7543_v55  ;;  %v7544_v22 = vunpack.i.l.bf16 %v7543_v55  ;;  %v1679_v30 = vld [vmem:[#allocation3 + $0x127] sm:$0xff] }
 0x269   : >> { %6646 = vmatprep.subr.bf16.mxu0 %v7846_v63  ;;  %v7540_v4 = vunpack.i.h.bf16 %v7538_v58  ;;  %v7539_v31 = vunpack.i.l.bf16 %v7538_v58  ;;  %v1685_v55 = vld [vmem:[#allocation3 + $0x187] sm:$0xff]  ;;  %v1686_v58 = vld [vmem:[#allocation3 + $0x18f] sm:$0xff] }
 0x26a   : >> { %6614 = vmatprep.mubr.msk.bf16.mxu0 %vm2214_vm6, %v8895_v56  ;;  %v2073_v10 = vsel %vm295_vm4, %v1677_v62, %v7544_v22  ;;  %v2074_v36 = vsel %vm295_vm4, %v1678_v3, %v7545_v60  ;;  %v1684_v62 = vld [vmem:[#allocation3 + $0x16f] sm:$0xff] }
 0x26b   : >> { %6615 = vmatmul.mubr.msk.bf16.gmra.mrb[8].mxu0 %vm2214_vm6, %v8891_v52  ;;  %v7553_v7 = vpop.permute.xlu1 %7552  ;;  %v2071_v11 = vsel %vm295_vm4, %v1675_v6, %v7539_v31  ;;  %v2072_v14 = vsel %vm295_vm4, %v1676_v19, %v7540_v4 }
 0x26c   : >> { %v7555_v48 = vunpack.i.h.bf16 %v7553_v7  ;;  %v7554_v8 = vunpack.i.l.bf16 %v7553_v7  ;;  %v7548_v9 = vpop.permute.xlu0 %7547  ;;  %6647 = vmatpush3.bf16.msra.mxu0 %v7846_v63 }
 0x26d   : >> { %v7550_v46 = vunpack.i.h.bf16 %v7548_v9  ;;  %v7549_v12 = vunpack.i.l.bf16 %v7548_v9  ;;  %6648 = vmatprep.subr.bf16.mxu0 %v7847_v61 }
 0x26e   : >> { %v2110_v15 = vsel %vm2093_vm5, %v2073_v10, %v7554_v8  ;;  %v2111_v16 = vsel %vm2093_vm5, %v2074_v36, %v7555_v48 }
 0x26f   : >> { %v8911_v17 = vpack.c.bf16 %v2111_v16, %v2110_v15  ;;  %v2108_v18 = vsel %vm2093_vm5, %v2071_v11, %v7549_v12  ;;  %v2109_v20 = vsel %vm2093_vm5, %v2072_v14, %v7550_v46  ;;  %v7563_v21 = vpop.permute.xlu1 %7562 }
 0x270   : >> { %v8915_v23 = vpack.c.bf16 %v2109_v20, %v2108_v18  ;;  %v7558_v2 = vpop.permute.xlu0 %7557  ;;  %6649 = vmatpush3.bf16.msra.mxu0 %v7847_v61  ;;  %v7565_v25 = vunpack.i.h.bf16 %v7563_v21  ;;  %v7564_v26 = vunpack.i.l.bf16 %v7563_v21  ;;  %v1683_v61 = vld [vmem:[#allocation3 + $0x167] sm:$0xff] }
 0x271   : >> { %6682 = vmatprep.subr.bf16.mxu0 %v8905_v13  ;;  %v7560_v35 = vunpack.i.h.bf16 %v7558_v2  ;;  %v7559_v28 = vunpack.i.l.bf16 %v7558_v2  ;;  %v1689_v2 = vld [vmem:[#allocation3 + $0x1c7] sm:$0xff] }
 0x272   : >> { %6618 = vmatprep.mubr.msk.bf16.mxu0 %vm2214_vm6, %v8915_v23  ;;  %v2077_v39 = vsel %vm295_vm4, %v1681_v1, %v7564_v26  ;;  %v2078_v54 = vsel %vm295_vm4, %v1682_v33, %v7565_v25  ;;  %v1690_v25 = vld [vmem:[#allocation3 + $0x1cf] sm:$0xff]  ;;  %v1687_v33 = vld [vmem:[#allocation3 + $0x1a7] sm:$0xff] }
 0x273   : >> { %6619 = vmatmul.mubr.msk.bf16.gmra.mrb[12].mxu0 %vm2214_vm6, %v8911_v17  ;;  %v7573_v37 = vpop.permute.xlu1 %7572  ;;  %v2075_v42 = vsel %vm295_vm4, %v1679_v30, %v7559_v28  ;;  %v2076_v34 = vsel %vm295_vm4, %v1680_v29, %v7560_v35  ;;  %v1688_v35 = vld [vmem:[#allocation3 + $0x1af] sm:$0xff] }
 0x274   : >> { %v7575_v32 = vunpack.i.h.bf16 %v7573_v37  ;;  %v7574_v38 = vunpack.i.l.bf16 %v7573_v37  ;;  %v7568_v57 = vpop.permute.xlu0 %7567 }
 0x275   : >> { %v7570_v40 = vunpack.i.h.bf16 %v7568_v57  ;;  %v7569_v41 = vunpack.i.l.bf16 %v7568_v57 }
 0x276   : >> { %v2114_v43 = vsel %vm2093_vm5, %v2077_v39, %v7574_v38  ;;  %v2115_v44 = vsel %vm2093_vm5, %v2078_v54, %v7575_v32 }
 0x277   : >> { %v8928_v45 = vpack.c.bf16 %v2115_v44, %v2114_v43  ;;  %v2112_v63 = vsel %vm2093_vm5, %v2075_v42, %v7569_v41  ;;  %v2113_v47 = vsel %vm2093_vm5, %v2076_v34, %v7570_v40  ;;  %v7583_v49 = vpop.permute.xlu1 %7582 }
 0x278   : >> { %v8932_v50 = vpack.c.bf16 %v2113_v47, %v2112_v63  ;;  %v7578_v51 = vpop.permute.xlu0 %7577  ;;  %v7585_v0 = vunpack.i.h.bf16 %v7583_v49  ;;  %v7584_v53 = vunpack.i.l.bf16 %v7583_v49 }
 0x279   : >> { %v7580_v60 = vunpack.i.h.bf16 %v7578_v51  ;;  %v7579_v22 = vunpack.i.l.bf16 %v7578_v51 }
 0x27a   : >> { %6622 = vmatprep.mubr.msk.bf16.mxu0 %vm2214_vm6, %v8932_v50  ;;  %v2081_v19 = vsel %vm295_vm4, %v1685_v55, %v7584_v53  ;;  %v2082_v7 = vsel %vm295_vm4, %v1686_v58, %v7585_v0  ;;  %v1693_v53 = vld [vmem:[#allocation3 + $0x207] sm:$0xff]  ;;  %v1694_v55 = vld [vmem:[#allocation3 + $0x20f] sm:$0xff] }
 0x27b   : >> { %6623 = vmatmul.mubr.msk.bf16.gmra.mrb[16].mxu0 %vm2214_vm6, %v8928_v45  ;;  %v7593_v3 = vpop.permute.xlu1 %7592  ;;  %v2079_v9 = vsel %vm295_vm4, %v1683_v61, %v7579_v22  ;;  %v2080_v10 = vsel %vm295_vm4, %v1684_v62, %v7580_v60  ;;  %v1691_v22 = vld [vmem:[#allocation3 + $0x1e7] sm:$0xff]  ;;  %v1692_v61 = vld [vmem:[#allocation3 + $0x1ef] sm:$0xff] }
 0x27c   : >> { %v7595_v4 = vunpack.i.h.bf16 %v7593_v3  ;;  %v7594_v31 = vunpack.i.l.bf16 %v7593_v3  ;;  %v7588_v6 = vpop.permute.xlu0 %7587 }
 0x27d   : >> { %v7590_v48 = vunpack.i.h.bf16 %v7588_v6  ;;  %v7589_v8 = vunpack.i.l.bf16 %v7588_v6 }
 0x27e   : >> { %v2118_v36 = vsel %vm2093_vm5, %v2081_v19, %v7594_v31  ;;  %v2119_v46 = vsel %vm2093_vm5, %v2082_v7, %v7595_v4 }
 0x27f   : >> { %v8944_v12 = vpack.c.bf16 %v2119_v46, %v2118_v36  ;;  %v2116_v11 = vsel %vm2093_vm5, %v2079_v9, %v7589_v8  ;;  %v2117_v14 = vsel %vm2093_vm5, %v2080_v10, %v7590_v48  ;;  %v7603_v15 = vpop.permute.xlu1 %7602 }
 0x280   : >> { %v8948_v16 = vpack.c.bf16 %v2117_v14, %v2116_v11  ;;  %v7598_v18 = vpop.permute.xlu0 %7597  ;;  %v7605_v20 = vunpack.i.h.bf16 %v7603_v15  ;;  %v7604_v21 = vunpack.i.l.bf16 %v7603_v15 }
 0x281   : >> { %v7600_v26 = vunpack.i.h.bf16 %v7598_v18  ;;  %v7599_v1 = vunpack.i.l.bf16 %v7598_v18 }
 0x282   : >> { %6626 = vmatprep.mubr.msk.bf16.mxu0 %vm2214_vm6, %v8948_v16  ;;  %v2085_v32 = vsel %vm295_vm4, %v1689_v2, %v7604_v21  ;;  %v2086_v38 = vsel %vm295_vm4, %v1690_v25, %v7605_v20  ;;  %v1661_v21 = vld [vmem:[#allocation3 + $0x7] sm:$0xff]  ;;  %v1662_v2 = vld [vmem:[#allocation3 + $0xf] sm:$0xff] }
 0x283   : >> { %6627 = vmatmul.mubr.msk.bf16.gmra.mrb[20].mxu0 %vm2214_vm6, %v8944_v12  ;;  %v7613_v28 = vpop.permute.xlu1 %7612  ;;  %v2083_v54 = vsel %vm295_vm4, %v1687_v33, %v7599_v1  ;;  %v2084_v40 = vsel %vm295_vm4, %v1688_v35, %v7600_v26 }
 0x284   : >> { %v7615_v30 = vunpack.i.h.bf16 %v7613_v28  ;;  %v7614_v29 = vunpack.i.l.bf16 %v7613_v28  ;;  %v7608_v37 = vpop.permute.xlu0 %7607 }
 0x285   : >> { %v7610_v57 = vunpack.i.h.bf16 %v7608_v37  ;;  %v7609_v39 = vunpack.i.l.bf16 %v7608_v37 }
 0x286   : >> { %v2122_v41 = vsel %vm2093_vm5, %v2085_v32, %v7614_v29  ;;  %v2123_v42 = vsel %vm2093_vm5, %v2086_v38, %v7615_v30  ;;  %v7849_v32 = vld [vmem:[%s8810_s7 + $0x68] sm:$0xff]   ;;  %v7850_v38 = vld [vmem:[%s8810_s7 + $0x70] sm:$0xff]  }
 0x287   : >> { %v8960_v34 = vpack.c.bf16 %v2123_v42, %v2122_v41  ;;  %v2120_v43 = vsel %vm2093_vm5, %v2083_v54, %v7609_v39  ;;  %v2121_v44 = vsel %vm2093_vm5, %v2084_v40, %v7610_v57  ;;  %v7623_v63 = vpop.permute.xlu1 %7622  ;;  %v7851_v57 = vld [vmem:[%s8810_s7 + $0x78] sm:$0xff]   ;;  %v7852_v39 = vld [vmem:[%s8810_s7 + $0x80] sm:$0xff]   ;;  %v7855_v41 = vld [vmem:[%s8810_s7 + $0xc8] sm:$0xff]  }
 0x288   : >> { %v8964_v47 = vpack.c.bf16 %v2121_v44, %v2120_v43  ;;  %v7618_v49 = vpop.permute.xlu0 %7617  ;;  %v7625_v51 = vunpack.i.h.bf16 %v7623_v63  ;;  %v7624_v0 = vunpack.i.l.bf16 %v7623_v63  ;;  %v7854_v40 = vld [vmem:[%s8810_s7 + $0xc0] sm:$0xff]   ;;  %v7856_v42 = vld [vmem:[%s8810_s7 + $0xd0] sm:$0xff]  }
 0x289   : >> { %v7620_v58 = vunpack.i.h.bf16 %v7618_v49  ;;  %v7619_v60 = vunpack.i.l.bf16 %v7618_v49  ;;  %6726 = vmatprep.subr.bf16.mxu1 %v7854_v40  ;;  %v9073_v43 = vld [vmem:[%s9070_s11] ss:$0 sm:$0xff] }
 0x28a   : >> { %6630 = vmatprep.mubr.msk.bf16.mxu0 %vm2214_vm6, %v8964_v47  ;;  %v2089_v6 = vsel %vm295_vm4, %v1693_v53, %v7624_v0  ;;  %v2090_v19 = vsel %vm295_vm4, %v1694_v55, %v7625_v51  ;;  %6727 = vmatpush3.bf16.msra.mxu1 %v7854_v40 }
 0x28b   : >> { %6631 = vmatmul.mubr.msk.bf16.gmra.mrb[24].mxu0 %vm2214_vm6, %v8960_v34  ;;  %v7633_v62 = vpop.permute.xlu1 %7632  ;;  %v2087_v8 = vsel %vm295_vm4, %v1691_v22, %v7619_v60  ;;  %v2088_v9 = vsel %vm295_vm4, %v1692_v61, %v7620_v58  ;;  %6728 = vmatprep.subr.bf16.mxu1 %v7855_v41 }
 0x28c   : >> { %v7635_v3 = vunpack.i.h.bf16 %v7633_v62  ;;  %v7634_v4 = vunpack.i.l.bf16 %v7633_v62  ;;  %v7628_v31 = vpop.permute.xlu0 %7627  ;;  %v7858_v62 = vld [vmem:[%s8810_s7 + $0xe0] sm:$0xff]  }
 0x28d   : >> { %v7630_v7 = vunpack.i.h.bf16 %v7628_v31  ;;  %v7629_v48 = vunpack.i.l.bf16 %v7628_v31 }
 0x28e   : >> { %v2126_v10 = vsel %vm2093_vm5, %v2089_v6, %v7634_v4  ;;  %v2127_v36 = vsel %vm2093_vm5, %v2090_v19, %v7635_v3  ;;  %6729 = vmatpush3.bf16.msra.mxu1 %v7855_v41 }
 0x28f   : >> { %v8976_v46 = vpack.c.bf16 %v2127_v36, %v2126_v10  ;;  %v2124_v11 = vsel %vm2093_vm5, %v2087_v8, %v7629_v48  ;;  %v2125_v14 = vsel %vm2093_vm5, %v2088_v9, %v7630_v7  ;;  %v7643_v15 = vpop.permute.xlu1 %7642  ;;  %6730 = vmatprep.subr.bf16.mxu1 %v7856_v42  ;;  %v7859_v9 = vld [vmem:[%s8810_s7 + $0xe8] sm:$0xff]  }
 0x290   : >> { %v8980_v18 = vpack.c.bf16 %v2125_v14, %v2124_v11  ;;  %v7638_v20 = vpop.permute.xlu0 %7637  ;;  %v7645_v25 = vunpack.i.h.bf16 %v7643_v15  ;;  %v7644_v26 = vunpack.i.l.bf16 %v7643_v15 }
 0x291   : >> { %v7640_v1 = vunpack.i.h.bf16 %v7638_v20  ;;  %v7639_v33 = vunpack.i.l.bf16 %v7638_v20 }
 0x292   : >> { %6634 = vmatprep.mubr.msk.bf16.mxu0 %vm2214_vm6, %v8980_v18  ;;  %6731 = vmatpush3.bf16.msra.mxu1 %v7856_v42 }
 0x293   : >> { %v2057_v35 = vsel %vm295_vm4, %v1661_v21, %v7639_v33  ;;  %v2058_v28 = vsel %vm295_vm4, %v1662_v2, %v7640_v1  ;;  %6635 = vmatmul.mubr.msk.bf16.gmra.mrb[28].mxu0 %vm2214_vm6, %v8976_v46  ;;  %v9094_v33 = vld [vmem:[%s8810_s7 + $0x90] sm:$0xff]  }
 0x294   : >> { %v2094_v30 = vsel %vm2093_vm5, %v2057_v35, %v7644_v26  ;;  %v2095_v29 = vsel %vm2093_vm5, %v2058_v28, %v7645_v25 }
 0x295   : >> { %v2130_v37 = vpack.c.bf16 %v2095_v29, %v2094_v30 }
 0x297   : >> { %6650 = vmatprep.mubr.msk.bf16.mxu0 %vm2214_vm6, %v2130_v37 }
 0x29b   : >> { %6651 = vmatmul.mubr.msk.bf16.vlgmr.msra.gmra.mrb[0].mxu0 %vm2214_vm6, %v8852_v59  ;;  %v7853_v59 = vld [vmem:[%s8810_s7 + $0x88] sm:$0xff]  }
 0x29c   : >> { %6683 = vmatpush3.bf16.msra.mxu0 %v8905_v13  ;;  %6654 = vmatprep.mubr.msk.bf16.mxu0 %vm2214_vm6, %v8860_v5  ;;  %v1696_v13 = vld [vmem:[#allocation3 + $0x22f] sm:$0xff] }
 0x29d   : >> { %6684 = vmatprep.subr.bf16.mxu0 %v7849_v32 }
 0x2a0   : >> { %6685 = vmatpush3.bf16.msra.mxu0 %v7849_v32 }
 0x2a1   : >> { %6686 = vmatprep.subr.bf16.mxu0 %v7850_v38 }
 0x2a3   : >> { %6655 = vmatmul.mubr.msk.bf16.gmra.mrb[4].mxu0 %vm2214_vm6, %v8877_v27 }
 0x2a4   : >> { %6658 = vmatprep.mubr.msk.bf16.mxu0 %vm2214_vm6, %v8873_v24  ;;  %6687 = vmatpush3.bf16.msra.mxu0 %v7850_v38 }
 0x2a5   : >> { %6688 = vmatprep.subr.bf16.mxu0 %v7851_v57 }
 0x2a8   : >> { %6689 = vmatpush3.bf16.msra.mxu0 %v7851_v57 }
 0x2a9   : >> { %6690 = vmatprep.subr.bf16.mxu0 %v7852_v39 }
 0x2ab   : >> { %6659 = vmatmul.mubr.msk.bf16.gmra.mrb[8].mxu0 %vm2214_vm6, %v8895_v56 }
 0x2ac   : >> { %6662 = vmatprep.mubr.msk.bf16.mxu0 %vm2214_vm6, %v8891_v52  ;;  %6691 = vmatpush3.bf16.msra.mxu0 %v7852_v39 }
 0x2ad   : >> { %6692 = vmatprep.subr.bf16.mxu0 %v7853_v59 }
 0x2b0   : >> { %6693 = vmatpush3.bf16.msra.mxu0 %v7853_v59 }
 0x2b3   : >> { %6663 = vmatmul.mubr.msk.bf16.gmra.mrb[12].mxu0 %vm2214_vm6, %v8915_v23 }
 0x2b4   : >> { %6666 = vmatprep.mubr.msk.bf16.mxu0 %vm2214_vm6, %v8911_v17 }
 0x2bb   : >> { %6667 = vmatmul.mubr.msk.bf16.gmra.mrb[16].mxu0 %vm2214_vm6, %v8932_v50 }
 0x2bc   : >> { %6670 = vmatprep.mubr.msk.bf16.mxu0 %vm2214_vm6, %v8928_v45 }
 0x2c3   : >> { %6671 = vmatmul.mubr.msk.bf16.gmra.mrb[20].mxu0 %vm2214_vm6, %v8948_v16 }
 0x2c4   : >> { %6674 = vmatprep.mubr.msk.bf16.mxu0 %vm2214_vm6, %v8944_v12 }
 0x2cb   : >> { %6675 = vmatmul.mubr.msk.bf16.gmra.mrb[24].mxu0 %vm2214_vm6, %v8964_v47 }
 0x2cc   : >> { %6678 = vmatprep.mubr.msk.bf16.mxu0 %vm2214_vm6, %v8960_v34 }
 0x2d3   : >> { %6679 = vmatmul.mubr.msk.bf16.gmra.mrb[28].mxu0 %vm2214_vm6, %v8980_v18 }
 0x2d4   : >> { %6694 = vmatprep.mubr.msk.bf16.mxu0 %vm2214_vm6, %v8860_v5  ;;  %v7648_v5 = vpop.permute.xlu0 %7647 }
 0x2db   : >> { %6695 = vmatmul.mubr.msk.bf16.vlgmr.msra.gmra.mrb[0].mxu0 %vm2214_vm6, %v8877_v27  ;;  %v7649_v27 = vunpack.i.l.bf16 %v7648_v5 }
 0x2dc   : >> { %6698 = vmatprep.mubr.msk.bf16.mxu0 %vm2214_vm6, %v8873_v24  ;;  %v7650_v24 = vunpack.i.h.bf16 %v7648_v5 }
 0x2e3   : >> { %6699 = vmatmul.mubr.msk.bf16.gmra.mrb[4].mxu0 %vm2214_vm6, %v8895_v56  ;;  %v1695_v56 = vld [vmem:[#allocation3 + $0x227] sm:$0xff] }
 0x2e4   : >> { %6702 = vmatprep.mubr.msk.bf16.mxu0 %vm2214_vm6, %v8891_v52  ;;  %v7653_v52 = vpop.permute.xlu1 %7652 }
 0x2eb   : >> { %6703 = vmatmul.mubr.msk.bf16.gmra.mrb[8].mxu0 %vm2214_vm6, %v8915_v23  ;;  %v7654_v23 = vunpack.i.l.bf16 %v7653_v52 }
 0x2ec   : >> { %6706 = vmatprep.mubr.msk.bf16.mxu0 %vm2214_vm6, %v8911_v17  ;;  %v7655_v17 = vunpack.i.h.bf16 %v7653_v52 }
 0x2f3   : >> { %6707 = vmatmul.mubr.msk.bf16.gmra.mrb[12].mxu0 %vm2214_vm6, %v8932_v50  ;;  %v2092_v50 = vsel %vm295_vm4, %v1696_v13, %v7650_v24 }
 0x2f4   : >> { %6710 = vmatprep.mubr.msk.bf16.mxu0 %vm2214_vm6, %v8928_v45  ;;  %v2091_v45 = vsel %vm295_vm4, %v1695_v56, %v7649_v27 }
 0x2fb   : >> { %6711 = vmatmul.mubr.msk.bf16.gmra.mrb[16].mxu0 %vm2214_vm6, %v8948_v16  ;;  %v2129_v16 = vsel %vm2093_vm5, %v2092_v50, %v7655_v17 }
 0x2fc   : >> { %6714 = vmatprep.mubr.msk.bf16.mxu0 %vm2214_vm6, %v8944_v12  ;;  %v2128_v12 = vsel %vm2093_vm5, %v2091_v45, %v7654_v23 }
 0x2fd   : >> { %v2147_v54 = vpack.c.bf16 %v2129_v16, %v2128_v12 }
 0x303   : >> { %6715 = vmatmul.mubr.msk.bf16.gmra.mrb[20].mxu0 %vm2214_vm6, %v8964_v47 }
 0x304   : >> { %6718 = vmatprep.mubr.msk.bf16.mxu0 %vm2214_vm6, %v8960_v34  ;;  %v7857_v34 = vld [vmem:[%s8810_s7 + $0xd8] sm:$0xff]  }
 0x305   : >> { %6732 = vmatprep.subr.bf16.mxu1 %v7857_v34 }
 0x306   : >> { %6733 = vmatpush3.bf16.msra.mxu1 %v7857_v34 }
 0x307   : >> { %6734 = vmatprep.subr.bf16.mxu1 %v7858_v62 }
 0x30a   : >> { %6735 = vmatpush3.bf16.msra.mxu1 %v7858_v62 }
 0x30b   : >> { %6719 = vmatmul.mubr.msk.bf16.gmra.mrb[24].mxu0 %vm2214_vm6, %v8980_v18  ;;  %6736 = vmatprep.subr.bf16.mxu1 %v7859_v9 }
 0x30c   : >> { %6722 = vmatprep.mubr.msk.bf16.mxu0 %vm2214_vm6, %v8976_v46 }
 0x30e   : >> { %6737 = vmatpush3.bf16.msra.mxu1 %v7859_v9 }
 0x30f   : >> { %6770 = vmatprep.subr.bf16.mxu1 %v9094_v33 }
 0x313   : >> { %6723 = vmatmul.mubr.msk.bf16.gmra.mrb[28].mxu0 %vm2214_vm6, %v2147_v54 }
 0x3ae   : >> { %v6696_v44 = vpop.f32.mrb[0].mxu0 }
 0x3af   : >> { %v2879_v63 = vadd.f32 %v6696_v44, %v9073_v43  ;;  %v2712_v47 = vpop.f32.mrb[1].mxu0 }
 0x3b0   : >> { %v2877_v49 = vadd.f32 %v9073_v43, %v2712_v47  ;;  %v6697_v51 = vpop.f32.mrb[2].mxu0 }
 0x3b1   : >> { %v2911_v0 = vmax.f32 %v2879_v63, 0.0  ;;  %v2880_v53 = vadd.f32 %v6697_v51, %v9073_v43  ;;  %v2715_v55 = vpop.f32.mrb[3].mxu0 }
 0x3b2   : >> { %v2909_v58 = vmax.f32 %v2877_v49, 0.0  ;;  %v2878_v60 = vadd.f32 %v9073_v43, %v2715_v55 }
 0x3b3   : >> { %2944 = vst.msk [vmem:[#allocation4 + $0x48] sm:$0xff] %vm295_vm4, %v2911_v0  ;;  %v2912_v22 = vmax.f32 %v2880_v53, 0.0 }
 0x3b4   : >> { %2942 = vst.msk [vmem:[#allocation4 + $0x28] sm:$0xff] %vm295_vm4, %v2909_v58  ;;  %v2910_v61 = vmax.f32 %v2878_v60, 0.0 }
 0x3b5   : >> { %2945 = vst.msk [vmem:[#allocation4 + $0x50] sm:$0xff] %vm295_vm4, %v2912_v22 }
 0x3b6   : >> { %2943 = vst.msk [vmem:[#allocation4 + $0x30] sm:$0xff] %vm295_vm4, %v2910_v61  ;;  %v6700_v3 = vpop.f32.mrb[4].mxu0 }
 0x3b7   : >> { %v2883_v4 = vadd.f32 %v6700_v3, %v9073_v43  ;;  %v2728_v31 = vpop.f32.mrb[5].mxu0 }
 0x3b8   : >> { %v2881_v6 = vadd.f32 %v9073_v43, %v2728_v31  ;;  %v6701_v19 = vpop.f32.mrb[6].mxu0 }
 0x3b9   : >> { %v2915_v7 = vmax.f32 %v2883_v4, 0.0  ;;  %v2884_v48 = vadd.f32 %v6701_v19, %v9073_v43  ;;  %v2731_v8 = vpop.f32.mrb[7].mxu0 }
 0x3ba   : >> { %v2913_v10 = vmax.f32 %v2881_v6, 0.0  ;;  %v2882_v36 = vadd.f32 %v9073_v43, %v2731_v8  ;;  %v3017_v14 = vld [vmem:[#allocation4 + $0x48] sm:$0xff] }
 0x3bb   : >> { %2948 = vst.msk [vmem:[#allocation4 + $0x88] sm:$0xff] %vm295_vm4, %v2915_v7  ;;  %v2916_v46 = vmax.f32 %v2884_v48, 0.0  ;;  %v3015_v20 = vld [vmem:[#allocation4 + $0x28] sm:$0xff] }
 0x3bc   : >> { %2946 = vst.msk [vmem:[#allocation4 + $0x68] sm:$0xff] %vm295_vm4, %v2913_v10  ;;  %v2914_v11 = vmax.f32 %v2882_v36, 0.0  ;;  %v3018_v15 = vld [vmem:[#allocation4 + $0x50] sm:$0xff] }
 0x3bd   : >> { %2949 = vst.msk [vmem:[#allocation4 + $0x90] sm:$0xff] %vm295_vm4, %v2916_v46  ;;  %v7656_v18 = vpack.i.bf16 %v3018_v15, %v3017_v14  ;;  %v3016_v21 = vld [vmem:[#allocation4 + $0x30] sm:$0xff] }
 0x3be   : >> { %2947 = vst.msk [vmem:[#allocation4 + $0x70] sm:$0xff] %vm295_vm4, %v2914_v11  ;;  %v6704_v2 = vpop.f32.mrb[8].mxu0  ;;  %v7666_v25 = vpack.i.bf16 %v3016_v21, %v3015_v20  ;;  %v3053_v26 = vld [vmem:[#allocation4 + $0x49] sm:$0xff]  ;;  %v3054_v1 = vld [vmem:[#allocation4 + $0x51] sm:$0xff] }
 0x3bf   : >> { %v2887_v35 = vadd.f32 %v6704_v2, %v9073_v43  ;;  %v2744_v28 = vpop.f32.mrb[9].mxu0  ;;  %7657 = vrot.lane.b32.xlu1 %v7656_v18, %s8090_s25  ;;  %v3051_v30 = vld [vmem:[#allocation4 + $0x29] sm:$0xff]  ;;  %v3052_v29 = vld [vmem:[#allocation4 + $0x31] sm:$0xff]  ;;  %v7661_v59 = vpack.i.bf16 %v3054_v1, %v3053_v26 }
 0x3c0   : >> { %v2885_v37 = vadd.f32 %v9073_v43, %v2744_v28  ;;  %v6705_v32 = vpop.f32.mrb[10].mxu0  ;;  %7667 = vrot.lane.b32.xlu0 %v7666_v25, %s8090_s25  ;;  %v7671_v27 = vpack.i.bf16 %v3052_v29, %v3051_v30 }
 0x3c1   : >> { %v2919_v38 = vmax.f32 %v2887_v35, 0.0  ;;  %v2888_v57 = vadd.f32 %v6705_v32, %v9073_v43  ;;  %v2747_v39 = vpop.f32.mrb[11].mxu0 }
 0x3c2   : >> { %v2917_v5 = vmax.f32 %v2885_v37, 0.0  ;;  %v2886_v24 = vadd.f32 %v9073_v43, %v2747_v39  ;;  %v3021_v13 = vld [vmem:[#allocation4 + $0x88] sm:$0xff] }
 0x3c3   : >> { %2952 = vst.msk [vmem:[#allocation4 + $0xc8] sm:$0xff] %vm295_vm4, %v2919_v38  ;;  %v2920_v52 = vmax.f32 %v2888_v57, 0.0  ;;  %7662 = vrot.lane.b32.xlu1 %v7661_v59, %s8089_s24  ;;  %v3019_v45 = vld [vmem:[#allocation4 + $0x68] sm:$0xff] }
 0x3c4   : >> { %2950 = vst.msk [vmem:[#allocation4 + $0xa8] sm:$0xff] %vm295_vm4, %v2917_v5  ;;  %v2918_v56 = vmax.f32 %v2886_v24, 0.0  ;;  %7672 = vrot.lane.b32.xlu0 %v7671_v27, %s8089_s24  ;;  %v3022_v17 = vld [vmem:[#allocation4 + $0x90] sm:$0xff] }
 0x3c5   : >> { %2953 = vst.msk [vmem:[#allocation4 + $0xd0] sm:$0xff] %vm295_vm4, %v2920_v52  ;;  %v7676_v23 = vpack.i.bf16 %v3022_v17, %v3021_v13  ;;  %v3020_v50 = vld [vmem:[#allocation4 + $0x70] sm:$0xff] }
 0x3c6   : >> { %2951 = vst.msk [vmem:[#allocation4 + $0xb0] sm:$0xff] %vm295_vm4, %v2918_v56  ;;  %v6708_v12 = vpop.f32.mrb[12].mxu0  ;;  %v7686_v16 = vpack.i.bf16 %v3020_v50, %v3019_v45  ;;  %v3057_v54 = vld [vmem:[#allocation4 + $0x89] sm:$0xff]  ;;  %v3058_v40 = vld [vmem:[#allocation4 + $0x91] sm:$0xff] }
 0x3c7   : >> { %v2891_v41 = vadd.f32 %v6708_v12, %v9073_v43  ;;  %v2760_v42 = vpop.f32.mrb[13].mxu0  ;;  %7677 = vrot.lane.b32.xlu1 %v7676_v23, %s8090_s25  ;;  %v3055_v34 = vld [vmem:[#allocation4 + $0x69] sm:$0xff]  ;;  %v3056_v44 = vld [vmem:[#allocation4 + $0x71] sm:$0xff]  ;;  %v7681_v53 = vpack.i.bf16 %v3058_v40, %v3057_v54 }
 0x3c8   : >> { %v2889_v63 = vadd.f32 %v9073_v43, %v2760_v42  ;;  %v6709_v47 = vpop.f32.mrb[14].mxu0  ;;  %7687 = vrot.lane.b32.xlu0 %v7686_v16, %s8090_s25  ;;  %v7691_v60 = vpack.i.bf16 %v3056_v44, %v3055_v34 }
 0x3c9   : >> { %v2923_v49 = vmax.f32 %v2891_v41, 0.0  ;;  %v2892_v51 = vadd.f32 %v6709_v47, %v9073_v43  ;;  %v2763_v0 = vpop.f32.mrb[15].mxu0 }
 0x3ca   : >> { %v2921_v55 = vmax.f32 %v2889_v63, 0.0  ;;  %v2890_v58 = vadd.f32 %v9073_v43, %v2763_v0  ;;  %v3025_v62 = vld [vmem:[#allocation4 + $0xc8] sm:$0xff] }
 0x3cb   : >> { %2956 = vst.msk [vmem:[#allocation4 + $0x108] sm:$0xff] %vm295_vm4, %v2923_v49  ;;  %v2924_v22 = vmax.f32 %v2892_v51, 0.0  ;;  %7682 = vrot.lane.b32.xlu1 %v7681_v53, %s8089_s24  ;;  %v3023_v31 = vld [vmem:[#allocation4 + $0xa8] sm:$0xff] }
 0x3cc   : >> { %2954 = vst.msk [vmem:[#allocation4 + $0xe8] sm:$0xff] %vm295_vm4, %v2921_v55  ;;  %v2922_v61 = vmax.f32 %v2890_v58, 0.0  ;;  %7692 = vrot.lane.b32.xlu0 %v7691_v60, %s8089_s24  ;;  %v3026_v3 = vld [vmem:[#allocation4 + $0xd0] sm:$0xff] }
 0x3cd   : >> { %2957 = vst.msk [vmem:[#allocation4 + $0x110] sm:$0xff] %vm295_vm4, %v2924_v22  ;;  %v7696_v4 = vpack.i.bf16 %v3026_v3, %v3025_v62  ;;  %v3024_v6 = vld [vmem:[#allocation4 + $0xb0] sm:$0xff] }
 0x3ce   : >> { %2955 = vst.msk [vmem:[#allocation4 + $0xf0] sm:$0xff] %vm295_vm4, %v2922_v61  ;;  %v6712_v19 = vpop.f32.mrb[16].mxu0  ;;  %v7706_v7 = vpack.i.bf16 %v3024_v6, %v3023_v31  ;;  %v3061_v48 = vld [vmem:[#allocation4 + $0xc9] sm:$0xff]  ;;  %v3062_v8 = vld [vmem:[#allocation4 + $0xd1] sm:$0xff] }
 0x3cf   : >> { %v2895_v9 = vadd.f32 %v6712_v19, %v9073_v43  ;;  %v2776_v10 = vpop.f32.mrb[17].mxu0  ;;  %7697 = vrot.lane.b32.xlu1 %v7696_v4, %s8090_s25  ;;  %v3059_v36 = vld [vmem:[#allocation4 + $0xa9] sm:$0xff]  ;;  %v3060_v46 = vld [vmem:[#allocation4 + $0xb1] sm:$0xff]  ;;  %v7701_v21 = vpack.i.bf16 %v3062_v8, %v3061_v48 }
 0x3d0   : >> { %v2893_v11 = vadd.f32 %v9073_v43, %v2776_v10  ;;  %v6713_v14 = vpop.f32.mrb[18].mxu0  ;;  %7707 = vrot.lane.b32.xlu0 %v7706_v7, %s8090_s25  ;;  %v7711_v26 = vpack.i.bf16 %v3060_v46, %v3059_v36 }
 0x3d1   : >> { %v2927_v15 = vmax.f32 %v2895_v9, 0.0  ;;  %v2896_v18 = vadd.f32 %v6713_v14, %v9073_v43  ;;  %v2779_v20 = vpop.f32.mrb[19].mxu0 }
 0x3d2   : >> { %v2925_v2 = vmax.f32 %v2893_v11, 0.0  ;;  %v2894_v25 = vadd.f32 %v9073_v43, %v2779_v20  ;;  %v3029_v28 = vld [vmem:[#allocation4 + $0x108] sm:$0xff] }
 0x3d3   : >> { %2960 = vst.msk [vmem:[#allocation4 + $0x148] sm:$0xff] %vm295_vm4, %v2927_v15  ;;  %v2928_v1 = vmax.f32 %v2896_v18, 0.0  ;;  %7702 = vrot.lane.b32.xlu1 %v7701_v21, %s8089_s24  ;;  %v3027_v37 = vld [vmem:[#allocation4 + $0xe8] sm:$0xff] }
 0x3d4   : >> { %2958 = vst.msk [vmem:[#allocation4 + $0x128] sm:$0xff] %vm295_vm4, %v2925_v2  ;;  %v2926_v35 = vmax.f32 %v2894_v25, 0.0  ;;  %7712 = vrot.lane.b32.xlu0 %v7711_v26, %s8089_s24  ;;  %v3030_v30 = vld [vmem:[#allocation4 + $0x110] sm:$0xff] }
 0x3d5   : >> { %2961 = vst.msk [vmem:[#allocation4 + $0x150] sm:$0xff] %vm295_vm4, %v2928_v1  ;;  %v7716_v29 = vpack.i.bf16 %v3030_v30, %v3029_v28  ;;  %v3028_v32 = vld [vmem:[#allocation4 + $0xf0] sm:$0xff] }
 0x3d6   : >> { %2959 = vst.msk [vmem:[#allocation4 + $0x130] sm:$0xff] %vm295_vm4, %v2926_v35  ;;  %v6716_v38 = vpop.f32.mrb[20].mxu0  ;;  %v7726_v57 = vpack.i.bf16 %v3028_v32, %v3027_v37  ;;  %v3065_v39 = vld [vmem:[#allocation4 + $0x109] sm:$0xff]  ;;  %v3066_v59 = vld [vmem:[#allocation4 + $0x111] sm:$0xff] }
 0x3d7   : >> { %v2899_v5 = vadd.f32 %v6716_v38, %v9073_v43  ;;  %v2792_v24 = vpop.f32.mrb[21].mxu0  ;;  %7717 = vrot.lane.b32.xlu1 %v7716_v29, %s8090_s25  ;;  %v3063_v27 = vld [vmem:[#allocation4 + $0xe9] sm:$0xff]  ;;  %v3064_v52 = vld [vmem:[#allocation4 + $0xf1] sm:$0xff]  ;;  %v7721_v50 = vpack.i.bf16 %v3066_v59, %v3065_v39 }
 0x3d8   : >> { %v2897_v56 = vadd.f32 %v9073_v43, %v2792_v24  ;;  %v6717_v13 = vpop.f32.mrb[22].mxu0  ;;  %7727 = vrot.lane.b32.xlu0 %v7726_v57, %s8090_s25  ;;  %v7731_v54 = vpack.i.bf16 %v3064_v52, %v3063_v27 }
 0x3d9   : >> { %v2931_v17 = vmax.f32 %v2899_v5, 0.0  ;;  %v2900_v23 = vadd.f32 %v6717_v13, %v9073_v43  ;;  %v2795_v45 = vpop.f32.mrb[23].mxu0 }
 0x3da   : >> { %v2929_v12 = vmax.f32 %v2897_v56, 0.0  ;;  %v2898_v16 = vadd.f32 %v9073_v43, %v2795_v45  ;;  %v3033_v42 = vld [vmem:[#allocation4 + $0x148] sm:$0xff] }
 0x3db   : >> { %2964 = vst.msk [vmem:[#allocation4 + $0x188] sm:$0xff] %vm295_vm4, %v2931_v17  ;;  %v2932_v40 = vmax.f32 %v2900_v23, 0.0  ;;  %7722 = vrot.lane.b32.xlu1 %v7721_v50, %s8089_s24  ;;  %v3031_v63 = vld [vmem:[#allocation4 + $0x128] sm:$0xff] }
 0x3dc   : >> { %2962 = vst.msk [vmem:[#allocation4 + $0x168] sm:$0xff] %vm295_vm4, %v2929_v12  ;;  %v2930_v41 = vmax.f32 %v2898_v16, 0.0  ;;  %7732 = vrot.lane.b32.xlu0 %v7731_v54, %s8089_s24  ;;  %v3034_v34 = vld [vmem:[#allocation4 + $0x150] sm:$0xff] }
 0x3dd   : >> { %2965 = vst.msk [vmem:[#allocation4 + $0x190] sm:$0xff] %vm295_vm4, %v2932_v40  ;;  %v7736_v44 = vpack.i.bf16 %v3034_v34, %v3033_v42  ;;  %v3032_v47 = vld [vmem:[#allocation4 + $0x130] sm:$0xff] }
 0x3de   : >> { %2963 = vst.msk [vmem:[#allocation4 + $0x170] sm:$0xff] %vm295_vm4, %v2930_v41  ;;  %v6720_v49 = vpop.f32.mrb[24].mxu0  ;;  %v7746_v51 = vpack.i.bf16 %v3032_v47, %v3031_v63  ;;  %v3069_v0 = vld [vmem:[#allocation4 + $0x149] sm:$0xff]  ;;  %v3070_v53 = vld [vmem:[#allocation4 + $0x151] sm:$0xff] }
 0x3df   : >> { %v2903_v55 = vadd.f32 %v6720_v49, %v9073_v43  ;;  %v2808_v58 = vpop.f32.mrb[25].mxu0  ;;  %7737 = vrot.lane.b32.xlu1 %v7736_v44, %s8090_s25  ;;  %v3067_v60 = vld [vmem:[#allocation4 + $0x129] sm:$0xff]  ;;  %v3068_v22 = vld [vmem:[#allocation4 + $0x131] sm:$0xff]  ;;  %v7741_v6 = vpack.i.bf16 %v3070_v53, %v3069_v0 }
 0x3e0   : >> { %v2901_v61 = vadd.f32 %v9073_v43, %v2808_v58  ;;  %v6721_v62 = vpop.f32.mrb[26].mxu0  ;;  %7747 = vrot.lane.b32.xlu0 %v7746_v51, %s8090_s25  ;;  %v7751_v48 = vpack.i.bf16 %v3068_v22, %v3067_v60  ;;  %v3049_v0 = vld [vmem:[#allocation4 + $0x9] sm:$0xff]  ;;  %v3050_v53 = vld [vmem:[#allocation4 + $0x11] sm:$0xff] }
 0x3e1   : >> { %v2935_v3 = vmax.f32 %v2903_v55, 0.0  ;;  %v2904_v4 = vadd.f32 %v6721_v62, %v9073_v43  ;;  %v2811_v31 = vpop.f32.mrb[27].mxu0  ;;  %v3013_v58 = vld [vmem:[#allocation4 + $0x8] sm:$0xff]  ;;  %v3014_v60 = vld [vmem:[#allocation4 + $0x10] sm:$0xff] }
 0x3e2   : >> { %v2933_v19 = vmax.f32 %v2901_v61, 0.0  ;;  %v2902_v7 = vadd.f32 %v9073_v43, %v2811_v31  ;;  %v3037_v10 = vld [vmem:[#allocation4 + $0x188] sm:$0xff]  ;;  %v7821_v61 = vpack.i.bf16 %v3050_v53, %v3049_v0  ;;  %v7816_v62 = vpack.i.bf16 %v3014_v60, %v3013_v58 }
 0x3e3   : >> { %2968 = vst.msk [vmem:[#allocation4 + $0x1c8] sm:$0xff] %vm295_vm4, %v2935_v3  ;;  %v2936_v8 = vmax.f32 %v2904_v4, 0.0  ;;  %7742 = vrot.lane.b32.xlu1 %v7741_v6, %s8089_s24  ;;  %v3035_v11 = vld [vmem:[#allocation4 + $0x168] sm:$0xff]  ;;  %v3084_v4 = vld [vmem:[#allocation4 + $0x231] sm:$0xff] }
 0x3e4   : >> { %2966 = vst.msk [vmem:[#allocation4 + $0x1a8] sm:$0xff] %vm295_vm4, %v2933_v19  ;;  %v2934_v9 = vmax.f32 %v2902_v7, 0.0  ;;  %7752 = vrot.lane.b32.xlu0 %v7751_v48, %s8089_s24  ;;  %v3038_v36 = vld [vmem:[#allocation4 + $0x190] sm:$0xff]  ;;  %v3047_v31 = vld [vmem:[#allocation4 + $0x228] sm:$0xff] }
 0x3e5   : >> { %2969 = vst.msk [vmem:[#allocation4 + $0x1d0] sm:$0xff] %vm295_vm4, %v2936_v8  ;;  %v7756_v46 = vpack.i.bf16 %v3038_v36, %v3037_v10  ;;  %v3036_v14 = vld [vmem:[#allocation4 + $0x170] sm:$0xff] }
 0x3e6   : >> { %2967 = vst.msk [vmem:[#allocation4 + $0x1b0] sm:$0xff] %vm295_vm4, %v2934_v9  ;;  %v6724_v15 = vpop.f32.mrb[28].mxu0  ;;  %v7766_v18 = vpack.i.bf16 %v3036_v14, %v3035_v11  ;;  %v3073_v20 = vld [vmem:[#allocation4 + $0x189] sm:$0xff]  ;;  %v3074_v21 = vld [vmem:[#allocation4 + $0x191] sm:$0xff] }
 0x3e7   : >> { %v2907_v2 = vadd.f32 %v6724_v15, %v9073_v43  ;;  %v2824_v25 = vpop.f32.mrb[29].mxu0  ;;  %7757 = vrot.lane.b32.xlu1 %v7756_v46, %s8090_s25  ;;  %v3071_v26 = vld [vmem:[#allocation4 + $0x169] sm:$0xff]  ;;  %v3072_v1 = vld [vmem:[#allocation4 + $0x171] sm:$0xff]  ;;  %v7761_v32 = vpack.i.bf16 %v3074_v21, %v3073_v20 }
 0x3e8   : >> { %v2905_v35 = vadd.f32 %v9073_v43, %v2824_v25  ;;  %v6725_v28 = vpop.f32.mrb[30].mxu0  ;;  %7767 = vrot.lane.b32.xlu0 %v7766_v18, %s8090_s25  ;;  %v7771_v39 = vpack.i.bf16 %v3072_v1, %v3071_v26  ;;  %v3083_v3 = vld [vmem:[#allocation4 + $0x229] sm:$0xff] }
 0x3e9   : >> { %v2939_v30 = vmax.f32 %v2907_v2, 0.0  ;;  %v2908_v29 = vadd.f32 %v6725_v28, %v9073_v43  ;;  %v2827_v37 = vpop.f32.mrb[31].mxu0  ;;  %v3048_v6 = vld [vmem:[#allocation4 + $0x230] sm:$0xff]  ;;  %v7831_v19 = vpack.i.bf16 %v3084_v4, %v3083_v3  ;;  %v2981_v14 = vld [vmem:[#allocation4 + $0x47] sm:$0xff] }
 0x3ea   : >> { %v2937_v38 = vmax.f32 %v2905_v35, 0.0  ;;  %v2906_v57 = vadd.f32 %v9073_v43, %v2827_v37  ;;  %v3041_v24 = vld [vmem:[#allocation4 + $0x1c8] sm:$0xff]  ;;  %v7826_v7 = vpack.i.bf16 %v3048_v6, %v3047_v31 }
 0x3eb   : >> { %2972 = vst.msk [vmem:[#allocation4 + $0x208] sm:$0xff] %vm295_vm4, %v2939_v30  ;;  %v2940_v59 = vmax.f32 %v2908_v29, 0.0  ;;  %7762 = vrot.lane.b32.xlu1 %v7761_v32, %s8089_s24  ;;  %v3039_v56 = vld [vmem:[#allocation4 + $0x1a8] sm:$0xff] }
 0x3ec   : >> { %2970 = vst.msk [vmem:[#allocation4 + $0x1e8] sm:$0xff] %vm295_vm4, %v2937_v38  ;;  %v2938_v5 = vmax.f32 %v2906_v57, 0.0  ;;  %7772 = vrot.lane.b32.xlu0 %v7771_v39, %s8089_s24  ;;  %v3042_v27 = vld [vmem:[#allocation4 + $0x1d0] sm:$0xff]  ;;  %v2979_v26 = vld [vmem:[#allocation4 + $0x27] sm:$0xff] }
 0x3ed   : >> { %2973 = vst.msk [vmem:[#allocation4 + $0x210] sm:$0xff] %vm295_vm4, %v2940_v59  ;;  %v7776_v52 = vpack.i.bf16 %v3042_v27, %v3041_v24  ;;  %v3040_v13 = vld [vmem:[#allocation4 + $0x1b0] sm:$0xff]  ;;  %v7863_v3 = vld [vmem:[%s8810_s7 + $0xa8] sm:$0xff]  }
 0x3ee   : >> { %2971 = vst.msk [vmem:[#allocation4 + $0x1f0] sm:$0xff] %vm295_vm4, %v2938_v5  ;;  %v7786_v43 = vpack.i.bf16 %v3040_v13, %v3039_v56  ;;  %v3077_v17 = vld [vmem:[#allocation4 + $0x1c9] sm:$0xff]  ;;  %v3078_v23 = vld [vmem:[#allocation4 + $0x1d1] sm:$0xff] }
 0x3ef   : >> { %7777 = vrot.lane.b32.xlu1 %v7776_v52, %s8090_s25  ;;  %v3075_v45 = vld [vmem:[#allocation4 + $0x1a9] sm:$0xff]  ;;  %v3076_v50 = vld [vmem:[#allocation4 + $0x1b1] sm:$0xff]  ;;  %v7781_v12 = vpack.i.bf16 %v3078_v23, %v3077_v17 }
 0x3f0   : >> { %7787 = vrot.lane.b32.xlu0 %v7786_v43, %s8090_s25  ;;  %v7791_v16 = vpack.i.bf16 %v3076_v50, %v3075_v45  ;;  %v2982_v15 = vld [vmem:[#allocation4 + $0x4f] sm:$0xff]  ;;  %v7861_v56 = vld [vmem:[%s8810_s7 + $0x98] sm:$0xff]   ;;  %v2985_v23 = vld [vmem:[#allocation4 + $0x87] sm:$0xff] }
 0x3f1   : >> { %v2980_v1 = vld [vmem:[#allocation4 + $0x2f] sm:$0xff] }
 0x3f2   : >> { %v3045_v54 = vld [vmem:[#allocation4 + $0x208] sm:$0xff] }
 0x3f3   : >> { %7782 = vrot.lane.b32.xlu1 %v7781_v12, %s8089_s24  ;;  %v3043_v42 = vld [vmem:[#allocation4 + $0x1e8] sm:$0xff] }
 0x3f4   : >> { %7792 = vrot.lane.b32.xlu0 %v7791_v16, %s8089_s24  ;;  %v3046_v40 = vld [vmem:[#allocation4 + $0x210] sm:$0xff] }
 0x3f5   : >> { %v7796_v41 = vpack.i.bf16 %v3046_v40, %v3045_v54  ;;  %v3044_v34 = vld [vmem:[#allocation4 + $0x1f0] sm:$0xff] }
 0x3f6   : >> { %v7801_v44 = vpack.i.bf16 %v3044_v34, %v3043_v42  ;;  %v3081_v63 = vld [vmem:[#allocation4 + $0x209] sm:$0xff]  ;;  %v3082_v47 = vld [vmem:[#allocation4 + $0x211] sm:$0xff] }
 0x3f7   : >> { %7797 = vrot.lane.b32.xlu1 %v7796_v41, %s8090_s25  ;;  %v3079_v49 = vld [vmem:[#allocation4 + $0x1e9] sm:$0xff]  ;;  %v3080_v51 = vld [vmem:[#allocation4 + $0x1f1] sm:$0xff]  ;;  %v7811_v55 = vpack.i.bf16 %v3082_v47, %v3081_v63  ;;  %v7862_v63 = vld [vmem:[%s8810_s7 + $0xa0] sm:$0xff]  }
 0x3f8   : >> { %7802 = vrot.lane.b32.xlu0 %v7801_v44, %s8090_s25  ;;  %v7806_v22 = vpack.i.bf16 %v3080_v51, %v3079_v49  ;;  %v2986_v45 = vld [vmem:[#allocation4 + $0x8f] sm:$0xff]  ;;  %v2983_v41 = vld [vmem:[#allocation4 + $0x67] sm:$0xff] }
 0x3f9   : >> { %v2984_v42 = vld [vmem:[#allocation4 + $0x6f] sm:$0xff] }
 0x3fb   : >> { %7812 = vrot.lane.b32.xlu1 %v7811_v55, %s8089_s24 }
 0x3fc   : >> { %7807 = vrot.lane.b32.xlu0 %v7806_v22, %s8089_s24 }
 0x3ff   : >> { %7822 = vrot.lane.b32.xlu1 %v7821_v61, %s8089_s24 }
 0x400   : >> { %7817 = vrot.lane.b32.xlu0 %v7816_v62, %s8090_s25 }
 0x403   : >> { %7832 = vrot.lane.b32.xlu1 %v7831_v19, %s8089_s24  ;;  %v2989_v19 = vld [vmem:[#allocation4 + $0xc7] sm:$0xff] }
 0x404   : >> { %7827 = vrot.lane.b32.xlu0 %v7826_v7, %s8090_s25  ;;  %v2990_v7 = vld [vmem:[#allocation4 + $0xcf] sm:$0xff] }
 0x431   : >> { %v7658_v48 = vpop.permute.xlu1 %7657 }
 0x432   : >> { %v7668_v8 = vpop.permute.xlu0 %7667  ;;  %v7660_v9 = vunpack.i.h.bf16 %v7658_v48  ;;  %v7659_v10 = vunpack.i.l.bf16 %v7658_v48 }
 0x433   : >> { %v7670_v36 = vunpack.i.h.bf16 %v7668_v8  ;;  %v7669_v46 = vunpack.i.l.bf16 %v7668_v8 }
 0x434   : >> { %v3377_v2 = vsel %vm295_vm4, %v2981_v14, %v7659_v10  ;;  %v3378_v25 = vsel %vm295_vm4, %v2982_v15, %v7660_v9 }
 0x435   : >> { %v7663_v11 = vpop.permute.xlu1 %7662  ;;  %v3375_v30 = vsel %vm295_vm4, %v2979_v26, %v7669_v46  ;;  %v3376_v29 = vsel %vm295_vm4, %v2980_v1, %v7670_v36  ;;  %v2987_v46 = vld [vmem:[#allocation4 + $0xa7] sm:$0xff] }
 0x436   : >> { %v7665_v18 = vunpack.i.h.bf16 %v7663_v11  ;;  %v7664_v20 = vunpack.i.l.bf16 %v7663_v11  ;;  %v7673_v21 = vpop.permute.xlu0 %7672  ;;  %v2988_v11 = vld [vmem:[#allocation4 + $0xaf] sm:$0xff] }
 0x437   : >> { %v7675_v35 = vunpack.i.h.bf16 %v7673_v21  ;;  %v7674_v28 = vunpack.i.l.bf16 %v7673_v21 }
 0x438   : >> { %v3413_v37 = vsel %vm2093_vm5, %v3377_v2, %v7664_v20  ;;  %v3414_v32 = vsel %vm2093_vm5, %v3378_v25, %v7665_v18  ;;  %v7864_v18 = vld [vmem:[%s8810_s7 + $0xb0] sm:$0xff]  }
 0x439   : >> { %v7678_v38 = vpop.permute.xlu1 %7677  ;;  %v3411_v57 = vsel %vm2093_vm5, %v3375_v30, %v7674_v28  ;;  %v3412_v39 = vsel %vm2093_vm5, %v3376_v29, %v7675_v35  ;;  %v9191_v24 = vpack.c.bf16 %v3414_v32, %v3413_v37 }
 0x43a   : >> { %v7688_v59 = vpop.permute.xlu0 %7687  ;;  %v9189_v5 = vpack.c.bf16 %v3412_v39, %v3411_v57  ;;  %v7680_v27 = vunpack.i.h.bf16 %v7678_v38  ;;  %v7679_v52 = vunpack.i.l.bf16 %v7678_v38  ;;  %v7865_v38 = vld [vmem:[%s8810_s7 + $0xb8] sm:$0xff]  }
 0x43b   : >> { %v7690_v13 = vunpack.i.h.bf16 %v7688_v59  ;;  %v7689_v43 = vunpack.i.l.bf16 %v7688_v59 }
 0x43c   : >> { %6738 = vmatprep.mubr.msk.bf16.mxu1 %vm2214_vm6, %v9189_v5  ;;  %v3382_v54 = vsel %vm295_vm4, %v2986_v45, %v7680_v27  ;;  %v3381_v40 = vsel %vm295_vm4, %v2985_v23, %v7679_v52  ;;  %v2993_v27 = vld [vmem:[#allocation4 + $0x107] sm:$0xff]  ;;  %v2994_v52 = vld [vmem:[#allocation4 + $0x10f] sm:$0xff] }
 0x43d   : >> { %v7683_v17 = vpop.permute.xlu1 %7682  ;;  %6739 = vmatmul.mubr.msk.bf16.vlgmr.msra.gmra.mrb[0].mxu1 %vm2214_vm6, %v9191_v24  ;;  %v3380_v47 = vsel %vm295_vm4, %v2984_v42, %v7690_v13  ;;  %v3379_v49 = vsel %vm295_vm4, %v2983_v41, %v7689_v43  ;;  %v2991_v45 = vld [vmem:[#allocation4 + $0xe7] sm:$0xff] }
 0x43e   : >> { %v7685_v50 = vunpack.i.h.bf16 %v7683_v17  ;;  %v7684_v12 = vunpack.i.l.bf16 %v7683_v17  ;;  %6771 = vmatpush3.bf16.msra.mxu1 %v9094_v33  ;;  %v7693_v16 = vpop.permute.xlu0 %7692 }
 0x43f   : >> { %v7695_v34 = vunpack.i.h.bf16 %v7693_v16  ;;  %v7694_v44 = vunpack.i.l.bf16 %v7693_v16  ;;  %6772 = vmatprep.subr.bf16.mxu1 %v7861_v56 }
 0x440   : >> { %v3417_v51 = vsel %vm2093_vm5, %v3381_v40, %v7684_v12  ;;  %v3418_v33 = vsel %vm2093_vm5, %v3382_v54, %v7685_v50  ;;  %v2992_v50 = vld [vmem:[#allocation4 + $0xef] sm:$0xff] }
 0x441   : >> { %v3415_v0 = vsel %vm2093_vm5, %v3379_v49, %v7694_v44  ;;  %v3416_v53 = vsel %vm2093_vm5, %v3380_v47, %v7695_v34  ;;  %v7698_v55 = vpop.permute.xlu1 %7697  ;;  %v9210_v22 = vpack.c.bf16 %v3418_v33, %v3417_v51  ;;  %v9238_v54 = vld [vmem:[%s8810_s7 + $0xf0] sm:$0xff]  }
 0x442   : >> { %v9208_v58 = vpack.c.bf16 %v3416_v53, %v3415_v0  ;;  %v7708_v60 = vpop.permute.xlu0 %7707  ;;  %6773 = vmatpush3.bf16.msra.mxu1 %v7861_v56  ;;  %v7700_v61 = vunpack.i.h.bf16 %v7698_v55  ;;  %v7699_v62 = vunpack.i.l.bf16 %v7698_v55 }
 0x443   : >> { %6774 = vmatprep.subr.bf16.mxu1 %v7862_v63  ;;  %v7710_v4 = vunpack.i.h.bf16 %v7708_v60  ;;  %v7709_v31 = vunpack.i.l.bf16 %v7708_v60 }
 0x444   : >> { %6742 = vmatprep.mubr.msk.bf16.mxu1 %vm2214_vm6, %v9208_v58  ;;  %v3386_v10 = vsel %vm295_vm4, %v2990_v7, %v7700_v61  ;;  %v3385_v36 = vsel %vm295_vm4, %v2989_v19, %v7699_v62  ;;  %v2997_v62 = vld [vmem:[#allocation4 + $0x147] sm:$0xff] }
 0x445   : >> { %v7703_v6 = vpop.permute.xlu1 %7702  ;;  %6743 = vmatmul.mubr.msk.bf16.gmra.mrb[4].mxu1 %vm2214_vm6, %v9210_v22  ;;  %v3384_v20 = vsel %vm295_vm4, %v2988_v11, %v7710_v4  ;;  %v3383_v21 = vsel %vm295_vm4, %v2987_v46, %v7709_v31 }
 0x446   : >> { %v7705_v48 = vunpack.i.h.bf16 %v7703_v6  ;;  %v7704_v8 = vunpack.i.l.bf16 %v7703_v6  ;;  %v7713_v9 = vpop.permute.xlu0 %7712  ;;  %6775 = vmatpush3.bf16.msra.mxu1 %v7862_v63 }
 0x447   : >> { %v7715_v14 = vunpack.i.h.bf16 %v7713_v9  ;;  %v7714_v15 = vunpack.i.l.bf16 %v7713_v9  ;;  %6776 = vmatprep.subr.bf16.mxu1 %v7863_v3 }
 0x448   : >> { %v3421_v2 = vsel %vm2093_vm5, %v3385_v36, %v7704_v8  ;;  %v3422_v25 = vsel %vm2093_vm5, %v3386_v10, %v7705_v48  ;;  %v2995_v48 = vld [vmem:[#allocation4 + $0x127] sm:$0xff]  ;;  %v2996_v8 = vld [vmem:[#allocation4 + $0x12f] sm:$0xff] }
 0x449   : >> { %v3419_v26 = vsel %vm2093_vm5, %v3383_v21, %v7714_v15  ;;  %v3420_v1 = vsel %vm2093_vm5, %v3384_v20, %v7715_v14  ;;  %v7718_v35 = vpop.permute.xlu1 %7717  ;;  %v9228_v29 = vpack.c.bf16 %v3422_v25, %v3421_v2 }
 0x44a   : >> { %v9226_v28 = vpack.c.bf16 %v3420_v1, %v3419_v26  ;;  %v7728_v30 = vpop.permute.xlu0 %7727  ;;  %6777 = vmatpush3.bf16.msra.mxu1 %v7863_v3  ;;  %v7720_v37 = vunpack.i.h.bf16 %v7718_v35  ;;  %v7719_v32 = vunpack.i.l.bf16 %v7718_v35  ;;  %v2998_v3 = vld [vmem:[#allocation4 + $0x14f] sm:$0xff] }
 0x44b   : >> { %6778 = vmatprep.subr.bf16.mxu1 %v7864_v18  ;;  %v7730_v57 = vunpack.i.h.bf16 %v7728_v30  ;;  %v7729_v39 = vunpack.i.l.bf16 %v7728_v30 }
 0x44c   : >> { %6746 = vmatprep.mubr.msk.bf16.mxu1 %vm2214_vm6, %v9226_v28  ;;  %v3390_v17 = vsel %vm295_vm4, %v2994_v52, %v7720_v37  ;;  %v3389_v23 = vsel %vm295_vm4, %v2993_v27, %v7719_v32  ;;  %v3001_v32 = vld [vmem:[#allocation4 + $0x187] sm:$0xff] }
 0x44d   : >> { %v7723_v59 = vpop.permute.xlu1 %7722  ;;  %6747 = vmatmul.mubr.msk.bf16.gmra.mrb[8].mxu1 %vm2214_vm6, %v9228_v29  ;;  %v3388_v40 = vsel %vm295_vm4, %v2992_v50, %v7730_v57  ;;  %v3387_v41 = vsel %vm295_vm4, %v2991_v45, %v7729_v39 }
 0x44e   : >> { %v7725_v56 = vunpack.i.h.bf16 %v7723_v59  ;;  %v7724_v13 = vunpack.i.l.bf16 %v7723_v59  ;;  %v7733_v43 = vpop.permute.xlu0 %7732  ;;  %6779 = vmatpush3.bf16.msra.mxu1 %v7864_v18 }
 0x44f   : >> { %v7735_v12 = vunpack.i.h.bf16 %v7733_v43  ;;  %v7734_v16 = vunpack.i.l.bf16 %v7733_v43  ;;  %6780 = vmatprep.subr.bf16.mxu1 %v7865_v38 }
 0x450   : >> { %v3425_v42 = vsel %vm2093_vm5, %v3389_v23, %v7724_v13  ;;  %v3426_v34 = vsel %vm2093_vm5, %v3390_v17, %v7725_v56  ;;  %v2999_v56 = vld [vmem:[#allocation4 + $0x167] sm:$0xff]  ;;  %v3000_v13 = vld [vmem:[#allocation4 + $0x16f] sm:$0xff] }
 0x451   : >> { %v3423_v44 = vsel %vm2093_vm5, %v3387_v41, %v7734_v16  ;;  %v3424_v63 = vsel %vm2093_vm5, %v3388_v40, %v7735_v12  ;;  %v7738_v47 = vpop.permute.xlu1 %7737  ;;  %v9248_v33 = vpack.c.bf16 %v3426_v34, %v3425_v42 }
 0x452   : >> { %v9246_v49 = vpack.c.bf16 %v3424_v63, %v3423_v44  ;;  %v7748_v51 = vpop.permute.xlu0 %7747  ;;  %6781 = vmatpush3.bf16.msra.mxu1 %v7865_v38  ;;  %v7740_v0 = vunpack.i.h.bf16 %v7738_v47  ;;  %v7739_v53 = vunpack.i.l.bf16 %v7738_v47  ;;  %v3002_v38 = vld [vmem:[#allocation4 + $0x18f] sm:$0xff] }
 0x453   : >> { %6814 = vmatprep.subr.bf16.mxu1 %v9238_v54  ;;  %v7750_v55 = vunpack.i.h.bf16 %v7748_v51  ;;  %v7749_v60 = vunpack.i.l.bf16 %v7748_v51 }
 0x454   : >> { %6750 = vmatprep.mubr.msk.bf16.mxu1 %vm2214_vm6, %v9246_v49  ;;  %v3394_v19 = vsel %vm295_vm4, %v2998_v3, %v7740_v0  ;;  %v3393_v7 = vsel %vm295_vm4, %v2997_v62, %v7739_v53 }
 0x455   : >> { %v7743_v61 = vpop.permute.xlu1 %7742  ;;  %6751 = vmatmul.mubr.msk.bf16.gmra.mrb[12].mxu1 %vm2214_vm6, %v9248_v33  ;;  %v3392_v36 = vsel %vm295_vm4, %v2996_v8, %v7750_v55  ;;  %v3391_v46 = vsel %vm295_vm4, %v2995_v48, %v7749_v60  ;;  %v3005_v55 = vld [vmem:[#allocation4 + $0x1c7] sm:$0xff]  ;;  %v3006_v60 = vld [vmem:[#allocation4 + $0x1cf] sm:$0xff] }
 0x456   : >> { %v7745_v4 = vunpack.i.h.bf16 %v7743_v61  ;;  %v7744_v31 = vunpack.i.l.bf16 %v7743_v61  ;;  %v7753_v6 = vpop.permute.xlu0 %7752 }
 0x457   : >> { %v7755_v9 = vunpack.i.h.bf16 %v7753_v6  ;;  %v7754_v10 = vunpack.i.l.bf16 %v7753_v6  ;;  %v3003_v6 = vld [vmem:[#allocation4 + $0x1a7] sm:$0xff] }
 0x458   : >> { %v3429_v11 = vsel %vm2093_vm5, %v3393_v7, %v7744_v31  ;;  %v3430_v14 = vsel %vm2093_vm5, %v3394_v19, %v7745_v4  ;;  %v3004_v19 = vld [vmem:[#allocation4 + $0x1af] sm:$0xff] }
 0x459   : >> { %v3427_v15 = vsel %vm2093_vm5, %v3391_v46, %v7754_v10  ;;  %v3428_v18 = vsel %vm2093_vm5, %v3392_v36, %v7755_v9  ;;  %v7758_v20 = vpop.permute.xlu1 %7757  ;;  %v9265_v25 = vpack.c.bf16 %v3430_v14, %v3429_v11 }
 0x45a   : >> { %v9263_v21 = vpack.c.bf16 %v3428_v18, %v3427_v15  ;;  %v7768_v2 = vpop.permute.xlu0 %7767  ;;  %v7760_v26 = vunpack.i.h.bf16 %v7758_v20  ;;  %v7759_v1 = vunpack.i.l.bf16 %v7758_v20 }
 0x45b   : >> { %v7770_v35 = vunpack.i.h.bf16 %v7768_v2  ;;  %v7769_v30 = vunpack.i.l.bf16 %v7768_v2 }
 0x45c   : >> { %6754 = vmatprep.mubr.msk.bf16.mxu1 %vm2214_vm6, %v9263_v21  ;;  %v3398_v27 = vsel %vm295_vm4, %v3002_v38, %v7760_v26  ;;  %v3397_v52 = vsel %vm295_vm4, %v3001_v32, %v7759_v1  ;;  %v3010_v32 = vld [vmem:[#allocation4 + $0x20f] sm:$0xff] }
 0x45d   : >> { %v7763_v37 = vpop.permute.xlu1 %7762  ;;  %6755 = vmatmul.mubr.msk.bf16.gmra.mrb[16].mxu1 %vm2214_vm6, %v9265_v25  ;;  %v3396_v23 = vsel %vm295_vm4, %v3000_v13, %v7770_v35  ;;  %v3395_v45 = vsel %vm295_vm4, %v2999_v56, %v7769_v30  ;;  %v3008_v56 = vld [vmem:[#allocation4 + $0x1ef] sm:$0xff] }
 0x45e   : >> { %v7765_v57 = vunpack.i.h.bf16 %v7763_v37  ;;  %v7764_v39 = vunpack.i.l.bf16 %v7763_v37  ;;  %v7773_v59 = vpop.permute.xlu0 %7772  ;;  %v3009_v37 = vld [vmem:[#allocation4 + $0x207] sm:$0xff] }
 0x45f   : >> { %v7775_v43 = vunpack.i.h.bf16 %v7773_v59  ;;  %v7774_v17 = vunpack.i.l.bf16 %v7773_v59 }
 0x460   : >> { %v3433_v50 = vsel %vm2093_vm5, %v3397_v52, %v7764_v39  ;;  %v3434_v12 = vsel %vm2093_vm5, %v3398_v27, %v7765_v57  ;;  %v3007_v52 = vld [vmem:[#allocation4 + $0x1e7] sm:$0xff] }
 0x461   : >> { %v3431_v16 = vsel %vm2093_vm5, %v3395_v45, %v7774_v17  ;;  %v3432_v40 = vsel %vm2093_vm5, %v3396_v23, %v7775_v43  ;;  %v7778_v41 = vpop.permute.xlu1 %7777  ;;  %v9281_v44 = vpack.c.bf16 %v3434_v12, %v3433_v50 }
 0x462   : >> { %v9279_v42 = vpack.c.bf16 %v3432_v40, %v3431_v16  ;;  %v7788_v34 = vpop.permute.xlu0 %7787  ;;  %v7780_v63 = vunpack.i.h.bf16 %v7778_v41  ;;  %v7779_v47 = vunpack.i.l.bf16 %v7778_v41 }
 0x463   : >> { %v7790_v51 = vunpack.i.h.bf16 %v7788_v34  ;;  %v7789_v0 = vunpack.i.l.bf16 %v7788_v34  ;;  %v2977_v34 = vld [vmem:[#allocation4 + $0x7] sm:$0xff] }
 0x464   : >> { %6758 = vmatprep.mubr.msk.bf16.mxu1 %vm2214_vm6, %v9279_v42  ;;  %v3402_v4 = vsel %vm295_vm4, %v3006_v60, %v7780_v63  ;;  %v3401_v31 = vsel %vm295_vm4, %v3005_v55, %v7779_v47  ;;  %v2978_v63 = vld [vmem:[#allocation4 + $0xf] sm:$0xff] }
 0x465   : >> { %v7783_v53 = vpop.permute.xlu1 %7782  ;;  %6759 = vmatmul.mubr.msk.bf16.gmra.mrb[20].mxu1 %vm2214_vm6, %v9281_v44  ;;  %v3400_v8 = vsel %vm295_vm4, %v3004_v19, %v7790_v51  ;;  %v3399_v9 = vsel %vm295_vm4, %v3003_v6, %v7789_v0  ;;  %v7867_v6 = vld [vmem:[%s8810_s7 + $0xf8] sm:$0xff]   ;;  %v7868_v19 = vld [vmem:[%s8810_s7 + $0x100] sm:$0xff]  }
 0x466   : >> { %v7785_v61 = vunpack.i.h.bf16 %v7783_v53  ;;  %v7784_v62 = vunpack.i.l.bf16 %v7783_v53  ;;  %v7793_v3 = vpop.permute.xlu0 %7792 }
 0x467   : >> { %v7795_v7 = vunpack.i.h.bf16 %v7793_v3  ;;  %v7794_v48 = vunpack.i.l.bf16 %v7793_v3 }
 0x468   : >> { %v3437_v10 = vsel %vm2093_vm5, %v3401_v31, %v7784_v62  ;;  %v3438_v36 = vsel %vm2093_vm5, %v3402_v4, %v7785_v61 }
 0x469   : >> { %v3435_v46 = vsel %vm2093_vm5, %v3399_v9, %v7794_v48  ;;  %v3436_v11 = vsel %vm2093_vm5, %v3400_v8, %v7795_v7  ;;  %v7798_v14 = vpop.permute.xlu1 %7797  ;;  %v9297_v20 = vpack.c.bf16 %v3438_v36, %v3437_v10  ;;  %v7869_v7 = vld [vmem:[%s8810_s7 + $0x108] sm:$0xff]   ;;  %v7870_v48 = vld [vmem:[%s8810_s7 + $0x110] sm:$0xff]   ;;  %v9396_v9 = vld [vmem:[%s9070_s11 + $0x1] ss:$0 sm:$0xff] }
 0x46a   : >> { %v9295_v15 = vpack.c.bf16 %v3436_v11, %v3435_v46  ;;  %v7803_v18 = vpop.permute.xlu0 %7802  ;;  %v7800_v2 = vunpack.i.h.bf16 %v7798_v14  ;;  %v7799_v26 = vunpack.i.l.bf16 %v7798_v14  ;;  %v4225_v11 = vld [vmem:[#allocation3 + $0x48] sm:$0xff] }
 0x46b   : >> { %v7805_v1 = vunpack.i.h.bf16 %v7803_v18  ;;  %v7804_v35 = vunpack.i.l.bf16 %v7803_v18 }
 0x46c   : >> { %6762 = vmatprep.mubr.msk.bf16.mxu1 %vm2214_vm6, %v9295_v15  ;;  %v3406_v59 = vsel %vm295_vm4, %v3010_v32, %v7800_v2  ;;  %v3405_v27 = vsel %vm295_vm4, %v3009_v37, %v7799_v26 }
 0x46d   : >> { %v7813_v30 = vpop.permute.xlu1 %7812  ;;  %6763 = vmatmul.mubr.msk.bf16.gmra.mrb[24].mxu1 %vm2214_vm6, %v9297_v20  ;;  %v3404_v17 = vsel %vm295_vm4, %v3008_v56, %v7805_v1  ;;  %v3403_v23 = vsel %vm295_vm4, %v3007_v52, %v7804_v35  ;;  %v4226_v35 = vld [vmem:[#allocation3 + $0x50] sm:$0xff] }
 0x46e   : >> { %v7815_v38 = vunpack.i.h.bf16 %v7813_v30  ;;  %v7814_v57 = vunpack.i.l.bf16 %v7813_v30  ;;  %v7808_v39 = vpop.permute.xlu0 %7807 }
 0x46f   : >> { %v7810_v13 = vunpack.i.h.bf16 %v7808_v39  ;;  %v7809_v43 = vunpack.i.l.bf16 %v7808_v39 }
 0x470   : >> { %v3441_v45 = vsel %vm2093_vm5, %v3405_v27, %v7814_v57  ;;  %v3442_v50 = vsel %vm2093_vm5, %v3406_v59, %v7815_v38  ;;  %v4224_v38 = vld [vmem:[#allocation3 + $0x30] sm:$0xff] }
 0x471   : >> { %v3439_v12 = vsel %vm2093_vm5, %v3403_v23, %v7809_v43  ;;  %v3440_v16 = vsel %vm2093_vm5, %v3404_v17, %v7810_v13  ;;  %v7823_v40 = vpop.permute.xlu1 %7822  ;;  %v9313_v53 = vpack.c.bf16 %v3442_v50, %v3441_v45  ;;  %v4229_v43 = vld [vmem:[#allocation3 + $0x88] sm:$0xff] }
 0x472   : >> { %v9311_v41 = vpack.c.bf16 %v3440_v16, %v3439_v12  ;;  %v7818_v47 = vpop.permute.xlu0 %7817  ;;  %v7825_v51 = vunpack.i.h.bf16 %v7823_v40  ;;  %v7824_v0 = vunpack.i.l.bf16 %v7823_v40  ;;  %v4227_v50 = vld [vmem:[#allocation3 + $0x68] sm:$0xff] }
 0x473   : >> { %v7820_v55 = vunpack.i.h.bf16 %v7818_v47  ;;  %v7819_v60 = vunpack.i.l.bf16 %v7818_v47 }
 0x474   : >> { %6766 = vmatprep.mubr.msk.bf16.mxu1 %vm2214_vm6, %v9311_v41 }
 0x475   : >> { %v3374_v61 = vsel %vm295_vm4, %v2978_v63, %v7820_v55  ;;  %v3373_v62 = vsel %vm295_vm4, %v2977_v34, %v7819_v60  ;;  %6767 = vmatmul.mubr.msk.bf16.gmra.mrb[28].mxu1 %vm2214_vm6, %v9313_v53 }
 0x476   : >> { %v3409_v3 = vsel %vm2093_vm5, %v3373_v62, %v7824_v0  ;;  %v3410_v4 = vsel %vm2093_vm5, %v3374_v61, %v7825_v51  ;;  %v4228_v51 = vld [vmem:[#allocation3 + $0x70] sm:$0xff] }
 0x477   : >> { %v3445_v31 = vpack.c.bf16 %v3410_v4, %v3409_v3  ;;  %v4233_v4 = vld [vmem:[#allocation3 + $0xc8] sm:$0xff] }
 0x479   : >> { %6782 = vmatprep.mubr.msk.bf16.mxu1 %vm2214_vm6, %v3445_v31 }
 0x47d   : >> { %6783 = vmatmul.mubr.msk.bf16.vlgmr.msra.gmra.mrb[0].mxu1 %vm2214_vm6, %v9189_v5  ;;  %v7871_v5 = vld [vmem:[%s8810_s7 + $0x118] sm:$0xff]  }
 0x47e   : >> { %6815 = vmatpush3.bf16.msra.mxu1 %v9238_v54  ;;  %6786 = vmatprep.mubr.msk.bf16.mxu1 %vm2214_vm6, %v9191_v24  ;;  %v3012_v54 = vld [vmem:[#allocation4 + $0x22f] sm:$0xff] }
 0x47f   : >> { %6816 = vmatprep.subr.bf16.mxu1 %v7867_v6 }
 0x482   : >> { %6817 = vmatpush3.bf16.msra.mxu1 %v7867_v6 }
 0x483   : >> { %6818 = vmatprep.subr.bf16.mxu1 %v7868_v19 }
 0x485   : >> { %6787 = vmatmul.mubr.msk.bf16.gmra.mrb[4].mxu1 %vm2214_vm6, %v9208_v58 }
 0x486   : >> { %6790 = vmatprep.mubr.msk.bf16.mxu1 %vm2214_vm6, %v9210_v22  ;;  %6819 = vmatpush3.bf16.msra.mxu1 %v7868_v19 }
 0x487   : >> { %6820 = vmatprep.subr.bf16.mxu1 %v7869_v7 }
 0x48a   : >> { %6821 = vmatpush3.bf16.msra.mxu1 %v7869_v7  ;;  %v4231_v7 = vld [vmem:[#allocation3 + $0xa8] sm:$0xff] }
 0x48b   : >> { %6822 = vmatprep.subr.bf16.mxu1 %v7870_v48 }
 0x48d   : >> { %6791 = vmatmul.mubr.msk.bf16.gmra.mrb[8].mxu1 %vm2214_vm6, %v9226_v28 }
 0x48e   : >> { %6794 = vmatprep.mubr.msk.bf16.mxu1 %vm2214_vm6, %v9228_v29  ;;  %6823 = vmatpush3.bf16.msra.mxu1 %v7870_v48 }
 0x48f   : >> { %6824 = vmatprep.subr.bf16.mxu1 %v7871_v5 }
 0x492   : >> { %6825 = vmatpush3.bf16.msra.mxu1 %v7871_v5 }
 0x495   : >> { %6795 = vmatmul.mubr.msk.bf16.gmra.mrb[12].mxu1 %vm2214_vm6, %v9246_v49 }
 0x496   : >> { %6798 = vmatprep.mubr.msk.bf16.mxu1 %vm2214_vm6, %v9248_v33 }
 0x49d   : >> { %6799 = vmatmul.mubr.msk.bf16.gmra.mrb[16].mxu1 %vm2214_vm6, %v9263_v21 }
 0x49e   : >> { %6802 = vmatprep.mubr.msk.bf16.mxu1 %vm2214_vm6, %v9265_v25 }
 0x4a5   : >> { %6803 = vmatmul.mubr.msk.bf16.gmra.mrb[20].mxu1 %vm2214_vm6, %v9279_v42 }
 0x4a6   : >> { %6806 = vmatprep.mubr.msk.bf16.mxu1 %vm2214_vm6, %v9281_v44 }
 0x4ad   : >> { %6807 = vmatmul.mubr.msk.bf16.gmra.mrb[24].mxu1 %vm2214_vm6, %v9295_v15 }
 0x4ae   : >> { %6810 = vmatprep.mubr.msk.bf16.mxu1 %vm2214_vm6, %v9297_v20 }
 0x4b5   : >> { %6811 = vmatmul.mubr.msk.bf16.gmra.mrb[28].mxu1 %vm2214_vm6, %v9311_v41 }
 0x4b6   : >> { %6826 = vmatprep.mubr.msk.bf16.mxu1 %vm2214_vm6, %v9191_v24  ;;  %v7828_v24 = vpop.permute.xlu0 %7827 }
 0x4bd   : >> { %6827 = vmatmul.mubr.msk.bf16.vlgmr.msra.gmra.mrb[0].mxu1 %vm2214_vm6, %v9208_v58  ;;  %v7830_v58 = vunpack.i.h.bf16 %v7828_v24 }
 0x4be   : >> { %6830 = vmatprep.mubr.msk.bf16.mxu1 %vm2214_vm6, %v9210_v22  ;;  %v7829_v22 = vunpack.i.l.bf16 %v7828_v24 }
 0x4c5   : >> { %6831 = vmatmul.mubr.msk.bf16.gmra.mrb[4].mxu1 %vm2214_vm6, %v9226_v28  ;;  %v7833_v28 = vpop.permute.xlu1 %7832 }
 0x4c6   : >> { %6834 = vmatprep.mubr.msk.bf16.mxu1 %vm2214_vm6, %v9228_v29  ;;  %v3011_v29 = vld [vmem:[#allocation4 + $0x227] sm:$0xff] }
 0x4cd   : >> { %6835 = vmatmul.mubr.msk.bf16.gmra.mrb[8].mxu1 %vm2214_vm6, %v9246_v49  ;;  %v7835_v49 = vunpack.i.h.bf16 %v7833_v28 }
 0x4ce   : >> { %6838 = vmatprep.mubr.msk.bf16.mxu1 %vm2214_vm6, %v9248_v33  ;;  %v7834_v33 = vunpack.i.l.bf16 %v7833_v28 }
 0x4d5   : >> { %6839 = vmatmul.mubr.msk.bf16.gmra.mrb[12].mxu1 %vm2214_vm6, %v9263_v21  ;;  %v3408_v21 = vsel %vm295_vm4, %v3012_v54, %v7830_v58  ;;  %v4234_v58 = vld [vmem:[#allocation3 + $0xd0] sm:$0xff] }
 0x4d6   : >> { %6842 = vmatprep.mubr.msk.bf16.mxu1 %vm2214_vm6, %v9265_v25  ;;  %v3407_v25 = vsel %vm295_vm4, %v3011_v29, %v7829_v22  ;;  %v4232_v54 = vld [vmem:[#allocation3 + $0xb0] sm:$0xff] }
 0x4dd   : >> { %6843 = vmatmul.mubr.msk.bf16.gmra.mrb[16].mxu1 %vm2214_vm6, %v9279_v42  ;;  %v3443_v42 = vsel %vm2093_vm5, %v3407_v25, %v7834_v33 }
 0x4de   : >> { %6846 = vmatprep.mubr.msk.bf16.mxu1 %vm2214_vm6, %v9281_v44  ;;  %v3444_v44 = vsel %vm2093_vm5, %v3408_v21, %v7835_v49 }
 0x4df   : >> { %v3462_v8 = vpack.c.bf16 %v3444_v44, %v3443_v42 }
 0x4e5   : >> { %6847 = vmatmul.mubr.msk.bf16.gmra.mrb[20].mxu1 %vm2214_vm6, %v9295_v15 }
 0x4e6   : >> { %6850 = vmatprep.mubr.msk.bf16.mxu1 %vm2214_vm6, %v9297_v20  ;;  %v4223_v20 = vld [vmem:[#allocation3 + $0x28] sm:$0xff] }
 0x4ed   : >> { %6851 = vmatmul.mubr.msk.bf16.gmra.mrb[24].mxu1 %vm2214_vm6, %v9311_v41  ;;  %v4230_v41 = vld [vmem:[#allocation3 + $0x90] sm:$0xff] }
 0x4ee   : >> { %6854 = vmatprep.mubr.msk.bf16.mxu1 %vm2214_vm6, %v9313_v53 }
 0x4f5   : >> { %6855 = vmatmul.mubr.msk.bf16.gmra.mrb[28].mxu1 %vm2214_vm6, %v3462_v8 }
 0x590   : >> { %v6828_v10 = vpop.f32.mrb[0].mxu1 }
 0x591   : >> { %v4193_v36 = vadd.f32 %v6828_v10, %v9396_v9  ;;  %v4026_v46 = vpop.f32.mrb[1].mxu1  ;;  %v4237_v10 = vld [vmem:[#allocation3 + $0x108] sm:$0xff] }
 0x592   : >> { %v4191_v14 = vadd.f32 %v9396_v9, %v4026_v46  ;;  %v6829_v15 = vpop.f32.mrb[2].mxu1 }
 0x593   : >> { %v4257_v18 = vmul.f32 0.1, %v4193_v36  ;;  %v4194_v2 = vadd.f32 %v6829_v15, %v9396_v9  ;;  %v4029_v26 = vpop.f32.mrb[3].mxu1 }
 0x594   : >> { %v4255_v1 = vmul.f32 0.1, %v4191_v14  ;;  %v4192_v30 = vadd.f32 %v9396_v9, %v4029_v26  ;;  %v4235_v14 = vld [vmem:[#allocation3 + $0xe8] sm:$0xff] }
 0x595   : >> { %v4289_v37 = vadd.f32 %v4257_v18, %v4225_v11  ;;  %v4258_v32 = vmul.f32 0.1, %v4194_v2  ;;  %v4238_v2 = vld [vmem:[#allocation3 + $0x110] sm:$0xff] }
 0x596   : >> { %v4287_v57 = vadd.f32 %v4255_v1, %v4223_v20  ;;  %v4256_v39 = vmul.f32 0.1, %v4192_v30  ;;  %v4236_v30 = vld [vmem:[#allocation3 + $0xf0] sm:$0xff] }
 0x597   : >> { %4321 = vst.msk [vmem:[#allocation3 + $0x48] sm:$0xff] %vm295_vm4, %v4289_v37  ;;  %v4290_v59 = vadd.f32 %v4258_v32, %v4226_v35 }
 0x598   : >> { %4319 = vst.msk [vmem:[#allocation3 + $0x28] sm:$0xff] %vm295_vm4, %v4287_v57  ;;  %v4288_v27 = vadd.f32 %v4256_v39, %v4224_v38  ;;  %v6832_v52 = vpop.f32.mrb[4].mxu1 }
 0x599   : >> { %4322 = vst.msk [vmem:[#allocation3 + $0x50] sm:$0xff] %vm295_vm4, %v4290_v59  ;;  %v4197_v56 = vadd.f32 %v6832_v52, %v9396_v9  ;;  %v4042_v13 = vpop.f32.mrb[5].mxu1  ;;  %v4241_v52 = vld [vmem:[#allocation3 + $0x148] sm:$0xff] }
 0x59a   : >> { %4320 = vst.msk [vmem:[#allocation3 + $0x30] sm:$0xff] %vm295_vm4, %v4288_v27  ;;  %v4195_v17 = vadd.f32 %v9396_v9, %v4042_v13  ;;  %v6833_v23 = vpop.f32.mrb[6].mxu1 }
 0x59b   : >> { %v4261_v45 = vmul.f32 0.1, %v4197_v56  ;;  %v4198_v12 = vadd.f32 %v6833_v23, %v9396_v9  ;;  %v4045_v16 = vpop.f32.mrb[7].mxu1 }
 0x59c   : >> { %v4259_v40 = vmul.f32 0.1, %v4195_v17  ;;  %v4196_v34 = vadd.f32 %v9396_v9, %v4045_v16  ;;  %v4239_v17 = vld [vmem:[#allocation3 + $0x128] sm:$0xff] }
 0x59d   : >> { %v4293_v63 = vadd.f32 %v4261_v45, %v4229_v43  ;;  %v4262_v47 = vmul.f32 0.1, %v4198_v12  ;;  %v4242_v12 = vld [vmem:[#allocation3 + $0x150] sm:$0xff] }
 0x59e   : >> { %v4291_v0 = vadd.f32 %v4259_v40, %v4227_v50  ;;  %v4260_v53 = vmul.f32 0.1, %v4196_v34  ;;  %v4240_v34 = vld [vmem:[#allocation3 + $0x130] sm:$0xff] }
 0x59f   : >> { %4325 = vst.msk [vmem:[#allocation3 + $0x88] sm:$0xff] %vm295_vm4, %v4293_v63  ;;  %v4294_v55 = vadd.f32 %v4262_v47, %v4230_v41 }
 0x5a0   : >> { %4323 = vst.msk [vmem:[#allocation3 + $0x68] sm:$0xff] %vm295_vm4, %v4291_v0  ;;  %v4292_v60 = vadd.f32 %v4260_v53, %v4228_v51  ;;  %v6836_v61 = vpop.f32.mrb[8].mxu1 }
 0x5a1   : >> { %4326 = vst.msk [vmem:[#allocation3 + $0x90] sm:$0xff] %vm295_vm4, %v4294_v55  ;;  %v4201_v62 = vadd.f32 %v6836_v61, %v9396_v9  ;;  %v4058_v3 = vpop.f32.mrb[9].mxu1  ;;  %v4245_v61 = vld [vmem:[#allocation3 + $0x188] sm:$0xff] }
 0x5a2   : >> { %4324 = vst.msk [vmem:[#allocation3 + $0x70] sm:$0xff] %vm295_vm4, %v4292_v60  ;;  %v4199_v31 = vadd.f32 %v9396_v9, %v4058_v3  ;;  %v6837_v6 = vpop.f32.mrb[10].mxu1 }
 0x5a3   : >> { %v4265_v19 = vmul.f32 0.1, %v4201_v62  ;;  %v4202_v48 = vadd.f32 %v6837_v6, %v9396_v9  ;;  %v4061_v5 = vpop.f32.mrb[11].mxu1 }
 0x5a4   : >> { %v4263_v24 = vmul.f32 0.1, %v4199_v31  ;;  %v4200_v22 = vadd.f32 %v9396_v9, %v4061_v5  ;;  %v4243_v31 = vld [vmem:[#allocation3 + $0x168] sm:$0xff] }
 0x5a5   : >> { %v4297_v28 = vadd.f32 %v4265_v19, %v4233_v4  ;;  %v4266_v29 = vmul.f32 0.1, %v4202_v48  ;;  %v4246_v48 = vld [vmem:[#allocation3 + $0x190] sm:$0xff] }
 0x5a6   : >> { %v4295_v49 = vadd.f32 %v4263_v24, %v4231_v7  ;;  %v4264_v33 = vmul.f32 0.1, %v4200_v22  ;;  %v4244_v22 = vld [vmem:[#allocation3 + $0x170] sm:$0xff] }
 0x5a7   : >> { %4329 = vst.msk [vmem:[#allocation3 + $0xc8] sm:$0xff] %vm295_vm4, %v4297_v28  ;;  %v4298_v21 = vadd.f32 %v4266_v29, %v4234_v58 }
 0x5a8   : >> { %4327 = vst.msk [vmem:[#allocation3 + $0xa8] sm:$0xff] %vm295_vm4, %v4295_v49  ;;  %v4296_v25 = vadd.f32 %v4264_v33, %v4232_v54  ;;  %v6840_v42 = vpop.f32.mrb[12].mxu1 }
 0x5a9   : >> { %4330 = vst.msk [vmem:[#allocation3 + $0xd0] sm:$0xff] %vm295_vm4, %v4298_v21  ;;  %v4205_v44 = vadd.f32 %v6840_v42, %v9396_v9  ;;  %v4074_v8 = vpop.f32.mrb[13].mxu1  ;;  %v4249_v42 = vld [vmem:[#allocation3 + $0x1c8] sm:$0xff] }
 0x5aa   : >> { %4328 = vst.msk [vmem:[#allocation3 + $0xb0] sm:$0xff] %vm295_vm4, %v4296_v25  ;;  %v4203_v36 = vadd.f32 %v9396_v9, %v4074_v8  ;;  %v6841_v46 = vpop.f32.mrb[14].mxu1 }
 0x5ab   : >> { %v4269_v11 = vmul.f32 0.1, %v4205_v44  ;;  %v4206_v15 = vadd.f32 %v6841_v46, %v9396_v9  ;;  %v4077_v18 = vpop.f32.mrb[15].mxu1 }
 0x5ac   : >> { %v4267_v20 = vmul.f32 0.1, %v4203_v36  ;;  %v4204_v26 = vadd.f32 %v9396_v9, %v4077_v18  ;;  %v4247_v36 = vld [vmem:[#allocation3 + $0x1a8] sm:$0xff] }
 0x5ad   : >> { %v4301_v1 = vadd.f32 %v4269_v11, %v4237_v10  ;;  %v4270_v35 = vmul.f32 0.1, %v4206_v15  ;;  %v4250_v15 = vld [vmem:[#allocation3 + $0x1d0] sm:$0xff] }
 0x5ae   : >> { %v4299_v37 = vadd.f32 %v4267_v20, %v4235_v14  ;;  %v4268_v32 = vmul.f32 0.1, %v4204_v26  ;;  %v4248_v26 = vld [vmem:[#allocation3 + $0x1b0] sm:$0xff] }
 0x5af   : >> { %4333 = vst.msk [vmem:[#allocation3 + $0x108] sm:$0xff] %vm295_vm4, %v4301_v1  ;;  %v4302_v38 = vadd.f32 %v4270_v35, %v4238_v2 }
 0x5b0   : >> { %4331 = vst.msk [vmem:[#allocation3 + $0xe8] sm:$0xff] %vm295_vm4, %v4299_v37  ;;  %v4300_v57 = vadd.f32 %v4268_v32, %v4236_v30  ;;  %v6844_v39 = vpop.f32.mrb[16].mxu1 }
 0x5b1   : >> { %4334 = vst.msk [vmem:[#allocation3 + $0x110] sm:$0xff] %vm295_vm4, %v4302_v38  ;;  %v4209_v59 = vadd.f32 %v6844_v39, %v9396_v9  ;;  %v4090_v27 = vpop.f32.mrb[17].mxu1  ;;  %v4253_v39 = vld [vmem:[#allocation3 + $0x208] sm:$0xff] }
 0x5b2   : >> { %4332 = vst.msk [vmem:[#allocation3 + $0xf0] sm:$0xff] %vm295_vm4, %v4300_v57  ;;  %v4207_v56 = vadd.f32 %v9396_v9, %v4090_v27  ;;  %v6845_v13 = vpop.f32.mrb[18].mxu1 }
 0x5b3   : >> { %v4273_v43 = vmul.f32 0.1, %v4209_v59  ;;  %v4210_v23 = vadd.f32 %v6845_v13, %v9396_v9  ;;  %v4093_v45 = vpop.f32.mrb[19].mxu1 }
 0x5b4   : >> { %v4271_v50 = vmul.f32 0.1, %v4207_v56  ;;  %v4208_v16 = vadd.f32 %v9396_v9, %v4093_v45  ;;  %v4251_v56 = vld [vmem:[#allocation3 + $0x1e8] sm:$0xff] }
 0x5b5   : >> { %v4305_v40 = vadd.f32 %v4273_v43, %v4241_v52  ;;  %v4274_v41 = vmul.f32 0.1, %v4210_v23  ;;  %v4254_v23 = vld [vmem:[#allocation3 + $0x210] sm:$0xff] }
 0x5b6   : >> { %v4303_v63 = vadd.f32 %v4271_v50, %v4239_v17  ;;  %v4272_v47 = vmul.f32 0.1, %v4208_v16  ;;  %v4252_v16 = vld [vmem:[#allocation3 + $0x1f0] sm:$0xff] }
 0x5b7   : >> { %4337 = vst.msk [vmem:[#allocation3 + $0x148] sm:$0xff] %vm295_vm4, %v4305_v40  ;;  %v4306_v51 = vadd.f32 %v4274_v41, %v4242_v12 }
 0x5b8   : >> { %4335 = vst.msk [vmem:[#allocation3 + $0x128] sm:$0xff] %vm295_vm4, %v4303_v63  ;;  %v4304_v0 = vadd.f32 %v4272_v47, %v4240_v34  ;;  %v6848_v53 = vpop.f32.mrb[20].mxu1  ;;  %v4392_v47 = vld [vmem:[#allocation3 + $0x50] sm:$0xff] (%p1654_p4) }
 0x5b9   : >> { %4338 = vst.msk [vmem:[#allocation3 + $0x150] sm:$0xff] %vm295_vm4, %v4306_v51  ;;  %v4213_v55 = vadd.f32 %v6848_v53, %v9396_v9  ;;  %v4106_v60 = vpop.f32.mrb[21].mxu1  ;;  %v4387_v51 = vld [vmem:[#allocation3 + $0x8] sm:$0xff] (%p1654_p4)  ;;  %v4388_v53 = vld [vmem:[#allocation3 + $0x10] sm:$0xff] (%p1654_p4) }
 0x5ba   : >> { %4336 = vst.msk [vmem:[#allocation3 + $0x130] sm:$0xff] %vm295_vm4, %v4304_v0  ;;  %v4211_v62 = vadd.f32 %v9396_v9, %v4106_v60  ;;  %v6849_v3 = vpop.f32.mrb[22].mxu1  ;;  %v4424_v60 = vld [vmem:[#allocation3 + $0x11] sm:$0xff] (%p1654_p4) }
 0x5bb   : >> { %v4277_v4 = vmul.f32 0.1, %v4213_v55  ;;  %v4214_v6 = vadd.f32 %v6849_v3, %v9396_v9  ;;  %v4109_v19 = vpop.f32.mrb[23].mxu1  ;;  %v4423_v55 = vld [vmem:[#allocation3 + $0x9] sm:$0xff] (%p1654_p4) }
 0x5bc   : >> { %v4275_v7 = vmul.f32 0.1, %v4211_v62  ;;  %v4212_v5 = vadd.f32 %v9396_v9, %v4109_v19  ;;  %v4389_v62 = vld [vmem:[#allocation3 + $0x28] sm:$0xff] (%p1654_p4)  ;;  %v4390_v3 = vld [vmem:[#allocation3 + $0x30] sm:$0xff] (%p1654_p4) }
 0x5bd   : >> { %v4309_v24 = vadd.f32 %v4277_v4, %v4245_v61  ;;  %v4278_v58 = vmul.f32 0.1, %v4214_v6  ;;  %v7872_v61 = vpack.i.bf16 (%p1654_p4), %v4388_v53, %v4387_v51  ;;  %v7887_v4 = vpack.i.bf16 (%p1654_p4), %v4424_v60, %v4423_v55  ;;  %v4427_v6 = vld [vmem:[#allocation3 + $0x49] sm:$0xff] (%p1654_p4)  ;;  %v4428_v19 = vld [vmem:[#allocation3 + $0x51] sm:$0xff] (%p1654_p4) }
 0x5be   : >> { %v4307_v28 = vadd.f32 %v4275_v7, %v4243_v31  ;;  %v4276_v29 = vmul.f32 0.1, %v4212_v5  ;;  %v7877_v31 = vpack.i.bf16 (%p1654_p4), %v4390_v3, %v4389_v62  ;;  %v4425_v7 = vld [vmem:[#allocation3 + $0x29] sm:$0xff] (%p1654_p4)  ;;  %v7897_v5 = vpack.i.bf16 (%p1654_p4), %v4428_v19, %v4427_v6  ;;  %v9528_v3 = vld [vmem:[%s9942_s5 + $0x20] sm:$0xff] (%p1654_p4)  }
 0x5bf   : >> { %4341 = vst.msk [vmem:[#allocation3 + $0x188] sm:$0xff] %vm295_vm4, %v4309_v24  ;;  %v4310_v54 = vadd.f32 %v4278_v58, %v4246_v48  ;;  %7873 = vrot.lane.b32.xlu0 (%p1654_p4), %v7872_v61, %s8091_s12  ;;  %v4426_v48 = vld [vmem:[#allocation3 + $0x31] sm:$0xff] (%p1654_p4)  ;;  %v4395_v58 = vld [vmem:[#allocation3 + $0x88] sm:$0xff] (%p1654_p4) }
 0x5c0   : >> { %4339 = vst.msk [vmem:[#allocation3 + $0x168] sm:$0xff] %vm295_vm4, %v4307_v28  ;;  %v4308_v49 = vadd.f32 %v4276_v29, %v4244_v22  ;;  %v6852_v33 = vpop.f32.mrb[24].mxu1  ;;  %v7892_v24 = vpack.i.bf16 (%p1654_p4), %v4426_v48, %v4425_v7  ;;  %v4396_v22 = vld [vmem:[#allocation3 + $0x90] sm:$0xff] (%p1654_p4)  ;;  %v4393_v28 = vld [vmem:[#allocation3 + $0x68] sm:$0xff] (%p1654_p4) }
 0x5c1   : >> { %4342 = vst.msk [vmem:[#allocation3 + $0x190] sm:$0xff] %vm295_vm4, %v4310_v54  ;;  %v4217_v21 = vadd.f32 %v6852_v33, %v9396_v9  ;;  %v4122_v25 = vpop.f32.mrb[25].mxu1  ;;  %v4394_v29 = vld [vmem:[#allocation3 + $0x70] sm:$0xff] (%p1654_p4)  ;;  %v7907_v54 = vpack.i.bf16 (%p1654_p4), %v4396_v22, %v4395_v58 }
 0x5c2   : >> { %4340 = vst.msk [vmem:[#allocation3 + $0x170] sm:$0xff] %vm295_vm4, %v4308_v49  ;;  %v4215_v44 = vadd.f32 %v9396_v9, %v4122_v25  ;;  %v6853_v8 = vpop.f32.mrb[26].mxu1  ;;  %v7902_v49 = vpack.i.bf16 (%p1654_p4), %v4394_v29, %v4393_v28  ;;  %v4431_v33 = vld [vmem:[#allocation3 + $0x89] sm:$0xff] (%p1654_p4)  ;;  %v4444_v55 = vld [vmem:[#allocation3 + $0x151] sm:$0xff] (%p1654_p4) }
 0x5c3   : >> { %v4281_v10 = vmul.f32 0.1, %v4217_v21  ;;  %v4218_v46 = vadd.f32 %v6853_v8, %v9396_v9  ;;  %v4125_v11 = vpop.f32.mrb[27].mxu1  ;;  %7878 = vrot.lane.b32.xlu0 (%p1654_p4), %v7877_v31, %s8091_s12  ;;  %v4432_v21 = vld [vmem:[#allocation3 + $0x91] sm:$0xff] (%p1654_p4)  ;;  %v4429_v25 = vld [vmem:[#allocation3 + $0x69] sm:$0xff] (%p1654_p4) }
 0x5c4   : >> { %v4279_v14 = vmul.f32 0.1, %v4215_v44  ;;  %v4216_v18 = vadd.f32 %v9396_v9, %v4125_v11  ;;  %v7917_v44 = vpack.i.bf16 (%p1654_p4), %v4432_v21, %v4431_v33  ;;  %v4398_v11 = vld [vmem:[#allocation3 + $0xb0] sm:$0xff] (%p1654_p4)  ;;  %v9549_v33 = vld [vmem:[%s9942_s5 + $0x60] sm:$0xff] (%p1654_p4)  }
 0x5c5   : >> { %v4313_v20 = vadd.f32 %v4281_v10, %v4249_v42  ;;  %v4282_v2 = vmul.f32 0.1, %v4218_v46  ;;  %v4430_v42 = vld [vmem:[#allocation3 + $0x71] sm:$0xff] (%p1654_p4)  ;;  %v4399_v10 = vld [vmem:[#allocation3 + $0xc8] sm:$0xff] (%p1654_p4) }
 0x5c6   : >> { %v4311_v1 = vadd.f32 %v4279_v14, %v4247_v36  ;;  %v4280_v35 = vmul.f32 0.1, %v4216_v18  ;;  %v7912_v8 = vpack.i.bf16 (%p1654_p4), %v4430_v42, %v4429_v25  ;;  %v4400_v36 = vld [vmem:[#allocation3 + $0xd0] sm:$0xff] (%p1654_p4)  ;;  %v4397_v46 = vld [vmem:[#allocation3 + $0xa8] sm:$0xff] (%p1654_p4) }
 0x5c7   : >> { %4345 = vst.msk [vmem:[#allocation3 + $0x1c8] sm:$0xff] %vm295_vm4, %v4313_v20  ;;  %v4314_v30 = vadd.f32 %v4282_v2, %v4250_v15  ;;  %7893 = vrot.lane.b32.xlu0 (%p1654_p4), %v7892_v24, %s8092_s13  ;;  %v7927_v14 = vpack.i.bf16 (%p1654_p4), %v4400_v36, %v4399_v10  ;;  %v7922_v15 = vpack.i.bf16 (%p1654_p4), %v4398_v11, %v4397_v46  ;;  %v4435_v18 = vld [vmem:[#allocation3 + $0xc9] sm:$0xff] (%p1654_p4)  ;;  %v4436_v20 = vld [vmem:[#allocation3 + $0xd1] sm:$0xff] (%p1654_p4) }
 0x5c8   : >> { %4343 = vst.msk [vmem:[#allocation3 + $0x1a8] sm:$0xff] %vm295_vm4, %v4311_v1  ;;  %v4312_v37 = vadd.f32 %v4280_v35, %v4248_v26  ;;  %v6856_v32 = vpop.f32.mrb[28].mxu1  ;;  %v4433_v2 = vld [vmem:[#allocation3 + $0xa9] sm:$0xff] (%p1654_p4)  ;;  %v4434_v26 = vld [vmem:[#allocation3 + $0xb1] sm:$0xff] (%p1654_p4)  ;;  %v7937_v35 = vpack.i.bf16 (%p1654_p4), %v4436_v20, %v4435_v18 }
 0x5c9   : >> { %4346 = vst.msk [vmem:[#allocation3 + $0x1d0] sm:$0xff] %vm295_vm4, %v4314_v30  ;;  %v4221_v38 = vadd.f32 %v6856_v32, %v9396_v9  ;;  %v4138_v57 = vpop.f32.mrb[29].mxu1  ;;  %v4403_v1 = vld [vmem:[#allocation3 + $0x108] sm:$0xff] (%p1654_p4)  ;;  %v4404_v30 = vld [vmem:[#allocation3 + $0x110] sm:$0xff] (%p1654_p4) }
 0x5ca   : >> { %4344 = vst.msk [vmem:[#allocation3 + $0x1b0] sm:$0xff] %vm295_vm4, %v4312_v37  ;;  %v4219_v59 = vadd.f32 %v9396_v9, %v4138_v57  ;;  %v6857_v27 = vpop.f32.mrb[30].mxu1  ;;  %v4401_v37 = vld [vmem:[#allocation3 + $0xe8] sm:$0xff] (%p1654_p4)  ;;  %v4402_v32 = vld [vmem:[#allocation3 + $0xf0] sm:$0xff] (%p1654_p4) }
 0x5cb   : >> { %v4285_v52 = vmul.f32 0.1, %v4221_v38  ;;  %v4222_v13 = vadd.f32 %v6857_v27, %v9396_v9  ;;  %v4141_v43 = vpop.f32.mrb[31].mxu1  ;;  %7903 = vrot.lane.b32.xlu0 (%p1654_p4), %v7902_v49, %s8091_s12  ;;  %v7932_v38 = vpack.i.bf16 (%p1654_p4), %v4434_v26, %v4433_v2  ;;  %v8052_v57 = vld [vmem:[%s9942_s5 + $0x30] sm:$0xff] (%p1654_p4)   ;;  %v4411_v6 = vld [vmem:[#allocation3 + $0x188] sm:$0xff] (%p1654_p4) }
 0x5cc   : >> { %v4283_v17 = vmul.f32 0.1, %v4219_v59  ;;  %v4220_v45 = vadd.f32 %v9396_v9, %v4141_v43  ;;  %1656 = sbr.rel (!%p1654_p4) target bundleno = 474 (0x1da), region = 99  ;;  %v4391_v9 = vld [vmem:[#allocation3 + $0x48] sm:$0xff] (%p1654_p4)  ;;  %v4440_v27 = vld [vmem:[#allocation3 + $0x111] sm:$0xff] (%p1654_p4)  ;;  %6858 = vmatprep.subr.bf16.mxu1 (%p1654_p4), %v8052_v57 }
 0x5cd   : >> { %v4317_v50 = vadd.f32 %v4285_v52, %v4253_v39  ;;  %v4286_v12 = vmul.f32 0.1, %v4222_v13  ;;  %v7882_v0 = vpack.i.bf16 (%p1654_p4), %v4392_v47, %v4391_v9  ;;  %v9483_v39 = vld [vmem:[%s9942_s5] sm:$0xff] (%p1654_p4)   ;;  %v4439_v59 = vld [vmem:[#allocation3 + $0x109] sm:$0xff] (%p1654_p4)  ;;  %v8054_v52 = vld [vmem:[%s9942_s5 + $0x38] sm:$0xff] (%p1654_p4)   ;;  %6859 = vmatpush3.bf16.msra.mxu1 (%p1654_p4), %v8052_v57 }
 0x5ce   : >> { %v4315_v40 = vadd.f32 %v4283_v17, %v4251_v56  ;;  %v4284_v41 = vmul.f32 0.1, %v4220_v45  ;;  %v7947_v56 = vpack.i.bf16 (%p1654_p4), %v4404_v30, %v4403_v1  ;;  %v4437_v13 = vld [vmem:[#allocation3 + $0xe9] sm:$0xff] (%p1654_p4)  ;;  %6902 = vmatprep.subr.bf16.mxu0 (%p1654_p4), %v9483_v39  ;;  %v7942_v17 = vpack.i.bf16 (%p1654_p4), %v4402_v32, %v4401_v37  ;;  %6860 = vmatprep.subr.bf16.mxu1 (%p1654_p4), %v8054_v52  ;;  %v8056_v45 = vld [vmem:[%s9942_s5 + $0x40] sm:$0xff] (%p1654_p4)   ;;  %v9516_v47 = vld [vmem:[%s9942_s5 + $0x18] sm:$0xff] (%p1654_p4)  }
 0x5cf   : >> { %4349 = vst.msk [vmem:[#allocation3 + $0x208] sm:$0xff] %vm295_vm4, %v4317_v50  ;;  %v4318_v34 = vadd.f32 %v4286_v12, %v4254_v23  ;;  %7883 = vrot.lane.b32.xlu1 (%p1654_p4), %v7882_v0, %s8091_s12  ;;  %7913 = vrot.lane.b32.xlu0 (%p1654_p4), %v7912_v8, %s8092_s13  ;;  %v9493_v43 = vld [vmem:[%s9942_s5 + $0x8] sm:$0xff] (%p1654_p4)   ;;  %v4438_v23 = vld [vmem:[#allocation3 + $0xf1] sm:$0xff] (%p1654_p4) }
 0x5d0   : >> { %4347 = vst.msk [vmem:[#allocation3 + $0x1e8] sm:$0xff] %vm295_vm4, %v4315_v40  ;;  %v4316_v63 = vadd.f32 %v4284_v41, %v4252_v16  ;;  %6903 = vmatpush3.bf16.msra.mxu0 (%p1654_p4), %v9483_v39  ;;  %v4407_v50 = vld [vmem:[#allocation3 + $0x148] sm:$0xff] (%p1654_p4)  ;;  %v4408_v12 = vld [vmem:[#allocation3 + $0x150] sm:$0xff] (%p1654_p4)  ;;  %v7957_v40 = vpack.i.bf16 (%p1654_p4), %v4440_v27, %v4439_v59 }
 0x5d1   : >> { %4350 = vst.msk [vmem:[#allocation3 + $0x210] sm:$0xff] %vm295_vm4, %v4318_v34  ;;  %6904 = vmatprep.subr.bf16.mxu0 (%p1654_p4), %v9493_v43  ;;  %v9504_v16 = vld [vmem:[%s9942_s5 + $0x10] sm:$0xff] (%p1654_p4)   ;;  %v4405_v41 = vld [vmem:[#allocation3 + $0x128] sm:$0xff] (%p1654_p4)  ;;  %v7952_v34 = vpack.i.bf16 (%p1654_p4), %v4438_v23, %v4437_v13  ;;  %6861 = vmatpush3.bf16.msra.mxu1 (%p1654_p4), %v8054_v52  ;;  %v7967_v51 = vpack.i.bf16 (%p1654_p4), %v4408_v12, %v4407_v50 }
 0x5d2   : >> { %4348 = vst.msk [vmem:[#allocation3 + $0x1f0] sm:$0xff] %vm295_vm4, %v4316_v63  ;;  %v4406_v63 = vld [vmem:[#allocation3 + $0x130] sm:$0xff] (%p1654_p4)  ;;  %6862 = vmatprep.subr.bf16.mxu1 (%p1654_p4), %v8056_v45  ;;  %v8058_v9 = vld [vmem:[%s9942_s5 + $0x48] sm:$0xff] (%p1654_p4)  }
 0x5d3   : > { %7888 = vrot.lane.b32.xlu1 %v7887_v4, %s8092_s13  ;;  %7923 = vrot.lane.b32.xlu0 %v7922_v15, %s8091_s12  ;;  %v7962_v0 = vpack.i.bf16 %v4406_v63, %v4405_v41  ;;  %v4443_v53 = vld [vmem:[#allocation3 + $0x149] sm:$0xff]  ;;  %v4442_v61 = vld [vmem:[#allocation3 + $0x131] sm:$0xff] }
 0x5d4   : > { %6905 = vmatpush3.bf16.msra.mxu0 %v9493_v43  ;;  %v4441_v60 = vld [vmem:[#allocation3 + $0x129] sm:$0xff]  ;;  %v7977_v4 = vpack.i.bf16 %v4444_v55, %v4443_v53  ;;  %v4448_v29 = vld [vmem:[#allocation3 + $0x191] sm:$0xff]  ;;  %v5562_v55 = vld [vmem:[%s8224_s26 + $0x40] sm:$0xff] }
 0x5d5   : > { %6906 = vmatprep.subr.bf16.mxu0 %v9504_v16  ;;  %6863 = vmatpush3.bf16.msra.mxu1 %v8056_v45  ;;  %v8060_v62 = vld [vmem:[%s9942_s5 + $0x50] sm:$0xff]   ;;  %v7972_v31 = vpack.i.bf16 %v4442_v61, %v4441_v60  ;;  %v4409_v7 = vld [vmem:[#allocation3 + $0x168] sm:$0xff]  ;;  %v5557_v63 = vld [vmem:[%s8224_s26 + $0x18] sm:$0xff] }
 0x5d6   : > { %6864 = vmatprep.subr.bf16.mxu1 %v8058_v9  ;;  %v4412_v19 = vld [vmem:[#allocation3 + $0x190] sm:$0xff]  ;;  %v9540_v24 = vld [vmem:[%s9942_s5 + $0x28] sm:$0xff]   ;;  %v5561_v53 = vld [vmem:[%s8224_s26 + $0x38] sm:$0xff] }
 0x5d7   : > { %7898 = vrot.lane.b32.xlu1 %v7897_v5, %s8092_s13  ;;  %7933 = vrot.lane.b32.xlu0 %v7932_v38, %s8092_s13  ;;  %v4410_v48 = vld [vmem:[#allocation3 + $0x170] sm:$0xff]  ;;  %v8062_v5 = vld [vmem:[%s9942_s5 + $0x58] sm:$0xff]   ;;  %v7987_v58 = vpack.i.bf16 %v4412_v19, %v4411_v6  ;;  %v4415_v25 = vld [vmem:[#allocation3 + $0x1c8] sm:$0xff] }
 0x5d8   : > { %6907 = vmatpush3.bf16.msra.mxu0 %v9504_v16  ;;  %v7982_v22 = vpack.i.bf16 %v4410_v48, %v4409_v7  ;;  %v4447_v28 = vld [vmem:[#allocation3 + $0x189] sm:$0xff]  ;;  %v4446_v49 = vld [vmem:[#allocation3 + $0x171] sm:$0xff] }
 0x5d9   : > { %6908 = vmatprep.subr.bf16.mxu0 %v9516_v47  ;;  %6865 = vmatpush3.bf16.msra.mxu1 %v8058_v9  ;;  %v7997_v21 = vpack.i.bf16 %v4448_v29, %v4447_v28  ;;  %v4413_v8 = vld [vmem:[#allocation3 + $0x1a8] sm:$0xff]  ;;  %v4414_v10 = vld [vmem:[#allocation3 + $0x1b0] sm:$0xff]  ;;  %v5558_v9 = vld [vmem:[%s8224_s26 + $0x20] sm:$0xff] }
 0x5da   : > { %6866 = vmatprep.subr.bf16.mxu1 %v8060_v62  ;;  %v8002_v46 = vpack.i.bf16 %v4414_v10, %v4413_v8  ;;  %v4451_v11 = vld [vmem:[#allocation3 + $0x1c9] sm:$0xff]  ;;  %v4450_v18 = vld [vmem:[#allocation3 + $0x1b1] sm:$0xff]  ;;  %v5570_v10 = vld [vmem:[%s8224_s26 + $0x80] sm:$0xff] }
 0x5db   : > { %7908 = vrot.lane.b32.xlu1 %v7907_v54, %s8091_s12  ;;  %7943 = vrot.lane.b32.xlu0 %v7942_v17, %s8091_s12  ;;  %v4445_v54 = vld [vmem:[#allocation3 + $0x169] sm:$0xff]  ;;  %v4456_v57 = vld [vmem:[#allocation3 + $0x211] sm:$0xff] }
 0x5dc   : > { %6909 = vmatpush3.bf16.msra.mxu0 %v9516_v47  ;;  %v7992_v42 = vpack.i.bf16 %v4446_v49, %v4445_v54  ;;  %v4449_v15 = vld [vmem:[#allocation3 + $0x1a9] sm:$0xff]  ;;  %v4454_v27 = vld [vmem:[#allocation3 + $0x1f1] sm:$0xff] }
 0x5dd   : > { %6910 = vmatprep.subr.bf16.mxu0 %v9528_v3  ;;  %6867 = vmatpush3.bf16.msra.mxu1 %v8060_v62  ;;  %v8012_v2 = vpack.i.bf16 %v4450_v18, %v4449_v15  ;;  %v4419_v26 = vld [vmem:[#allocation3 + $0x208] sm:$0xff]  ;;  %v4420_v1 = vld [vmem:[#allocation3 + $0x210] sm:$0xff]  ;;  %v5565_v62 = vld [vmem:[%s8224_s26 + $0x58] sm:$0xff] }
 0x5de   : > { %6868 = vmatprep.subr.bf16.mxu1 %v8062_v5  ;;  %v4418_v30 = vld [vmem:[#allocation3 + $0x1f0] sm:$0xff]  ;;  %v8027_v37 = vpack.i.bf16 %v4420_v1, %v4419_v26  ;;  %v4421_v23 = vld [vmem:[#allocation3 + $0x228] sm:$0xff] }
 0x5df   : > { %7918 = vrot.lane.b32.xlu1 %v7917_v44, %s8092_s13  ;;  %7953 = vrot.lane.b32.xlu0 %v7952_v34, %s8092_s13  ;;  %v4416_v44 = vld [vmem:[#allocation3 + $0x1d0] sm:$0xff]  ;;  %v5555_v41 = vld [vmem:[%s8224_s26 + $0x8] sm:$0xff] }
 0x5e0   : > { %6911 = vmatpush3.bf16.msra.mxu0 %v9528_v3  ;;  %v8007_v36 = vpack.i.bf16 %v4416_v44, %v4415_v25  ;;  %v4455_v38 = vld [vmem:[#allocation3 + $0x209] sm:$0xff]  ;;  %v4458_v17 = vld [vmem:[#allocation3 + $0x231] sm:$0xff] }
 0x5e1   : > { %6912 = vmatprep.subr.bf16.mxu0 %v9540_v24  ;;  %6869 = vmatpush3.bf16.msra.mxu1 %v8062_v5  ;;  %v4453_v59 = vld [vmem:[#allocation3 + $0x1e9] sm:$0xff]  ;;  %v8037_v52 = vpack.i.bf16 %v4456_v57, %v4455_v38 }
 0x5e2   : > { %7186 = vmatprep.subr.bf16.mxu1 %v9483_v39  ;;  %v4457_v13 = vld [vmem:[#allocation3 + $0x229] sm:$0xff] }
 0x5e3   : > { %7928 = vrot.lane.b32.xlu1 %v7927_v14, %s8091_s12  ;;  %7963 = vrot.lane.b32.xlu0 %v7962_v0, %s8091_s12  ;;  %v4452_v14 = vld [vmem:[#allocation3 + $0x1d1] sm:$0xff]  ;;  %v8047_v50 = vpack.i.bf16 %v4458_v17, %v4457_v13  ;;  %v5563_v60 = vld [vmem:[%s8224_s26 + $0x48] sm:$0xff] }
 0x5e4   : > { %6913 = vmatpush3.bf16.msra.mxu0 %v9540_v24  ;;  %v8017_v20 = vpack.i.bf16 %v4452_v14, %v4451_v11  ;;  %v4422_v45 = vld [vmem:[#allocation3 + $0x230] sm:$0xff]  ;;  %v4353_v1 = vld [vmem:[#allocation3 + $0x27] sm:$0xff] }
 0x5e5   : > { %6946 = vmatprep.subr.bf16.mxu0 %v9549_v33  ;;  %v8042_v12 = vpack.i.bf16 %v4422_v45, %v4421_v23  ;;  %v5556_v34 = vld [vmem:[%s8224_s26 + $0x10] sm:$0xff] }
 0x5e6   : > { %v5560_v0 = vld [vmem:[%s8224_s26 + $0x30] sm:$0xff] }
 0x5e7   : > { %7938 = vrot.lane.b32.xlu1 %v7937_v35, %s8092_s13  ;;  %7973 = vrot.lane.b32.xlu0 %v7972_v31, %s8092_s13  ;;  %v4417_v35 = vld [vmem:[#allocation3 + $0x1e8] sm:$0xff]  ;;  %v5564_v61 = vld [vmem:[%s8224_s26 + $0x50] sm:$0xff] }
 0x5e8   : > { %v8022_v32 = vpack.i.bf16 %v4418_v30, %v4417_v35  ;;  %v5567_v31 = vld [vmem:[%s8224_s26 + $0x68] sm:$0xff]  ;;  %v5568_v5 = vld [vmem:[%s8224_s26 + $0x70] sm:$0xff] }
 0x5e9   : > { %v4352_v28 = vld [vmem:[#allocation3 + $0xf] sm:$0xff] }
 0x5ea   : > { %v4356_v11 = vld [vmem:[#allocation3 + $0x4f] sm:$0xff] }
 0x5eb   : > { %7948 = vrot.lane.b32.xlu1 %v7947_v56, %s8091_s12  ;;  %7983 = vrot.lane.b32.xlu0 %v7982_v22, %s8091_s12  ;;  %v8032_v56 = vpack.i.bf16 %v4454_v27, %v4453_v59  ;;  %v4351_v22 = vld [vmem:[#allocation3 + $0x7] sm:$0xff]  ;;  %v4354_v35 = vld [vmem:[#allocation3 + $0x2f] sm:$0xff] }
 0x5ef   : > { %7958 = vrot.lane.b32.xlu1 %v7957_v40, %s8092_s13  ;;  %7993 = vrot.lane.b32.xlu0 %v7992_v42, %s8092_s13  ;;  %v5554_v40 = vld [vmem:[%s8224_s26] sm:$0xff] }
 0x5f3   : > { %7968 = vrot.lane.b32.xlu1 %v7967_v51, %s8091_s12  ;;  %8003 = vrot.lane.b32.xlu0 %v8002_v46, %s8091_s12  ;;  %v5559_v51 = vld [vmem:[%s8224_s26 + $0x28] sm:$0xff] }
 0x5f4   : > { %v4355_v46 = vld [vmem:[#allocation3 + $0x47] sm:$0xff] }
 0x5f7   : > { %7978 = vrot.lane.b32.xlu1 %v7977_v4, %s8092_s13  ;;  %8013 = vrot.lane.b32.xlu0 %v8012_v2, %s8092_s13  ;;  %v5566_v4 = vld [vmem:[%s8224_s26 + $0x60] sm:$0xff] }
 0x5fb   : > { %7988 = vrot.lane.b32.xlu1 %v7987_v58, %s8091_s12  ;;  %8023 = vrot.lane.b32.xlu0 %v8022_v32, %s8091_s12  ;;  %v5569_v58 = vld [vmem:[%s8224_s26 + $0x78] sm:$0xff] }
 0x5ff   : > { %7998 = vrot.lane.b32.xlu1 %v7997_v21, %s8092_s13  ;;  %8033 = vrot.lane.b32.xlu0 %v8032_v56, %s8092_s13  ;;  %v5573_v56 = vld [vmem:[%s8224_s26 + $0x98] sm:$0xff] }
 0x603   : > { %8008 = vrot.lane.b32.xlu1 %v8007_v36, %s8091_s12  ;;  %8043 = vrot.lane.b32.xlu0 %v8042_v12, %s8091_s12  ;;  %v5571_v36 = vld [vmem:[%s8224_s26 + $0x88] sm:$0xff] }
 0x607   : > { %8018 = vrot.lane.b32.xlu1 %v8017_v20, %s8092_s13  ;;  %5618 = vrot.lane.b32.xlu0 %v5554_v40, %s8093_s22 }
 0x60b   : > { %8028 = vrot.lane.b32.xlu1 %v8027_v37, %s8091_s12  ;;  %5622 = vrot.lane.b32.xlu0 %v5556_v34, %s8093_s22 }
 0x60f   : > { %8038 = vrot.lane.b32.xlu1 %v8037_v52, %s8092_s13  ;;  %5626 = vrot.lane.b32.xlu0 %v5558_v9, %s8093_s22  ;;  %v5572_v52 = vld [vmem:[%s8224_s26 + $0x90] sm:$0xff] }
 0x613   : > { %8048 = vrot.lane.b32.xlu1 %v8047_v50, %s8092_s13  ;;  %5630 = vrot.lane.b32.xlu0 %v5560_v0, %s8093_s22  ;;  %v4359_v0 = vld [vmem:[#allocation3 + $0x87] sm:$0xff] }
 0x617   : > { %5620 = vrot.lane.b32.xlu1 %v5555_v41, %s8093_s22  ;;  %5634 = vrot.lane.b32.xlu0 %v5562_v55, %s8093_s22  ;;  %v8065_v55 = vld [vmem:[%s9942_s5 + $0x68] sm:$0xff]  }
 0x61b   : > { %5624 = vrot.lane.b32.xlu1 %v5557_v63, %s8093_s22  ;;  %5638 = vrot.lane.b32.xlu0 %v5564_v61, %s8093_s22 }
 0x61f   : > { %5628 = vrot.lane.b32.xlu1 %v5559_v51, %s8093_s22  ;;  %5642 = vrot.lane.b32.xlu0 %v5566_v4, %s8093_s22  ;;  %v4358_v4 = vld [vmem:[#allocation3 + $0x6f] sm:$0xff] }
 0x623   : > { %5632 = vrot.lane.b32.xlu1 %v5561_v53, %s8093_s22  ;;  %5646 = vrot.lane.b32.xlu0 %v5568_v5, %s8093_s22 }
 0x627   : > { %5636 = vrot.lane.b32.xlu1 %v5563_v60, %s8093_s22  ;;  %5650 = vrot.lane.b32.xlu0 %v5570_v10, %s8093_s22  ;;  %v4360_v60 = vld [vmem:[#allocation3 + $0x8f] sm:$0xff] }
 0x62b   : > { %5640 = vrot.lane.b32.xlu1 %v5565_v62, %s8093_s22  ;;  %5654 = vrot.lane.b32.xlu0 %v5572_v52, %s8093_s22  ;;  %v4357_v62 = vld [vmem:[#allocation3 + $0x67] sm:$0xff] }
 0x62f   : > { %5644 = vrot.lane.b32.xlu1 %v5567_v31, %s8093_s22 }
 0x631   : > { %v7874_v19 = vpop.permute.xlu0 %7873 }
 0x632   : > { %v7876_v7 = vunpack.i.h.bf16 %v7874_v19  ;;  %v7875_v48 = vunpack.i.l.bf16 %v7874_v19  ;;  %v5575_v19 = vld [vmem:[%s8224_s26 + $0xa8] sm:$0xff] }
 0x633   : > { %5648 = vrot.lane.b32.xlu1 %v5569_v58, %s8093_s22 }
 0x634   : > { %v4747_v44 = vsel %vm295_vm4, %v4351_v22, %v7875_v48  ;;  %v4748_v8 = vsel %vm295_vm4, %v4352_v28, %v7876_v7 }
 0x635   : > { %v7879_v21 = vpop.permute.xlu0 %7878 }
 0x636   : > { %v7881_v14 = vunpack.i.h.bf16 %v7879_v21  ;;  %v7880_v15 = vunpack.i.l.bf16 %v7879_v21 }
 0x637   : > { %5652 = vrot.lane.b32.xlu1 %v5571_v36, %s8093_s22 }
 0x638   : > { %v4749_v23 = vsel %vm295_vm4, %v4353_v1, %v7880_v15  ;;  %v4750_v45 = vsel %vm295_vm4, %v4354_v35, %v7881_v14  ;;  %v4363_v14 = vld [vmem:[#allocation3 + $0xc7] sm:$0xff]  ;;  %v5576_v35 = vld [vmem:[%s8224_s26 + $0xb0] sm:$0xff] }
 0x639   : > { %v7894_v32 = vpop.permute.xlu0 %7893 }
 0x63a   : > { %v7896_v59 = vunpack.i.h.bf16 %v7894_v32  ;;  %v7895_v27 = vunpack.i.l.bf16 %v7894_v32 }
 0x63b   : > { %5656 = vrot.lane.b32.xlu1 %v5573_v56, %s8093_s22 }
 0x63c   : > { %v4786_v12 = vsel %vm2093_vm5, %v4749_v23, %v7895_v27  ;;  %v4787_v40 = vsel %vm2093_vm5, %v4750_v45, %v7896_v59 }
 0x63d   : > { %v7904_v63 = vpop.permute.xlu0 %7903  ;;  %v4821_v9 = vpack.c.bf16 %v4787_v40, %v4786_v12 }
 0x63e   : > { %v7905_v53 = vunpack.i.l.bf16 %v7904_v63  ;;  %v7906_v61 = vunpack.i.h.bf16 %v7904_v63 }
 0x63f   : > { %6870 = vmatprep.mubr.msk.bf16.mxu1 %vm2214_vm6, %v4821_v9  ;;  %5660 = vrot.lane.b32.xlu1 %v5575_v19, %s8093_s22 }
 0x640   : > { %v4753_v28 = vsel %vm295_vm4, %v4357_v62, %v7905_v53  ;;  %v4365_v62 = vld [vmem:[#allocation3 + $0xe7] sm:$0xff] }
 0x641   : > { %v7884_v6 = vpop.permute.xlu1 %7883  ;;  %v7914_v58 = vpop.permute.xlu0 %7913 }
 0x642   : > { %v7886_v25 = vunpack.i.h.bf16 %v7884_v6  ;;  %v7885_v42 = vunpack.i.l.bf16 %v7884_v6  ;;  %v5574_v6 = vld [vmem:[%s8224_s26 + $0xa0] sm:$0xff] }
 0x643   : > { %5658 = vrot.lane.b32.xlu0 %v5574_v6, %s8093_s22  ;;  %v5579_v6 = vld [vmem:[%s8224_s26 + $0xc8] sm:$0xff] }
 0x644   : > { %v4751_v38 = vsel %vm295_vm4, %v4355_v46, %v7885_v42  ;;  %v4752_v57 = vsel %vm295_vm4, %v4356_v11, %v7886_v25 }
 0x645   : > { %v7889_v29 = vpop.permute.xlu1 %7888  ;;  %v7924_v36 = vpop.permute.xlu0 %7923 }
 0x646   : > { %v7891_v54 = vunpack.i.h.bf16 %v7889_v29  ;;  %v7890_v49 = vunpack.i.l.bf16 %v7889_v29  ;;  %v7916_v29 = vunpack.i.h.bf16 %v7914_v58  ;;  %v7925_v15 = vunpack.i.l.bf16 %v7924_v36 }
 0x647   : > { %5662 = vrot.lane.b32.xlu0 %v5576_v35, %s8093_s22 }
 0x648   : > { %v4784_v18 = vsel %vm2093_vm5, %v4747_v44, %v7890_v49  ;;  %v4785_v20 = vsel %vm2093_vm5, %v4748_v8, %v7891_v54  ;;  %v7915_v54 = vunpack.i.l.bf16 %v7914_v58  ;;  %v8066_v49 = vld [vmem:[%s9942_s5 + $0x70] sm:$0xff]  }
 0x649   : > { %v7899_v2 = vpop.permute.xlu1 %7898  ;;  %v4820_v26 = vpack.c.bf16 %v4785_v20, %v4784_v18  ;;  %v8067_v18 = vld [vmem:[%s9942_s5 + $0x78] sm:$0xff]   ;;  %v4364_v20 = vld [vmem:[#allocation3 + $0xcf] sm:$0xff] }
 0x64a   : > { %v7901_v30 = vunpack.i.h.bf16 %v7899_v2  ;;  %v7900_v37 = vunpack.i.l.bf16 %v7899_v2  ;;  %v4790_v25 = vsel %vm2093_vm5, %v4753_v28, %v7915_v54  ;;  %v7926_v2 = vunpack.i.h.bf16 %v7924_v36 }
 0x64b   : > { %6914 = vmatprep.mubr.msk.bf16.mxu0 %vm2214_vm6, %v4820_v26  ;;  %v4361_v26 = vld [vmem:[#allocation3 + $0xa7] sm:$0xff] }
 0x64c   : > { %v4788_v13 = vsel %vm2093_vm5, %v4751_v38, %v7900_v37  ;;  %v4789_v17 = vsel %vm2093_vm5, %v4752_v57, %v7901_v30  ;;  %6915 = vmatmul.mubr.msk.bf16.vlgmr.msra.gmra.mrb[0].mxu0 %vm2214_vm6, %v4821_v9  ;;  %v5577_v30 = vld [vmem:[%s8224_s26 + $0xb8] sm:$0xff]  ;;  %v7934_v57 = vpop.permute.xlu0 %7933  ;;  %v4757_v27 = vsel %vm295_vm4, %v4361_v26, %v7925_v15  ;;  %v4371_v15 = vld [vmem:[#allocation3 + $0x147] sm:$0xff] }
 0x64d   : > { %v7909_v50 = vpop.permute.xlu1 %7908  ;;  %v9619_v41 = vpack.c.bf16 %v4789_v17, %v4788_v13  ;;  %6947 = vmatpush3.bf16.msra.mxu0 %v9549_v33  ;;  %v7936_v52 = vunpack.i.h.bf16 %v7934_v57  ;;  %v7935_v56 = vunpack.i.l.bf16 %v7934_v57  ;;  %v8068_v13 = vld [vmem:[%s9942_s5 + $0x80] sm:$0xff]   ;;  %5664 = vrot.lane.b32.xlu1 %v5577_v30, %s8093_s22 }
 0x64e   : > { %v7910_v34 = vunpack.i.l.bf16 %v7909_v50  ;;  %v7911_v51 = vunpack.i.h.bf16 %v7909_v50  ;;  %6948 = vmatprep.subr.bf16.mxu0 %v8065_v55  ;;  %v4369_v26 = vld [vmem:[#allocation3 + $0x127] sm:$0xff] }
 0x64f   : > { %6871 = vmatmul.mubr.msk.bf16.vlgmr.msra.gmra.mrb[0].mxu1 %vm2214_vm6, %v9619_v41  ;;  %6918 = vmatprep.mubr.msk.bf16.mxu0 %vm2214_vm6, %v9619_v41 }
 0x650   : > { %v4755_v7 = vsel %vm295_vm4, %v4359_v0, %v7910_v34  ;;  %7192 = vmatpush3.bf16.msra.mxu1 %v9483_v39  ;;  %v4756_v22 = vsel %vm295_vm4, %v4360_v60, %v7911_v51  ;;  %v4754_v39 = vsel %vm295_vm4, %v4358_v4, %v7906_v61  ;;  %v7944_v63 = vpop.permute.xlu0 %7943  ;;  %v4367_v0 = vld [vmem:[#allocation3 + $0x107] sm:$0xff]  ;;  %v4368_v60 = vld [vmem:[#allocation3 + $0x10f] sm:$0xff] }
 0x651   : > { %v7919_v31 = vpop.permute.xlu1 %7918  ;;  %7187 = vmatprep.subr.bf16.mxu1 %v9493_v43  ;;  %v4791_v42 = vsel %vm2093_vm5, %v4754_v39, %v7916_v29  ;;  %6949 = vmatpush3.bf16.msra.mxu0 %v8065_v55  ;;  %v7945_v53 = vunpack.i.l.bf16 %v7944_v63  ;;  %v8069_v55 = vld [vmem:[%s9942_s5 + $0x88] sm:$0xff]   ;;  %v7946_v61 = vunpack.i.h.bf16 %v7944_v63 }
 0x652   : > { %v7921_v48 = vunpack.i.h.bf16 %v7919_v31  ;;  %v7920_v5 = vunpack.i.l.bf16 %v7919_v31  ;;  %v9652_v46 = vpack.c.bf16 %v4791_v42, %v4790_v25  ;;  %6950 = vmatprep.subr.bf16.mxu0 %v8066_v49  ;;  %v5578_v31 = vld [vmem:[%s8224_s26 + $0xc0] sm:$0xff]  ;;  %5668 = vrot.lane.b32.xlu1 %v5579_v6, %s8093_s22 }
 0x653   : > { %5666 = vrot.lane.b32.xlu0 %v5578_v31, %s8093_s22 }
 0x654   : > { %v4792_v33 = vsel %vm2093_vm5, %v4755_v7, %v7920_v5  ;;  %v4793_v21 = vsel %vm2093_vm5, %v4756_v22, %v7921_v48  ;;  %7193 = vmatpush3.bf16.msra.mxu1 %v9493_v43  ;;  %6874 = vmatprep.mubr.msk.bf16.mxu1 %vm2214_vm6, %v9652_v46  ;;  %v4362_v43 = vld [vmem:[#allocation3 + $0xaf] sm:$0xff]  ;;  %v7954_v5 = vpop.permute.xlu0 %7953  ;;  %v4761_v22 = vsel %vm295_vm4, %v4365_v62, %v7945_v53  ;;  %v4375_v53 = vld [vmem:[#allocation3 + $0x187] sm:$0xff] }
 0x655   : > { %v7929_v44 = vpop.permute.xlu1 %7928  ;;  %v9650_v8 = vpack.c.bf16 %v4793_v21, %v4792_v33  ;;  %7188 = vmatprep.subr.bf16.mxu1 %v9504_v16  ;;  %6919 = vmatmul.mubr.msk.bf16.gmra.mrb[4].mxu0 %vm2214_vm6, %v9652_v46  ;;  %v4758_v17 = vsel %vm295_vm4, %v4362_v43, %v7926_v2  ;;  %v7956_v28 = vunpack.i.h.bf16 %v7954_v5  ;;  %v7955_v29 = vunpack.i.l.bf16 %v7954_v5  ;;  %v4370_v43 = vld [vmem:[#allocation3 + $0x12f] sm:$0xff]  ;;  %v4373_v62 = vld [vmem:[#allocation3 + $0x167] sm:$0xff] }
 0x656   : > { %v7930_v10 = vunpack.i.l.bf16 %v7929_v44  ;;  %v7931_v11 = vunpack.i.h.bf16 %v7929_v44  ;;  %6951 = vmatpush3.bf16.msra.mxu0 %v8066_v49  ;;  %v4795_v50 = vsel %vm2093_vm5, %v4758_v17, %v7936_v52 }
 0x657   : > { %6875 = vmatmul.mubr.msk.bf16.gmra.mrb[4].mxu1 %vm2214_vm6, %v9650_v8  ;;  %6922 = vmatprep.mubr.msk.bf16.mxu0 %vm2214_vm6, %v9650_v8 }
 0x658   : > { %v4759_v37 = vsel %vm295_vm4, %v4363_v14, %v7930_v10  ;;  %7194 = vmatpush3.bf16.msra.mxu1 %v9504_v16  ;;  %v4760_v59 = vsel %vm295_vm4, %v4364_v20, %v7931_v11  ;;  %6952 = vmatprep.subr.bf16.mxu0 %v8067_v18  ;;  %v4794_v16 = vsel %vm2093_vm5, %v4757_v27, %v7935_v56  ;;  %v7964_v42 = vpop.permute.xlu0 %7963  ;;  %v5580_v11 = vld [vmem:[%s8224_s26 + $0xd0] sm:$0xff]  ;;  %v5581_v14 = vld [vmem:[%s8224_s26 + $0xd8] sm:$0xff]  ;;  %v5583_v27 = vld [vmem:[%s8224_s26 + $0xe8] sm:$0xff] }
 0x659   : > { %v7939_v1 = vpop.permute.xlu1 %7938  ;;  %7189 = vmatprep.subr.bf16.mxu1 %v9516_v47  ;;  %v9686_v9 = vpack.c.bf16 %v4795_v50, %v4794_v16  ;;  %v7966_v20 = vunpack.i.h.bf16 %v7964_v42  ;;  %v7965_v2 = vunpack.i.l.bf16 %v7964_v42  ;;  %5670 = vrot.lane.b32.xlu0 %v5580_v11, %s8093_s22 }
 0x65a   : > { %v7941_v32 = vunpack.i.h.bf16 %v7939_v1  ;;  %v7940_v38 = vunpack.i.l.bf16 %v7939_v1  ;;  %6953 = vmatpush3.bf16.msra.mxu0 %v8067_v18  ;;  %v4372_v18 = vld [vmem:[#allocation3 + $0x14f] sm:$0xff]  ;;  %5672 = vrot.lane.b32.xlu1 %v5581_v14, %s8093_s22 }
 0x65b   : > { %6954 = vmatprep.subr.bf16.mxu0 %v8068_v13  ;;  %6878 = vmatprep.mubr.msk.bf16.mxu1 %vm2214_vm6, %v9686_v9  ;;  %v4766_v52 = vsel %vm295_vm4, %v4370_v43, %v7966_v20 }
 0x65c   : > { %v4796_v23 = vsel %vm2093_vm5, %v4759_v37, %v7940_v38  ;;  %v4797_v45 = vsel %vm2093_vm5, %v4760_v59, %v7941_v32  ;;  %7195 = vmatpush3.bf16.msra.mxu1 %v9516_v47  ;;  %v4366_v47 = vld [vmem:[#allocation3 + $0xef] sm:$0xff]  ;;  %v7974_v30 = vpop.permute.xlu0 %7973  ;;  %v5582_v59 = vld [vmem:[%s8224_s26 + $0xe0] sm:$0xff] }
 0x65d   : > { %v7949_v12 = vpop.permute.xlu1 %7948  ;;  %v9684_v40 = vpack.c.bf16 %v4797_v45, %v4796_v23  ;;  %7190 = vmatprep.subr.bf16.mxu1 %v9528_v3  ;;  %6923 = vmatmul.mubr.msk.bf16.gmra.mrb[8].mxu0 %vm2214_vm6, %v9686_v9  ;;  %v4762_v54 = vsel %vm295_vm4, %v4366_v47, %v7946_v61  ;;  %v7976_v38 = vunpack.i.h.bf16 %v7974_v30  ;;  %v7975_v57 = vunpack.i.l.bf16 %v7974_v30  ;;  %v4374_v47 = vld [vmem:[#allocation3 + $0x16f] sm:$0xff] }
 0x65e   : > { %v7950_v34 = vunpack.i.l.bf16 %v7949_v12  ;;  %v7951_v51 = vunpack.i.h.bf16 %v7949_v12  ;;  %6955 = vmatpush3.bf16.msra.mxu0 %v8068_v13  ;;  %v4799_v33 = vsel %vm2093_vm5, %v4762_v54, %v7956_v28  ;;  %5674 = vrot.lane.b32.xlu0 %v5582_v59, %s8093_s22 }
 0x65f   : > { %6879 = vmatmul.mubr.msk.bf16.gmra.mrb[8].mxu1 %vm2214_vm6, %v9684_v40  ;;  %6926 = vmatprep.mubr.msk.bf16.mxu0 %vm2214_vm6, %v9684_v40  ;;  %v4803_v23 = vsel %vm2093_vm5, %v4766_v52, %v7976_v38 }
 0x660   : > { %v4763_v19 = vsel %vm295_vm4, %v4367_v0, %v7950_v34  ;;  %7196 = vmatpush3.bf16.msra.mxu1 %v9528_v3  ;;  %v4764_v58 = vsel %vm295_vm4, %v4368_v60, %v7951_v51  ;;  %6956 = vmatprep.subr.bf16.mxu0 %v8069_v55  ;;  %v4798_v3 = vsel %vm2093_vm5, %v4761_v22, %v7955_v29  ;;  %v7984_v50 = vpop.permute.xlu0 %7983  ;;  %v5584_v51 = vld [vmem:[%s8224_s26 + $0xf0] sm:$0xff]  ;;  %v5585_v0 = vld [vmem:[%s8224_s26 + $0xf8] sm:$0xff] }
 0x661   : > { %v7959_v4 = vpop.permute.xlu1 %7958  ;;  %7191 = vmatprep.subr.bf16.mxu1 %v9540_v24  ;;  %v9717_v44 = vpack.c.bf16 %v4799_v33, %v4798_v3  ;;  %5676 = vrot.lane.b32.xlu1 %v5583_v27, %s8093_s22  ;;  %v7986_v60 = vunpack.i.h.bf16 %v7984_v50  ;;  %v7985_v61 = vunpack.i.l.bf16 %v7984_v50 }
 0x662   : > { %v7961_v7 = vunpack.i.h.bf16 %v7959_v4  ;;  %v7960_v48 = vunpack.i.l.bf16 %v7959_v4  ;;  %6957 = vmatpush3.bf16.msra.mxu0 %v8069_v55  ;;  %v4376_v55 = vld [vmem:[#allocation3 + $0x18f] sm:$0xff]  ;;  %5678 = vrot.lane.b32.xlu0 %v5584_v51, %s8093_s22 }
 0x663   : > { %6882 = vmatprep.mubr.msk.bf16.mxu1 %vm2214_vm6, %v9717_v44  ;;  %v4770_v22 = vsel %vm295_vm4, %v4374_v47, %v7986_v60 }
 0x664   : > { %v4800_v49 = vsel %vm2093_vm5, %v4763_v19, %v7960_v48  ;;  %v4801_v39 = vsel %vm2093_vm5, %v4764_v58, %v7961_v7  ;;  %7197 = vmatpush3.bf16.msra.mxu1 %v9540_v24  ;;  %v7994_v19 = vpop.permute.xlu0 %7993  ;;  %v4769_v58 = vsel %vm295_vm4, %v4373_v62, %v7985_v61 }
 0x665   : > { %v7969_v21 = vpop.permute.xlu1 %7968  ;;  %v9715_v25 = vpack.c.bf16 %v4801_v39, %v4800_v49  ;;  %6927 = vmatmul.mubr.msk.bf16.gmra.mrb[12].mxu0 %vm2214_vm6, %v9717_v44  ;;  %5680 = vrot.lane.b32.xlu1 %v5585_v0, %s8093_s22  ;;  %v7996_v48 = vunpack.i.h.bf16 %v7994_v19  ;;  %v7995_v5 = vunpack.i.l.bf16 %v7994_v19 }
 0x666   : > { %v7971_v10 = vunpack.i.h.bf16 %v7969_v21  ;;  %v7970_v36 = vunpack.i.l.bf16 %v7969_v21  ;;  %6958 = vmatprep.mubr.msk.bf16.mxu0 %vm2214_vm6, %v9619_v41  ;;  %v4765_v41 = vsel %vm295_vm4, %v4369_v26, %v7965_v2 }
 0x667   : > { %6883 = vmatmul.mubr.msk.bf16.gmra.mrb[12].mxu1 %vm2214_vm6, %v9715_v25  ;;  %v4802_v17 = vsel %vm2093_vm5, %v4765_v41, %v7975_v57  ;;  %v4806_v29 = vsel %vm2093_vm5, %v4769_v58, %v7995_v5  ;;  %v4807_v54 = vsel %vm2093_vm5, %v4770_v22, %v7996_v48  ;;  %v4385_v22 = vld [vmem:[#allocation3 + $0x227] sm:$0xff] }
 0x668   : > { %v4767_v37 = vsel %vm295_vm4, %v4371_v15, %v7970_v36  ;;  %v4768_v32 = vsel %vm295_vm4, %v4372_v18, %v7971_v10  ;;  %v9744_v12 = vpack.c.bf16 %v4803_v23, %v4802_v17  ;;  %v8004_v3 = vpop.permute.xlu0 %8003  ;;  %v9770_v33 = vpack.c.bf16 %v4807_v54, %v4806_v29  ;;  %v4379_v10 = vld [vmem:[#allocation3 + $0x1c7] sm:$0xff]  ;;  %v4380_v36 = vld [vmem:[#allocation3 + $0x1cf] sm:$0xff] }
 0x669   : > { %v7979_v24 = vpop.permute.xlu1 %7978  ;;  %v8006_v11 = vunpack.i.h.bf16 %v8004_v3  ;;  %v8005_v14 = vunpack.i.l.bf16 %v8004_v3  ;;  %v4377_v15 = vld [vmem:[#allocation3 + $0x1a7] sm:$0xff]  ;;  %v4378_v18 = vld [vmem:[#allocation3 + $0x1af] sm:$0xff] }
 0x66a   : > { %v7981_v1 = vunpack.i.h.bf16 %v7979_v24  ;;  %v7980_v35 = vunpack.i.l.bf16 %v7979_v24  ;;  %6886 = vmatprep.mubr.msk.bf16.mxu1 %vm2214_vm6, %v9744_v12  ;;  %v4383_v17 = vld [vmem:[#allocation3 + $0x207] sm:$0xff]  ;;  %v4384_v23 = vld [vmem:[#allocation3 + $0x20f] sm:$0xff] }
 0x66c   : > { %v4804_v56 = vsel %vm2093_vm5, %v4767_v37, %v7980_v35  ;;  %v4805_v13 = vsel %vm2093_vm5, %v4768_v32, %v7981_v1  ;;  %v8014_v43 = vpop.permute.xlu0 %8013  ;;  %v4774_v37 = vsel %vm295_vm4, %v4378_v18, %v8006_v11 }
 0x66d   : > { %v7989_v45 = vpop.permute.xlu1 %7988  ;;  %v9742_v16 = vpack.c.bf16 %v4805_v13, %v4804_v56  ;;  %6959 = vmatmul.mubr.msk.bf16.vlgmr.msra.gmra.mrb[0].mxu0 %vm2214_vm6, %v9652_v46  ;;  %v8016_v35 = vunpack.i.h.bf16 %v8014_v43  ;;  %v8015_v30 = vunpack.i.l.bf16 %v8014_v43 }
 0x66e   : > { %v7991_v34 = vunpack.i.h.bf16 %v7989_v45  ;;  %v7990_v63 = vunpack.i.l.bf16 %v7989_v45  ;;  %6962 = vmatprep.mubr.msk.bf16.mxu0 %vm2214_vm6, %v9650_v8 }
 0x66f   : > { %6887 = vmatmul.mubr.msk.bf16.gmra.mrb[16].mxu1 %vm2214_vm6, %v9742_v16  ;;  %v4811_v57 = vsel %vm2093_vm5, %v4774_v37, %v8016_v35 }
 0x670   : > { %v4771_v7 = vsel %vm295_vm4, %v4375_v53, %v7990_v63  ;;  %v4772_v46 = vsel %vm295_vm4, %v4376_v55, %v7991_v34  ;;  %6890 = vmatprep.mubr.msk.bf16.mxu1 %vm2214_vm6, %v9770_v33  ;;  %v8024_v41 = vpop.permute.xlu0 %8023  ;;  %v4381_v34 = vld [vmem:[#allocation3 + $0x1e7] sm:$0xff]  ;;  %v4382_v63 = vld [vmem:[#allocation3 + $0x1ef] sm:$0xff] }
 0x671   : > { %v7999_v4 = vpop.permute.xlu1 %7998  ;;  %v8026_v45 = vunpack.i.h.bf16 %v8024_v41  ;;  %v8025_v50 = vunpack.i.l.bf16 %v8024_v41 }
 0x672   : > { %v8001_v31 = vunpack.i.h.bf16 %v7999_v4  ;;  %v8000_v6 = vunpack.i.l.bf16 %v7999_v4 }
 0x673   : > { %v4777_v4 = vsel %vm295_vm4, %v4381_v34, %v8025_v50 }
 0x674   : > { %v4808_v8 = vsel %vm2093_vm5, %v4771_v7, %v8000_v6  ;;  %v4809_v28 = vsel %vm2093_vm5, %v4772_v46, %v8001_v31  ;;  %v8034_v55 = vpop.permute.xlu0 %8033 }
 0x675   : > { %v8009_v49 = vpop.permute.xlu1 %8008  ;;  %v9768_v39 = vpack.c.bf16 %v4809_v28, %v4808_v8  ;;  %6963 = vmatmul.mubr.msk.bf16.gmra.mrb[4].mxu0 %vm2214_vm6, %v9686_v9  ;;  %v4773_v9 = vsel %vm295_vm4, %v4377_v15, %v8005_v14  ;;  %v8036_v62 = vunpack.i.h.bf16 %v8034_v55  ;;  %v8035_v47 = vunpack.i.l.bf16 %v8034_v55  ;;  %v4386_v8 = vld [vmem:[#allocation3 + $0x22f] sm:$0xff] }
 0x676   : > { %v8011_v21 = vunpack.i.h.bf16 %v8009_v49  ;;  %v8010_v42 = vunpack.i.l.bf16 %v8009_v49  ;;  %6966 = vmatprep.mubr.msk.bf16.mxu0 %vm2214_vm6, %v9684_v40  ;;  %v4810_v40 = vsel %vm2093_vm5, %v4773_v9, %v8015_v30 }
 0x677   : > { %6891 = vmatmul.mubr.msk.bf16.gmra.mrb[20].mxu1 %vm2214_vm6, %v9768_v39  ;;  %v4833_v52 = vpack.c.bf16 %v4811_v57, %v4810_v40  ;;  %v4814_v19 = vsel %vm2093_vm5, %v4777_v4, %v8035_v47 }
 0x678   : > { %v4775_v24 = vsel %vm295_vm4, %v4379_v10, %v8010_v42  ;;  %v4776_v1 = vsel %vm295_vm4, %v4380_v36, %v8011_v21  ;;  %v8044_v5 = vpop.permute.xlu0 %8043 }
 0x679   : > { %v8019_v20 = vpop.permute.xlu1 %8018  ;;  %6894 = vmatprep.mubr.msk.bf16.mxu1 %vm2214_vm6, %v4833_v52  ;;  %v8045_v58 = vunpack.i.l.bf16 %v8044_v5 }
 0x67a   : > { %v8021_v2 = vunpack.i.h.bf16 %v8019_v20  ;;  %v8020_v26 = vunpack.i.l.bf16 %v8019_v20 }
 0x67c   : > { %v4812_v32 = vsel %vm2093_vm5, %v4775_v24, %v8020_v26  ;;  %v4813_v38 = vsel %vm2093_vm5, %v4776_v1, %v8021_v2 }
 0x67d   : > { %v8029_v59 = vpop.permute.xlu1 %8028  ;;  %v4834_v27 = vpack.c.bf16 %v4813_v38, %v4812_v32  ;;  %6967 = vmatmul.mubr.msk.bf16.gmra.mrb[8].mxu0 %vm2214_vm6, %v9717_v44  ;;  %v4778_v44 = vsel %vm295_vm4, %v4382_v63, %v8026_v45 }
 0x67e   : > { %v8031_v56 = vunpack.i.h.bf16 %v8029_v59  ;;  %v8030_v13 = vunpack.i.l.bf16 %v8029_v59  ;;  %6970 = vmatprep.mubr.msk.bf16.mxu0 %vm2214_vm6, %v9715_v25  ;;  %v4815_v7 = vsel %vm2093_vm5, %v4778_v44, %v8036_v62 }
 0x67f   : > { %6895 = vmatmul.mubr.msk.bf16.gmra.mrb[24].mxu1 %vm2214_vm6, %v4834_v27  ;;  %v4835_v48 = vpack.c.bf16 %v4815_v7, %v4814_v19 }
 0x680   : > { %v4779_v60 = vsel %vm295_vm4, %v4383_v17, %v8030_v13  ;;  %v4780_v61 = vsel %vm295_vm4, %v4384_v23, %v8031_v56 }
 0x681   : > { %v8039_v51 = vpop.permute.xlu1 %8038  ;;  %6898 = vmatprep.mubr.msk.bf16.mxu1 %vm2214_vm6, %v4835_v48 }
 0x682   : > { %v8041_v0 = vunpack.i.h.bf16 %v8039_v51  ;;  %v8040_v53 = vunpack.i.l.bf16 %v8039_v51 }
 0x684   : > { %v4816_v31 = vsel %vm2093_vm5, %v4779_v60, %v8040_v53  ;;  %v4817_v6 = vsel %vm2093_vm5, %v4780_v61, %v8041_v0 }
 0x685   : > { %v4836_v46 = vpack.c.bf16 %v4817_v6, %v4816_v31  ;;  %6971 = vmatmul.mubr.msk.bf16.gmra.mrb[12].mxu0 %vm2214_vm6, %v9744_v12 }
 0x686   : > { %6974 = vmatprep.mubr.msk.bf16.mxu0 %vm2214_vm6, %v9742_v16 }
 0x687   : > { %6899 = vmatmul.mubr.msk.bf16.gmra.mrb[28].mxu1 %vm2214_vm6, %v4836_v46 }
 0x688   : > { %6930 = vmatprep.mubr.msk.bf16.mxu1 %vm2214_vm6, %v9715_v25  ;;  %v8046_v25 = vunpack.i.h.bf16 %v8044_v5 }
 0x68a   : > { %v4782_v54 = vsel %vm295_vm4, %v4386_v8, %v8046_v25 }
 0x68d   : > { %6975 = vmatmul.mubr.msk.bf16.gmra.mrb[16].mxu0 %vm2214_vm6, %v9770_v33 }
 0x68e   : > { %6978 = vmatprep.mubr.msk.bf16.mxu0 %vm2214_vm6, %v9768_v39 }
 0x68f   : > { %6931 = vmatmul.mubr.msk.bf16.vlgmr.msra.gmra.mrb[16].mxu1 %vm2214_vm6, %v9744_v12  ;;  %v8049_v12 = vpop.permute.xlu1 %8048 }
 0x690   : > { %6934 = vmatprep.mubr.msk.bf16.mxu1 %vm2214_vm6, %v9742_v16  ;;  %v8051_v28 = vunpack.i.h.bf16 %v8049_v12  ;;  %v8050_v29 = vunpack.i.l.bf16 %v8049_v12  ;;  %v4781_v16 = vsel %vm295_vm4, %v4385_v22, %v8045_v58 }
 0x692   : > { %v4818_v49 = vsel %vm2093_vm5, %v4781_v16, %v8050_v29 }
 0x693   : > { %v5621_v21 = vpop.permute.xlu1 %5620 }
 0x695   : > { %6979 = vmatmul.mubr.msk.bf16.gmra.mrb[20].mxu0 %vm2214_vm6, %v4833_v52 }
 0x696   : > { %6982 = vmatprep.mubr.msk.bf16.mxu0 %vm2214_vm6, %v4834_v27 }
 0x697   : > { %6935 = vmatmul.mubr.msk.bf16.gmra.mrb[20].mxu1 %vm2214_vm6, %v9770_v33  ;;  %v5619_v33 = vpop.permute.xlu0 %5618  ;;  %v5625_v10 = vpop.permute.xlu1 %5624 }
 0x698   : > { %6938 = vmatprep.mubr.msk.bf16.mxu1 %vm2214_vm6, %v9768_v39  ;;  %v4819_v39 = vsel %vm2093_vm5, %v4782_v54, %v8051_v28 }
 0x699   : > { %v4837_v3 = vpack.c.bf16 %v4819_v39, %v4818_v49 }
 0x69b   : > { %v5623_v42 = vpop.permute.xlu0 %5622  ;;  %v5629_v20 = vpop.permute.xlu1 %5628 }
 0x69d   : > { %6983 = vmatmul.mubr.msk.bf16.gmra.mrb[24].mxu0 %vm2214_vm6, %v4835_v48 }
 0x69e   : > { %6986 = vmatprep.mubr.msk.bf16.mxu0 %vm2214_vm6, %v4836_v46 }
 0x69f   : > { %6939 = vmatmul.mubr.msk.bf16.gmra.mrb[24].mxu1 %vm2214_vm6, %v4833_v52  ;;  %v5627_v15 = vpop.permute.xlu0 %5626  ;;  %v5633_v24 = vpop.permute.xlu1 %5632 }
 0x6a0   : > { %6942 = vmatprep.mubr.msk.bf16.mxu1 %vm2214_vm6, %v4834_v27 }
 0x6a3   : > { %v5631_v26 = vpop.permute.xlu0 %5630  ;;  %v9834_v9 = vpop.permute.xlu1 %5636 }
 0x6a5   : > { %6987 = vmatmul.mubr.msk.bf16.gmra.mrb[28].mxu0 %vm2214_vm6, %v4837_v3 }
 0x6a7   : > { %6943 = vmatmul.mubr.msk.bf16.gmra.mrb[28].mxu1 %vm2214_vm6, %v4835_v48  ;;  %v5635_v30 = vpop.permute.xlu0 %5634  ;;  %v5641_v59 = vpop.permute.xlu1 %5640 }
 0x6ab   : > { %v5639_v57 = vpop.permute.xlu0 %5638  ;;  %v9846_v17 = vpop.permute.xlu1 %5644 }
 0x6af   : > { %v9842_v56 = vpop.permute.xlu0 %5642  ;;  %v9848_v0 = vpop.permute.xlu1 %5648 }
 0x6b3   : > { %v5647_v34 = vpop.permute.xlu0 %5646  ;;  %v9860_v6 = vpop.permute.xlu1 %5652 }
 0x6b7   : > { %v9856_v44 = vpop.permute.xlu0 %5650  ;;  %v5657_v16 = vpop.permute.xlu1 %5656 }
 0x6bb   : > { %v5655_v28 = vpop.permute.xlu0 %5654 }
 0x722   : > { %v6872_v36 = vpop.f32.mrb[0].mxu1 }
 0x723   : > { %v4982_v11 = vpop.f32.mrb[1].mxu1 }
 0x724   : > { %v6873_v14 = vpop.f32.mrb[2].mxu1 }
 0x725   : > { %v4985_v18 = vpop.f32.mrb[3].mxu1 }
 0x72a   : > { %v6876_v2 = vpop.f32.mrb[4].mxu1 }
 0x72b   : > { %v4998_v43 = vpop.f32.mrb[5].mxu1 }
 0x72c   : > { %v6877_v1 = vpop.f32.mrb[6].mxu1 }
 0x72d   : > { %v5001_v35 = vpop.f32.mrb[7].mxu1 }
 0x732   : > { %v6880_v37 = vpop.f32.mrb[8].mxu1 }
 0x733   : > { %v5014_v32 = vpop.f32.mrb[9].mxu1 }
 0x734   : > { %v6881_v38 = vpop.f32.mrb[10].mxu1 }
 0x735   : > { %v5017_v40 = vpop.f32.mrb[11].mxu1 }
 0x73a   : > { %v9836_v27 = vpop.f32.mrb[12].mxu1 }
 0x73b   : > { %v9838_v41 = vpop.f32.mrb[13].mxu1 }
 0x73c   : > { %v9840_v52 = vpop.f32.mrb[14].mxu1 }
 0x73d   : > { %v9844_v13 = vpop.f32.mrb[15].mxu1 }
 0x740   : > { %v6960_v23 = vpop.f32.mrb[0].mxu0 }
 0x741   : > { %v7198_v45 = vadd.f32 %v6960_v23, %v6872_v36  ;;  %v5395_v50 = vpop.f32.mrb[1].mxu0  ;;  %v9870_v36 = vpop.permute.xlu0 %5658 }
 0x742   : > { %v7199_v63 = vadd.f32 %v5395_v50, %v4982_v11  ;;  %v6961_v51 = vpop.f32.mrb[2].mxu0 }
 0x743   : > { %v5716_v53 = vadd.f32 %v7198_v45, %v5623_v42  ;;  %v7200_v55 = vadd.f32 %v6961_v51, %v6873_v14  ;;  %v5398_v60 = vpop.f32.mrb[3].mxu0 }
 0x744   : > { %v5714_v61 = vadd.f32 %v7199_v63, %v5619_v33  ;;  %v7201_v62 = vadd.f32 %v5398_v60, %v4985_v18 }
 0x745   : > { %5749 = vst.msk [vmem:[%s8229_s29 + $0x10] sm:$0xff] %vm5746_vm7, %v5716_v53  ;;  %v5717_v47 = vadd.f32 %v7200_v55, %v5625_v10 }
 0x746   : > { %5747 = vst.msk [vmem:[%s8229_s29] sm:$0xff] %vm5746_vm7, %v5714_v61  ;;  %v5715_v4 = vadd.f32 %v7201_v62, %v5621_v21 }
 0x747   : > { %5750 = vst.msk [vmem:[%s8229_s29 + $0x18] sm:$0xff] %vm5746_vm7, %v5717_v47 }
 0x748   : > { %5748 = vst.msk [vmem:[%s8229_s29 + $0x8] sm:$0xff] %vm5746_vm7, %v5715_v4  ;;  %v6964_v31 = vpop.f32.mrb[4].mxu0 }
 0x749   : > { %v7202_v19 = vadd.f32 %v6964_v31, %v6876_v2  ;;  %v5411_v7 = vpop.f32.mrb[5].mxu0 }
 0x74a   : > { %v7203_v46 = vadd.f32 %v5411_v7, %v4998_v43  ;;  %v6965_v48 = vpop.f32.mrb[6].mxu0 }
 0x74b   : > { %v5720_v5 = vadd.f32 %v7202_v19, %v5631_v26  ;;  %v7204_v25 = vadd.f32 %v6965_v48, %v6877_v1  ;;  %v5414_v58 = vpop.f32.mrb[7].mxu0 }
 0x74c   : > { %v5718_v12 = vadd.f32 %v7203_v46, %v5627_v15  ;;  %v7205_v22 = vadd.f32 %v5414_v58, %v5001_v35  ;;  %v9872_v15 = vpop.permute.xlu1 %5660 }
 0x74d   : > { %5753 = vst.msk [vmem:[%s8229_s29 + $0x30] sm:$0xff] %vm5746_vm7, %v5720_v5  ;;  %v5721_v8 = vadd.f32 %v7204_v25, %v5633_v24  ;;  %v5663_v24 = vpop.permute.xlu0 %5662 }
 0x74e   : > { %5751 = vst.msk [vmem:[%s8229_s29 + $0x20] sm:$0xff] %vm5746_vm7, %v5718_v12  ;;  %v5719_v29 = vadd.f32 %v7205_v22, %v5629_v20 }
 0x74f   : > { %5754 = vst.msk [vmem:[%s8229_s29 + $0x38] sm:$0xff] %vm5746_vm7, %v5721_v8 }
 0x750   : > { %5752 = vst.msk [vmem:[%s8229_s29 + $0x28] sm:$0xff] %vm5746_vm7, %v5719_v29  ;;  %v6968_v54 = vpop.f32.mrb[8].mxu0 }
 0x751   : > { %v7206_v49 = vadd.f32 %v6968_v54, %v6880_v37  ;;  %v5427_v39 = vpop.f32.mrb[9].mxu0 }
 0x752   : > { %v7207_v3 = vadd.f32 %v5427_v39, %v5014_v32  ;;  %v6969_v33 = vpop.f32.mrb[10].mxu0 }
 0x753   : > { %v5724_v21 = vadd.f32 %v7206_v49, %v5639_v57  ;;  %v7208_v42 = vadd.f32 %v6969_v33, %v6881_v38  ;;  %v5430_v10 = vpop.f32.mrb[11].mxu0 }
 0x754   : > { %v5722_v11 = vadd.f32 %v7207_v3, %v5635_v30  ;;  %v7209_v14 = vadd.f32 %v5430_v10, %v5017_v40  ;;  %v5665_v30 = vpop.permute.xlu1 %5664 }
 0x755   : > { %5757 = vst.msk [vmem:[%s8229_s29 + $0x50] sm:$0xff] %vm5746_vm7, %v5724_v21  ;;  %v5725_v18 = vadd.f32 %v7208_v42, %v5641_v59 }
 0x756   : > { %5755 = vst.msk [vmem:[%s8229_s29 + $0x40] sm:$0xff] %vm5746_vm7, %v5722_v11  ;;  %v5723_v20 = vadd.f32 %v7209_v14, %v9834_v9 }
 0x757   : > { %5758 = vst.msk [vmem:[%s8229_s29 + $0x58] sm:$0xff] %vm5746_vm7, %v5725_v18 }
 0x758   : > { %5756 = vst.msk [vmem:[%s8229_s29 + $0x48] sm:$0xff] %vm5746_vm7, %v5723_v20  ;;  %v6972_v2 = vpop.f32.mrb[12].mxu0 }
 0x759   : > { %v7210_v26 = vadd.f32 %v6972_v2, %v9836_v27  ;;  %v5443_v43 = vpop.f32.mrb[13].mxu0  ;;  %v5667_v27 = vpop.permute.xlu0 %5666 }
 0x75a   : > { %v7211_v1 = vadd.f32 %v5443_v43, %v9838_v41  ;;  %v6973_v35 = vpop.f32.mrb[14].mxu0 }
 0x75b   : > { %v5728_v37 = vadd.f32 %v7210_v26, %v5647_v34  ;;  %v7212_v32 = vadd.f32 %v6973_v35, %v9840_v52  ;;  %v5446_v9 = vpop.f32.mrb[15].mxu0  ;;  %v5669_v52 = vpop.permute.xlu1 %5668 }
 0x75c   : > { %v5726_v38 = vadd.f32 %v7211_v1, %v9842_v56  ;;  %v7213_v40 = vadd.f32 %v5446_v9, %v9844_v13 }
 0x75d   : > { %5761 = vst.msk [vmem:[%s8229_s29 + $0x70] sm:$0xff] %vm5746_vm7, %v5728_v37  ;;  %v5729_v57 = vadd.f32 %v7212_v32, %v9848_v0  ;;  %v5671_v47 = vpop.permute.xlu0 %5670 }
 0x75e   : > { %5759 = vst.msk [vmem:[%s8229_s29 + $0x60] sm:$0xff] %vm5746_vm7, %v5726_v38  ;;  %v5727_v59 = vadd.f32 %v7213_v40, %v9846_v17 }
 0x75f   : > { %5762 = vst.msk [vmem:[%s8229_s29 + $0x78] sm:$0xff] %vm5746_vm7, %v5729_v57  ;;  %v5673_v31 = vpop.permute.xlu1 %5672 }
 0x760   : > { %5760 = vst.msk [vmem:[%s8229_s29 + $0x68] sm:$0xff] %vm5746_vm7, %v5727_v59  ;;  %v6976_v41 = vpop.f32.mrb[16].mxu0 }
 0x761   : > { %v5459_v23 = vpop.f32.mrb[17].mxu0  ;;  %v5675_v54 = vpop.permute.xlu0 %5674 }
 0x762   : > { %v6932_v56 = vpop.f32.mrb[16].mxu1  ;;  %v6977_v50 = vpop.f32.mrb[18].mxu0 }
 0x763   : > { %v7214_v13 = vadd.f32 %v6976_v41, %v6932_v56  ;;  %v5246_v45 = vpop.f32.mrb[17].mxu1  ;;  %v5462_v51 = vpop.f32.mrb[19].mxu0 }
 0x764   : > { %v7215_v34 = vadd.f32 %v5459_v23, %v5246_v45  ;;  %v6933_v63 = vpop.f32.mrb[18].mxu1  ;;  %v5677_v39 = vpop.permute.xlu1 %5676 }
 0x765   : > { %v5732_v17 = vadd.f32 %v7214_v13, %v5655_v28  ;;  %v7216_v0 = vadd.f32 %v6977_v50, %v6933_v63  ;;  %v5249_v53 = vpop.f32.mrb[19].mxu1  ;;  %v5679_v1 = vpop.permute.xlu0 %5678 }
 0x766   : > { %v5730_v55 = vadd.f32 %v7215_v34, %v9856_v44  ;;  %v7217_v60 = vadd.f32 %v5462_v51, %v5249_v53 }
 0x767   : > { %5765 = vst.msk [vmem:[%s8229_s29 + $0x90] sm:$0xff] %vm5746_vm7, %v5732_v17  ;;  %v5733_v61 = vadd.f32 %v7216_v0, %v5657_v16 }
 0x768   : > { %5763 = vst.msk [vmem:[%s8229_s29 + $0x80] sm:$0xff] %vm5746_vm7, %v5730_v55  ;;  %v5731_v62 = vadd.f32 %v7217_v60, %v9860_v6  ;;  %v6980_v4 = vpop.f32.mrb[20].mxu0 }
 0x769   : > { %5766 = vst.msk [vmem:[%s8229_s29 + $0x98] sm:$0xff] %vm5746_vm7, %v5733_v61  ;;  %v5475_v7 = vpop.f32.mrb[21].mxu0 }
 0x76a   : > { %5764 = vst.msk [vmem:[%s8229_s29 + $0x88] sm:$0xff] %vm5746_vm7, %v5731_v62  ;;  %v6936_v19 = vpop.f32.mrb[20].mxu1  ;;  %v6981_v48 = vpop.f32.mrb[22].mxu0 }
 0x76b   : > { %v7218_v44 = vadd.f32 %v6980_v4, %v6936_v19  ;;  %v5262_v46 = vpop.f32.mrb[21].mxu1  ;;  %v5478_v58 = vpop.f32.mrb[23].mxu0 }
 0x76c   : > { %v7219_v5 = vadd.f32 %v5475_v7, %v5262_v46  ;;  %v6937_v25 = vpop.f32.mrb[22].mxu1 }
 0x76d   : > { %v5736_v6 = vadd.f32 %v7218_v44, %v5663_v24  ;;  %v7220_v12 = vadd.f32 %v6981_v48, %v6937_v25  ;;  %v5265_v22 = vpop.f32.mrb[23].mxu1 }
 0x76e   : > { %v5734_v8 = vadd.f32 %v7219_v5, %v9870_v36  ;;  %v7221_v28 = vadd.f32 %v5478_v58, %v5265_v22 }
 0x76f   : > { %5769 = vst.msk [vmem:[%s8229_s29 + $0xb0] sm:$0xff] %vm5746_vm7, %v5736_v6  ;;  %v5737_v29 = vadd.f32 %v7220_v12, %v5665_v30  ;;  %v5681_v30 = vpop.permute.xlu1 %5680 }
 0x770   : > { %5767 = vst.msk [vmem:[%s8229_s29 + $0xa0] sm:$0xff] %vm5746_vm7, %v5734_v8  ;;  %v5735_v16 = vadd.f32 %v7221_v28, %v9872_v15  ;;  %v6984_v49 = vpop.f32.mrb[24].mxu0 }
 0x771   : > { %5770 = vst.msk [vmem:[%s8229_s29 + $0xb8] sm:$0xff] %vm5746_vm7, %v5737_v29  ;;  %v5491_v33 = vpop.f32.mrb[25].mxu0 }
 0x772   : > { %5768 = vst.msk [vmem:[%s8229_s29 + $0xa8] sm:$0xff] %vm5746_vm7, %v5735_v16  ;;  %v6940_v3 = vpop.f32.mrb[24].mxu1  ;;  %v6985_v10 = vpop.f32.mrb[26].mxu0 }
 0x773   : > { %v7222_v21 = vadd.f32 %v6984_v49, %v6940_v3  ;;  %v5278_v42 = vpop.f32.mrb[25].mxu1  ;;  %v5494_v14 = vpop.f32.mrb[27].mxu0 }
 0x774   : > { %v7223_v36 = vadd.f32 %v5491_v33, %v5278_v42  ;;  %v6941_v11 = vpop.f32.mrb[26].mxu1 }
 0x775   : > { %v5740_v15 = vadd.f32 %v7222_v21, %v5671_v47  ;;  %v7224_v18 = vadd.f32 %v6985_v10, %v6941_v11  ;;  %v5281_v20 = vpop.f32.mrb[27].mxu1 }
 0x776   : > { %v5738_v2 = vadd.f32 %v7223_v36, %v5667_v27  ;;  %v7225_v26 = vadd.f32 %v5494_v14, %v5281_v20 }
 0x777   : > { %5773 = vst.msk [vmem:[%s8229_s29 + $0xd0] sm:$0xff] %vm5746_vm7, %v5740_v15  ;;  %v5741_v43 = vadd.f32 %v7224_v18, %v5673_v31 }
 0x778   : > { %5771 = vst.msk [vmem:[%s8229_s29 + $0xc0] sm:$0xff] %vm5746_vm7, %v5738_v2  ;;  %v5739_v24 = vadd.f32 %v7225_v26, %v5669_v52  ;;  %v6988_v35 = vpop.f32.mrb[28].mxu0 }
 0x779   : > { %5774 = vst.msk [vmem:[%s8229_s29 + $0xd8] sm:$0xff] %vm5746_vm7, %v5741_v43  ;;  %v5507_v32 = vpop.f32.mrb[29].mxu0 }
 0x77a   : > { %5772 = vst.msk [vmem:[%s8229_s29 + $0xc8] sm:$0xff] %vm5746_vm7, %v5739_v24  ;;  %v6944_v37 = vpop.f32.mrb[28].mxu1  ;;  %v6989_v40 = vpop.f32.mrb[30].mxu0 }
 0x77b   : > { %v7226_v9 = vadd.f32 %v6988_v35, %v6944_v37  ;;  %v5294_v38 = vpop.f32.mrb[29].mxu1  ;;  %v5510_v27 = vpop.f32.mrb[31].mxu0 }
 0x77c   : > { %v7227_v57 = vadd.f32 %v5507_v32, %v5294_v38  ;;  %v6945_v59 = vpop.f32.mrb[30].mxu1 }
 0x77d   : > { %v5744_v41 = vadd.f32 %v7226_v9, %v5679_v1  ;;  %v7228_v52 = vadd.f32 %v6989_v40, %v6945_v59  ;;  %v5297_v56 = vpop.f32.mrb[31].mxu1 }
 0x77e   : > { %v5742_v23 = vadd.f32 %v7227_v57, %v5675_v54  ;;  %v7229_v13 = vadd.f32 %v5510_v27, %v5297_v56 }
 0x77f   : > { %5777 = vst.msk [vmem:[%s8229_s29 + $0xf0] sm:$0xff] %vm5746_vm7, %v5744_v41  ;;  %v5745_v45 = vadd.f32 %v7228_v52, %v5681_v30 }
 0x780   : > { %5775 = vst.msk [vmem:[%s8229_s29 + $0xe0] sm:$0xff] %vm5746_vm7, %v5742_v23  ;;  %v5743_v50 = vadd.f32 %v7229_v13, %v5677_v39 }
 0x781   : > { %5778 = vst.msk [vmem:[%s8229_s29 + $0xf8] sm:$0xff] %vm5746_vm7, %v5745_v45 }
 0x782   : > { %5776 = vst.msk [vmem:[%s8229_s29 + $0xe8] sm:$0xff] %vm5746_vm7, %v5743_v50 }
 0x783 PF: > { %s16_s21 = sadd.s32 1, %s8080_s21  }
 0x784   : > { %p13_p5 = scmp.ge.s32.totalorder %s16_s21, 4  }
 0x786   :  { %15 = sbr.rel (!%p13_p5) target bundleno = 1 (0x1), region = 110 }

</bundles_post_ra>
